<compile_context>
chip_gen: v5e
topology: v5e:2x2
jax: 0.10.0
libtpu: 0.0.40
codegen_flags: <defaults>
</compile_context>

<pallas_src>
import functools

import jax
import jax.numpy as jnp
from jax import lax
from jax.experimental import pallas as pl
from jax.experimental.pallas import tpu as pltpu


# ----------------------------------------------------------------------------
# Pallas kernel: one LSTM layer, both directions fused into one time loop
# ----------------------------------------------------------------------------
def _lstm_layer_kernel(x_ref, wih_ref, whh_ref, b_ref, out_ref, hn_ref, xg_ref):
    """x_ref:   (S, B, E)      bf16  full input sequence
       wih_ref: (E, D*4H)      bf16  input weights, all directions, g-cols x2
       whh_ref: (D, H, 4H)     bf16  recurrent weights, g-cols x2
       b_ref:   (1, D*4H)      f32   b_ih + b_hh per direction, g-block x2
       out_ref: (S, B, D*H)    bf16  per-step hidden, directions lane-concat
       hn_ref:  (D, B, H)      f32   final hidden state per direction
       xg_ref:  (S, B, D*4H)   f32   VMEM scratch: precomputed x-projection
    """
    S, B, E = x_ref.shape
    D, H, G = whh_ref.shape            # G == 4*H

    # ---- Bulk input projection: one big MXU matmul, bias folded in --------
    xg = jnp.dot(x_ref[...].reshape(S * B, E), wih_ref[...],
                 preferred_element_type=jnp.float32) + b_ref[...]
    xg_ref[...] = xg.reshape(S, B, D * G)

    # ---- Loop-invariants hoisted out of the recurrence ---------------------
    whh = [whh_ref[d] for d in range(D)]              # few vregs each
    lane = lax.broadcasted_iota(jnp.int32, (B, G), 1)
    g_mask = (lane >= 2 * H) & (lane < 3 * H)         # tanh-gate lanes

    def cell(xg_t, h, c, w):
        # h stays f32; cast to bf16 only as the MXU operand.
        gates = xg_t + jnp.dot(h.astype(w.dtype), w,
                               preferred_element_type=jnp.float32)
        # One sigmoid pass over all gate lanes; g columns were pre-scaled by 2
        # so tanh(z) = 2*sigmoid(2z) - 1 needs no second transcendental.
        s = jax.nn.sigmoid(gates)
        acts = jnp.where(g_mask, 2.0 * s - 1.0, s)
        i_g = acts[:, 0 * H:1 * H]
        f_g = acts[:, 1 * H:2 * H]
        g_g = acts[:, 2 * H:3 * H]
        o_g = acts[:, 3 * H:4 * H]
        c_new = f_g * c + i_g * g_g
        h_new = o_g * jnp.tanh(c_new)
        return h_new, c_new

    def step(t, carry):
        new = []
        for d in range(D):                       # static: fwd & rev interleaved
            h, c = carry[d]
            ti = t if d == 0 else S - 1 - t      # reverse walks time backwards
            h, c = cell(xg_ref[ti, :, d * G:(d + 1) * G], h, c, whh[d])
            out_ref[ti, :, d * H:(d + 1) * H] = h.astype(out_ref.dtype)
            new.append((h, c))
        return tuple(new)

    zeros = jnp.zeros((B, H), jnp.float32)
    init = tuple((zeros, zeros) for _ in range(D))
    final = lax.fori_loop(0, S, step, init, unroll=min(S, 8))
    for d in range(D):
        hn_ref[d] = final[d][0].astype(hn_ref.dtype)


def lstm_layer(x_bf16, wih, whh, b):
    """x_bf16: (S, B, E) bf16; wih: (E, D*4H) bf16; whh: (D, H, 4H) bf16;
       b: (1, D*4H) f32.
       Returns (out, hn): out (S, B, D*H) bf16 (forward time order, directions
       lane-concatenated), hn (D, B, H) f32 final hidden states."""
    S, B, E = x_bf16.shape
    D, H, G = whh.shape
    assert G == 4 * H and wih.shape == (E, D * G) and b.shape == (1, D * G)

    return pl.pallas_call(
        _lstm_layer_kernel,
        out_shape=(
            jax.ShapeDtypeStruct((S, B, D * H), jnp.bfloat16),
            jax.ShapeDtypeStruct((D, B, H), jnp.float32),
        ),
        grid=(1,),
        in_specs=[
            pl.BlockSpec((S, B, E), lambda i: (0, 0, 0)),
            pl.BlockSpec((E, D * G), lambda i: (0, 0)),
            pl.BlockSpec((D, H, G), lambda i: (0, 0, 0)),
            pl.BlockSpec((1, D * G), lambda i: (0, 0)),
        ],
        out_specs=(
            pl.BlockSpec((S, B, D * H), lambda i: (0, 0, 0)),
            pl.BlockSpec((D, B, H), lambda i: (0, 0, 0)),
        ),
        scratch_shapes=[pltpu.VMEM((S, B, D * G), jnp.float32)],
        compiler_params=pltpu.CompilerParams(
            dimension_semantics=("arbitrary",)),
    )(x_bf16, wih, whh, b)


# ----------------------------------------------------------------------------
# Parameter construction (PyTorch-default uniform init) + offline fusion
# ----------------------------------------------------------------------------
def make_params(key, embedding_dim, hidden_dim, output_dim, n_layers,
                bidirectional):
    num_dirs = 2 if bidirectional else 1
    k_lstm = 1.0 / jnp.sqrt(hidden_dim)
    params = {"lstm": []}
    for layer in range(n_layers):
        in_dim = embedding_dim if layer == 0 else hidden_dim * num_dirs
        dirs = []
        for _ in range(num_dirs):
            key, k1, k2, k3, k4 = jax.random.split(key, 5)
            dirs.append(dict(
                w_ih=jax.random.uniform(k1, (4 * hidden_dim, in_dim),
                                        jnp.float32, -k_lstm, k_lstm),
                w_hh=jax.random.uniform(k2, (4 * hidden_dim, hidden_dim),
                                        jnp.float32, -k_lstm, k_lstm),
                b_ih=jax.random.uniform(k3, (4 * hidden_dim,),
                                        jnp.float32, -k_lstm, k_lstm),
                b_hh=jax.random.uniform(k4, (4 * hidden_dim,),
                                        jnp.float32, -k_lstm, k_lstm),
            ))
        params["lstm"].append(dirs)

    fc_in = hidden_dim * n_layers * num_dirs
    k_fc = 1.0 / jnp.sqrt(fc_in)
    key, k1, k2 = jax.random.split(key, 3)
    params["fc_w"] = jax.random.uniform(k1, (output_dim, fc_in),
                                        jnp.float32, -k_fc, k_fc)
    params["fc_b"] = jax.random.uniform(k2, (output_dim,),
                                        jnp.float32, -k_fc, k_fc)
    return params


def fuse_params(params):
    """Transpose/stack weights for the kernel layout, sum biases, pre-scale the
    g-gate block by 2 (tanh(z) = 2*sigmoid(2z)-1 trick), cast MXU operands to
    bf16.  Done once, outside jit."""
    H = params["lstm"][0][0]["w_hh"].shape[1]
    scale = jnp.ones((1, 4 * H), jnp.float32).at[:, 2 * H:3 * H].set(2.0)

    layers = []
    for dirs in params["lstm"]:
        wih_l, whh_l, b_l = [], [], []
        for p in dirs:
            wih_l.append(p["w_ih"].T * scale)                      # (E, 4H)
            whh_l.append(p["w_hh"].T * scale)                      # (H, 4H)
            b_l.append((p["b_ih"] + p["b_hh"]).reshape(1, -1) * scale)
        layers.append({
            "wih": jnp.concatenate(wih_l, axis=-1).astype(jnp.bfloat16),
            "whh": jnp.stack(whh_l, axis=0).astype(jnp.bfloat16),
            "b": jnp.concatenate(b_l, axis=-1).astype(jnp.float32),
        })
    return {"layers": layers,
            "fc_w_t": params["fc_w"].T.astype(jnp.float32),
            "fc_b": params["fc_b"].astype(jnp.float32)}


# ----------------------------------------------------------------------------
# Full forward pass (== RNN.forward with model_name == 'LSTM', eval mode)
# ----------------------------------------------------------------------------
@functools.partial(jax.jit, static_argnums=(2, 3))
def rnn_forward(text, fused, n_layers, bidirectional):
    """text: (B, S, E), batch-first like the PyTorch module."""
    num_dirs = 2 if bidirectional else 1
    # dropout(text) -> identity (eval mode)
    x = jnp.transpose(text, (1, 0, 2)).astype(jnp.bfloat16)    # (S, B, E)

    hn_parts = []   # PyTorch h_n cat order: [l0_fwd, l0_rev, l1_fwd, l1_rev,...]
    for layer in range(n_layers):
        lw = fused["layers"][layer]
        out, hn = lstm_layer(x, lw["wih"], lw["whh"], lw["b"])
        for d in range(num_dirs):
            hn_parts.append(hn[d])                             # (B, H) f32
        x = out                                                # (S, B, D*H) bf16

    hidden_cat = jnp.concatenate(hn_parts, axis=-1)            # (B, H*L*D)
    # dropout(hidden_cat) -> identity (eval mode); tiny FC stays in plain XLA.
    return hidden_cat @ fused["fc_w_t"] + fused["fc_b"]


# ----------------------------------------------------------------------------
# Pure-JAX reference (f32) for a numerical sanity check
# ----------------------------------------------------------------------------
def rnn_ref(text, params, n_layers, bidirectional):
    num_dirs = 2 if bidirectional else 1
    x = jnp.transpose(text, (1, 0, 2)).astype(jnp.float32)     # (S, B, E)
    S, B, _ = x.shape
    hns = []
    for layer in range(n_layers):
        dir_outs = []
        for d in range(num_dirs):
            p = params["lstm"][layer][d]
            H = p["w_hh"].shape[1]
            b = p["b_ih"] + p["b_hh"]
            h = jnp.zeros((B, H)); c = jnp.zeros((B, H))
            outs = [None] * S
            ts = range(S) if d == 0 else range(S - 1, -1, -1)
            for t in ts:
                g = x[t] @ p["w_ih"].T + h @ p["w_hh"].T + b
                i_g = jax.nn.sigmoid(g[:, 0 * H:1 * H])
                f_g = jax.nn.sigmoid(g[:, 1 * H:2 * H])
                g_g = jnp.tanh(g[:, 2 * H:3 * H])
                o_g = jax.nn.sigmoid(g[:, 3 * H:4 * H])
                c = f_g * c + i_g * g_g
                h = o_g * jnp.tanh(c)
                outs[t] = h
            hns.append(h)
            dir_outs.append(jnp.stack(outs, axis=0))
        x = jnp.concatenate(dir_outs, axis=-1)
    hidden_cat = jnp.concatenate(hns, axis=-1)
    return hidden_cat @ params["fc_w"].T + params["fc_b"]


# ----------------------------------------------------------------------------
if __name__ == "__main__":
    model_name = "LSTM"
    batch, seq = 2, 8
    embedding_dim, hidden_dim, output_dim = 16, 32, 4
    n_layers, bidirectional, dropout = 2, True, 0.0

    key = jax.random.PRNGKey(0)
    key, k_x, k_p = jax.random.split(key, 3)
    text = jax.random.normal(k_x, (batch, seq, embedding_dim), jnp.float32)
    params = make_params(k_p, embedding_dim, hidden_dim, output_dim,
                         n_layers, bidirectional)
    fused = fuse_params(params)

    out = rnn_forward(text, fused, n_layers, bidirectional)
    jax.block_until_ready(out)
    assert out.shape == (batch, output_dim), out.shape

    # Loose tolerance: kernel uses bf16 MXU operands (weights + per-step h cast).
    ref = rnn_ref(text, params, n_layers, bidirectional)
    max_err = float(jnp.max(jnp.abs(out - ref)))
    assert max_err < 0.1, f"max abs error vs f32 reference: {max_err}"

    print("KERNEL_OK")
</pallas_src>

<mosaic_0001>
module attributes {stable_mosaic.version = 11 : i64} {
  func.func @_lstm_layer_kernel(%arg0: i32, %arg1: memref<8x2x16xbf16, #tpu.memory_space<vmem>>, %arg2: memref<16x256xbf16, #tpu.memory_space<vmem>>, %arg3: memref<2x32x128xbf16, #tpu.memory_space<vmem>>, %arg4: memref<1x256xf32, #tpu.memory_space<vmem>>, %arg5: memref<8x2x64xbf16, #tpu.memory_space<vmem>>, %arg6: memref<2x2x32xf32, #tpu.memory_space<vmem>>, %arg7: memref<8x2x256xf32, #tpu.memory_space<vmem>>) attributes {dimension_semantics = [#tpu.dimension_semantics<arbitrary>], iteration_bounds = array<i64: 1>, scalar_prefetch = 0 : i64, scratch_operands = 1 : i64, tpu.core_type = #tpu.core_type<tc>, window_params = [{pipeline_mode = #tpu.pipeline_mode<synchronous>, transform_indices = @transform_0, window_bounds = array<i64: 8, 2, 16>}, {pipeline_mode = #tpu.pipeline_mode<synchronous>, transform_indices = @transform_1, window_bounds = array<i64: 16, 256>}, {pipeline_mode = #tpu.pipeline_mode<synchronous>, transform_indices = @transform_2, window_bounds = array<i64: 2, 32, 128>}, {pipeline_mode = #tpu.pipeline_mode<synchronous>, transform_indices = @transform_3, window_bounds = array<i64: 1, 256>}, {pipeline_mode = #tpu.pipeline_mode<synchronous>, transform_indices = @transform_4, window_bounds = array<i64: 8, 2, 64>}, {pipeline_mode = #tpu.pipeline_mode<synchronous>, transform_indices = @transform_5, window_bounds = array<i64: 2, 2, 32>}]} {
    %c0 = arith.constant 0 : index
    %c0_0 = arith.constant 0 : index
    %c0_1 = arith.constant 0 : index
    %0 = vector.load %arg1[%c0, %c0_0, %c0_1] : memref<8x2x16xbf16, #tpu.memory_space<vmem>>, vector<8x2x16xbf16>
    %1 = vector.shape_cast %0 : vector<8x2x16xbf16> to vector<16x16xbf16>
    %c0_2 = arith.constant 0 : index
    %c0_3 = arith.constant 0 : index
    %2 = vector.load %arg2[%c0_2, %c0_3] : memref<16x256xbf16, #tpu.memory_space<vmem>>, vector<16x256xbf16>
    %cst = arith.constant dense<0.000000e+00> : vector<16x256xf32>
    %3 = tpu.matmul %1, %2, %cst {dimension_numbers = #tpu.dot_dimension_numbers<[1], [0], [0], [1], [0, 0, 1, 1], [], []>} : vector<16x16xbf16>, vector<16x256xbf16>, vector<16x256xf32> -> vector<16x256xf32>
    %c0_4 = arith.constant 0 : index
    %c0_5 = arith.constant 0 : index
    %4 = vector.load %arg4[%c0_4, %c0_5] : memref<1x256xf32, #tpu.memory_space<vmem>>, vector<1x256xf32>
    %5 = vector.broadcast %4 : vector<1x256xf32> to vector<16x256xf32>
    %6 = arith.addf %3, %5 : vector<16x256xf32>
    %7 = vector.shape_cast %6 : vector<16x256xf32> to vector<8x2x256xf32>
    %c0_6 = arith.constant 0 : index
    %c0_7 = arith.constant 0 : index
    %c0_8 = arith.constant 0 : index
    %8 = vector.load %arg7[%c0_6, %c0_7, %c0_8] : memref<8x2x256xf32, #tpu.memory_space<vmem>>, vector<8x2x256xf32>
    tpu.vector_store %arg7[%c0_6, %c0_7, %c0_8], %7 {strides = array<i32>} : memref<8x2x256xf32, #tpu.memory_space<vmem>>, vector<8x2x256xf32>,
    %c0_9 = arith.constant 0 : index
    %c0_10 = arith.constant 0 : index
    %c0_11 = arith.constant 0 : index
    %9 = vector.load %arg3[%c0_9, %c0_10, %c0_11] : memref<2x32x128xbf16, #tpu.memory_space<vmem>>, vector<1x32x128xbf16>
    %10 = vector.shape_cast %9 : vector<1x32x128xbf16> to vector<32x128xbf16>
    %c1 = arith.constant 1 : index
    %c0_12 = arith.constant 0 : index
    %c0_13 = arith.constant 0 : index
    %11 = vector.load %arg3[%c1, %c0_12, %c0_13] : memref<2x32x128xbf16, #tpu.memory_space<vmem>>, vector<1x32x128xbf16>
    %12 = vector.shape_cast %11 : vector<1x32x128xbf16> to vector<32x128xbf16>
    %13 = tpu.iota {dimensions = array<i32: 1>} : vector<2x128xi32>
    %c64_i32 = arith.constant 64 : i32
    %14 = vector.broadcast %c64_i32 : i32 to vector<2x128xi32>
    %15 = arith.cmpi sge, %13, %14 : vector<2x128xi32>
    %c96_i32 = arith.constant 96 : i32
    %16 = vector.broadcast %c96_i32 : i32 to vector<2x128xi32>
    %17 = arith.cmpi slt, %13, %16 : vector<2x128xi32>
    %18 = arith.andi %15, %17 : vector<2x128xi1>
    %cst_14 = arith.constant 0.000000e+00 : f32
    %19 = vector.broadcast %cst_14 : f32 to vector<2x32xf32>
    %c0_i32 = arith.constant 0 : i32
    %20 = arith.index_cast %c0_i32 : i32 to index
    %c0_15 = arith.constant 0 : index
    %c0_16 = arith.constant 0 : index
    %21 = vector.load %arg7[%20, %c0_15, %c0_16] : memref<8x2x256xf32, #tpu.memory_space<vmem>>, vector<1x2x128xf32>
    %22 = vector.shape_cast %21 : vector<1x2x128xf32> to vector<2x128xf32>
    %23 = arith.truncf %19 : vector<2x32xf32> to vector<2x32xbf16>
    %cst_17 = arith.constant dense<0.000000e+00> : vector<2x128xf32>
    %24 = tpu.matmul %23, %10, %cst_17 {dimension_numbers = #tpu.dot_dimension_numbers<[1], [0], [0], [1], [0, 0, 1, 1], [], []>} : vector<2x32xbf16>, vector<32x128xbf16>, vector<2x128xf32> -> vector<2x128xf32>
    %25 = arith.addf %22, %24 : vector<2x128xf32>
    %26 = arith.negf %25 : vector<2x128xf32>
    %27 = math.exp %26 : vector<2x128xf32>
    %cst_18 = arith.constant 1.000000e+00 : f32
    %28 = vector.broadcast %cst_18 : f32 to vector<2x128xf32>
    %29 = arith.addf %28, %27 : vector<2x128xf32>
    %30 = arith.divf %28, %29 : vector<2x128xf32>
    %cst_19 = arith.constant 2.000000e+00 : f32
    %31 = vector.broadcast %cst_19 : f32 to vector<2x128xf32>
    %32 = arith.mulf %31, %30 : vector<2x128xf32>
    %cst_20 = arith.constant 1.000000e+00 : f32
    %33 = vector.broadcast %cst_20 : f32 to vector<2x128xf32>
    %34 = arith.subf %32, %33 : vector<2x128xf32>
    %35 = arith.select %18, %34, %30 : vector<2x128xi1>, vector<2x128xf32>
    %36 = vector.extract_strided_slice %35 {offsets = [0, 0], sizes = [2, 32], strides = [1, 1]} : vector<2x128xf32> to vector<2x32xf32>
    %37 = vector.extract_strided_slice %35 {offsets = [0, 32], sizes = [2, 32], strides = [1, 1]} : vector<2x128xf32> to vector<2x32xf32>
    %38 = vector.extract_strided_slice %35 {offsets = [0, 64], sizes = [2, 32], strides = [1, 1]} : vector<2x128xf32> to vector<2x32xf32>
    %39 = vector.extract_strided_slice %35 {offsets = [0, 96], sizes = [2, 32], strides = [1, 1]} : vector<2x128xf32> to vector<2x32xf32>
    %40 = arith.mulf %37, %19 : vector<2x32xf32>
    %41 = arith.mulf %36, %38 : vector<2x32xf32>
    %42 = arith.addf %40, %41 : vector<2x32xf32>
    %43 = math.tanh %42 : vector<2x32xf32>
    %44 = arith.mulf %39, %43 : vector<2x32xf32>
    %45 = arith.truncf %44 : vector<2x32xf32> to vector<2x32xbf16>
    %46 = arith.index_cast %c0_i32 : i32 to index
    %c0_21 = arith.constant 0 : index
    %c0_22 = arith.constant 0 : index
    %47 = vector.load %arg5[%46, %c0_21, %c0_22] : memref<8x2x64xbf16, #tpu.memory_space<vmem>>, vector<1x2x32xbf16>
    %48 = vector.shape_cast %47 : vector<1x2x32xbf16> to vector<2x32xbf16>
    %49 = vector.shape_cast %45 : vector<2x32xbf16> to vector<1x2x32xbf16>
    tpu.vector_store %arg5[%46, %c0_21, %c0_22], %49 {strides = array<i32>} : memref<8x2x64xbf16, #tpu.memory_space<vmem>>, vector<1x2x32xbf16>,
    %c7_i32 = arith.constant 7 : i32
    %50 = arith.subi %c7_i32, %c0_i32 : i32
    %51 = arith.index_cast %50 : i32 to index
    %c0_23 = arith.constant 0 : index
    %c128 = arith.constant 128 : index
    %52 = vector.load %arg7[%51, %c0_23, %c128] : memref<8x2x256xf32, #tpu.memory_space<vmem>>, vector<1x2x128xf32>
    %53 = vector.shape_cast %52 : vector<1x2x128xf32> to vector<2x128xf32>
    %54 = arith.truncf %19 : vector<2x32xf32> to vector<2x32xbf16>
    %cst_24 = arith.constant dense<0.000000e+00> : vector<2x128xf32>
    %55 = tpu.matmul %54, %12, %cst_24 {dimension_numbers = #tpu.dot_dimension_numbers<[1], [0], [0], [1], [0, 0, 1, 1], [], []>} : vector<2x32xbf16>, vector<32x128xbf16>, vector<2x128xf32> -> vector<2x128xf32>
    %56 = arith.addf %53, %55 : vector<2x128xf32>
    %57 = arith.negf %56 : vector<2x128xf32>
    %58 = math.exp %57 : vector<2x128xf32>
    %cst_25 = arith.constant 1.000000e+00 : f32
    %59 = vector.broadcast %cst_25 : f32 to vector<2x128xf32>
    %60 = arith.addf %59, %58 : vector<2x128xf32>
    %61 = arith.divf %59, %60 : vector<2x128xf32>
    %cst_26 = arith.constant 2.000000e+00 : f32
    %62 = vector.broadcast %cst_26 : f32 to vector<2x128xf32>
    %63 = arith.mulf %62, %61 : vector<2x128xf32>
    %cst_27 = arith.constant 1.000000e+00 : f32
    %64 = vector.broadcast %cst_27 : f32 to vector<2x128xf32>
    %65 = arith.subf %63, %64 : vector<2x128xf32>
    %66 = arith.select %18, %65, %61 : vector<2x128xi1>, vector<2x128xf32>
    %67 = vector.extract_strided_slice %66 {offsets = [0, 0], sizes = [2, 32], strides = [1, 1]} : vector<2x128xf32> to vector<2x32xf32>
    %68 = vector.extract_strided_slice %66 {offsets = [0, 32], sizes = [2, 32], strides = [1, 1]} : vector<2x128xf32> to vector<2x32xf32>
    %69 = vector.extract_strided_slice %66 {offsets = [0, 64], sizes = [2, 32], strides = [1, 1]} : vector<2x128xf32> to vector<2x32xf32>
    %70 = vector.extract_strided_slice %66 {offsets = [0, 96], sizes = [2, 32], strides = [1, 1]} : vector<2x128xf32> to vector<2x32xf32>
    %71 = arith.mulf %68, %19 : vector<2x32xf32>
    %72 = arith.mulf %67, %69 : vector<2x32xf32>
    %73 = arith.addf %71, %72 : vector<2x32xf32>
    %74 = math.tanh %73 : vector<2x32xf32>
    %75 = arith.mulf %70, %74 : vector<2x32xf32>
    %76 = arith.truncf %75 : vector<2x32xf32> to vector<2x32xbf16>
    %77 = arith.index_cast %50 : i32 to index
    %c0_28 = arith.constant 0 : index
    %c32 = arith.constant 32 : index
    %78 = vector.load %arg5[%77, %c0_28, %c32] : memref<8x2x64xbf16, #tpu.memory_space<vmem>>, vector<1x2x32xbf16>
    %79 = vector.shape_cast %78 : vector<1x2x32xbf16> to vector<2x32xbf16>
    %80 = vector.shape_cast %76 : vector<2x32xbf16> to vector<1x2x32xbf16>
    tpu.vector_store %arg5[%77, %c0_28, %c32], %80 {strides = array<i32>} : memref<8x2x64xbf16, #tpu.memory_space<vmem>>, vector<1x2x32xbf16>,
    %c1_i32 = arith.constant 1 : i32
    %81 = arith.index_cast %c1_i32 : i32 to index
    %c0_29 = arith.constant 0 : index
    %c0_30 = arith.constant 0 : index
    %82 = vector.load %arg7[%81, %c0_29, %c0_30] : memref<8x2x256xf32, #tpu.memory_space<vmem>>, vector<1x2x128xf32>
    %83 = vector.shape_cast %82 : vector<1x2x128xf32> to vector<2x128xf32>
    %84 = arith.truncf %44 : vector<2x32xf32> to vector<2x32xbf16>
    %cst_31 = arith.constant dense<0.000000e+00> : vector<2x128xf32>
    %85 = tpu.matmul %84, %10, %cst_31 {dimension_numbers = #tpu.dot_dimension_numbers<[1], [0], [0], [1], [0, 0, 1, 1], [], []>} : vector<2x32xbf16>, vector<32x128xbf16>, vector<2x128xf32> -> vector<2x128xf32>
    %86 = arith.addf %83, %85 : vector<2x128xf32>
    %87 = arith.negf %86 : vector<2x128xf32>
    %88 = math.exp %87 : vector<2x128xf32>
    %cst_32 = arith.constant 1.000000e+00 : f32
    %89 = vector.broadcast %cst_32 : f32 to vector<2x128xf32>
    %90 = arith.addf %89, %88 : vector<2x128xf32>
    %91 = arith.divf %89, %90 : vector<2x128xf32>
    %cst_33 = arith.constant 2.000000e+00 : f32
    %92 = vector.broadcast %cst_33 : f32 to vector<2x128xf32>
    %93 = arith.mulf %92, %91 : vector<2x128xf32>
    %cst_34 = arith.constant 1.000000e+00 : f32
    %94 = vector.broadcast %cst_34 : f32 to vector<2x128xf32>
    %95 = arith.subf %93, %94 : vector<2x128xf32>
    %96 = arith.select %18, %95, %91 : vector<2x128xi1>, vector<2x128xf32>
    %97 = vector.extract_strided_slice %96 {offsets = [0, 0], sizes = [2, 32], strides = [1, 1]} : vector<2x128xf32> to vector<2x32xf32>
    %98 = vector.extract_strided_slice %96 {offsets = [0, 32], sizes = [2, 32], strides = [1, 1]} : vector<2x128xf32> to vector<2x32xf32>
    %99 = vector.extract_strided_slice %96 {offsets = [0, 64], sizes = [2, 32], strides = [1, 1]} : vector<2x128xf32> to vector<2x32xf32>
    %100 = vector.extract_strided_slice %96 {offsets = [0, 96], sizes = [2, 32], strides = [1, 1]} : vector<2x128xf32> to vector<2x32xf32>
    %101 = arith.mulf %98, %42 : vector<2x32xf32>
    %102 = arith.mulf %97, %99 : vector<2x32xf32>
    %103 = arith.addf %101, %102 : vector<2x32xf32>
    %104 = math.tanh %103 : vector<2x32xf32>
    %105 = arith.mulf %100, %104 : vector<2x32xf32>
    %106 = arith.truncf %105 : vector<2x32xf32> to vector<2x32xbf16>
    %107 = arith.index_cast %c1_i32 : i32 to index
    %c0_35 = arith.constant 0 : index
    %c0_36 = arith.constant 0 : index
    %108 = vector.load %arg5[%107, %c0_35, %c0_36] : memref<8x2x64xbf16, #tpu.memory_space<vmem>>, vector<1x2x32xbf16>
    %109 = vector.shape_cast %108 : vector<1x2x32xbf16> to vector<2x32xbf16>
    %110 = vector.shape_cast %106 : vector<2x32xbf16> to vector<1x2x32xbf16>
    tpu.vector_store %arg5[%107, %c0_35, %c0_36], %110 {strides = array<i32>} : memref<8x2x64xbf16, #tpu.memory_space<vmem>>, vector<1x2x32xbf16>,
    %c7_i32_37 = arith.constant 7 : i32
    %111 = arith.subi %c7_i32_37, %c1_i32 : i32
    %112 = arith.index_cast %111 : i32 to index
    %c0_38 = arith.constant 0 : index
    %c128_39 = arith.constant 128 : index
    %113 = vector.load %arg7[%112, %c0_38, %c128_39] : memref<8x2x256xf32, #tpu.memory_space<vmem>>, vector<1x2x128xf32>
    %114 = vector.shape_cast %113 : vector<1x2x128xf32> to vector<2x128xf32>
    %115 = arith.truncf %75 : vector<2x32xf32> to vector<2x32xbf16>
    %cst_40 = arith.constant dense<0.000000e+00> : vector<2x128xf32>
    %116 = tpu.matmul %115, %12, %cst_40 {dimension_numbers = #tpu.dot_dimension_numbers<[1], [0], [0], [1], [0, 0, 1, 1], [], []>} : vector<2x32xbf16>, vector<32x128xbf16>, vector<2x128xf32> -> vector<2x128xf32>
    %117 = arith.addf %114, %116 : vector<2x128xf32>
    %118 = arith.negf %117 : vector<2x128xf32>
    %119 = math.exp %118 : vector<2x128xf32>
    %cst_41 = arith.constant 1.000000e+00 : f32
    %120 = vector.broadcast %cst_41 : f32 to vector<2x128xf32>
    %121 = arith.addf %120, %119 : vector<2x128xf32>
    %122 = arith.divf %120, %121 : vector<2x128xf32>
    %cst_42 = arith.constant 2.000000e+00 : f32
    %123 = vector.broadcast %cst_42 : f32 to vector<2x128xf32>
    %124 = arith.mulf %123, %122 : vector<2x128xf32>
    %cst_43 = arith.constant 1.000000e+00 : f32
    %125 = vector.broadcast %cst_43 : f32 to vector<2x128xf32>
    %126 = arith.subf %124, %125 : vector<2x128xf32>
    %127 = arith.select %18, %126, %122 : vector<2x128xi1>, vector<2x128xf32>
    %128 = vector.extract_strided_slice %127 {offsets = [0, 0], sizes = [2, 32], strides = [1, 1]} : vector<2x128xf32> to vector<2x32xf32>
    %129 = vector.extract_strided_slice %127 {offsets = [0, 32], sizes = [2, 32], strides = [1, 1]} : vector<2x128xf32> to vector<2x32xf32>
    %130 = vector.extract_strided_slice %127 {offsets = [0, 64], sizes = [2, 32], strides = [1, 1]} : vector<2x128xf32> to vector<2x32xf32>
    %131 = vector.extract_strided_slice %127 {offsets = [0, 96], sizes = [2, 32], strides = [1, 1]} : vector<2x128xf32> to vector<2x32xf32>
    %132 = arith.mulf %129, %73 : vector<2x32xf32>
    %133 = arith.mulf %128, %130 : vector<2x32xf32>
    %134 = arith.addf %132, %133 : vector<2x32xf32>
    %135 = math.tanh %134 : vector<2x32xf32>
    %136 = arith.mulf %131, %135 : vector<2x32xf32>
    %137 = arith.truncf %136 : vector<2x32xf32> to vector<2x32xbf16>
    %138 = arith.index_cast %111 : i32 to index
    %c0_44 = arith.constant 0 : index
    %c32_45 = arith.constant 32 : index
    %139 = vector.load %arg5[%138, %c0_44, %c32_45] : memref<8x2x64xbf16, #tpu.memory_space<vmem>>, vector<1x2x32xbf16>
    %140 = vector.shape_cast %139 : vector<1x2x32xbf16> to vector<2x32xbf16>
    %141 = vector.shape_cast %137 : vector<2x32xbf16> to vector<1x2x32xbf16>
    tpu.vector_store %arg5[%138, %c0_44, %c32_45], %141 {strides = array<i32>} : memref<8x2x64xbf16, #tpu.memory_space<vmem>>, vector<1x2x32xbf16>,
    %c2_i32 = arith.constant 2 : i32
    %142 = arith.index_cast %c2_i32 : i32 to index
    %c0_46 = arith.constant 0 : index
    %c0_47 = arith.constant 0 : index
    %143 = vector.load %arg7[%142, %c0_46, %c0_47] : memref<8x2x256xf32, #tpu.memory_space<vmem>>, vector<1x2x128xf32>
    %144 = vector.shape_cast %143 : vector<1x2x128xf32> to vector<2x128xf32>
    %145 = arith.truncf %105 : vector<2x32xf32> to vector<2x32xbf16>
    %cst_48 = arith.constant dense<0.000000e+00> : vector<2x128xf32>
    %146 = tpu.matmul %145, %10, %cst_48 {dimension_numbers = #tpu.dot_dimension_numbers<[1], [0], [0], [1], [0, 0, 1, 1], [], []>} : vector<2x32xbf16>, vector<32x128xbf16>, vector<2x128xf32> -> vector<2x128xf32>
    %147 = arith.addf %144, %146 : vector<2x128xf32>
    %148 = arith.negf %147 : vector<2x128xf32>
    %149 = math.exp %148 : vector<2x128xf32>
    %cst_49 = arith.constant 1.000000e+00 : f32
    %150 = vector.broadcast %cst_49 : f32 to vector<2x128xf32>
    %151 = arith.addf %150, %149 : vector<2x128xf32>
    %152 = arith.divf %150, %151 : vector<2x128xf32>
    %cst_50 = arith.constant 2.000000e+00 : f32
    %153 = vector.broadcast %cst_50 : f32 to vector<2x128xf32>
    %154 = arith.mulf %153, %152 : vector<2x128xf32>
    %cst_51 = arith.constant 1.000000e+00 : f32
    %155 = vector.broadcast %cst_51 : f32 to vector<2x128xf32>
    %156 = arith.subf %154, %155 : vector<2x128xf32>
    %157 = arith.select %18, %156, %152 : vector<2x128xi1>, vector<2x128xf32>
    %158 = vector.extract_strided_slice %157 {offsets = [0, 0], sizes = [2, 32], strides = [1, 1]} : vector<2x128xf32> to vector<2x32xf32>
    %159 = vector.extract_strided_slice %157 {offsets = [0, 32], sizes = [2, 32], strides = [1, 1]} : vector<2x128xf32> to vector<2x32xf32>
    %160 = vector.extract_strided_slice %157 {offsets = [0, 64], sizes = [2, 32], strides = [1, 1]} : vector<2x128xf32> to vector<2x32xf32>
    %161 = vector.extract_strided_slice %157 {offsets = [0, 96], sizes = [2, 32], strides = [1, 1]} : vector<2x128xf32> to vector<2x32xf32>
    %162 = arith.mulf %159, %103 : vector<2x32xf32>
    %163 = arith.mulf %158, %160 : vector<2x32xf32>
    %164 = arith.addf %162, %163 : vector<2x32xf32>
    %165 = math.tanh %164 : vector<2x32xf32>
    %166 = arith.mulf %161, %165 : vector<2x32xf32>
    %167 = arith.truncf %166 : vector<2x32xf32> to vector<2x32xbf16>
    %168 = arith.index_cast %c2_i32 : i32 to index
    %c0_52 = arith.constant 0 : index
    %c0_53 = arith.constant 0 : index
    %169 = vector.load %arg5[%168, %c0_52, %c0_53] : memref<8x2x64xbf16, #tpu.memory_space<vmem>>, vector<1x2x32xbf16>
    %170 = vector.shape_cast %169 : vector<1x2x32xbf16> to vector<2x32xbf16>
    %171 = vector.shape_cast %167 : vector<2x32xbf16> to vector<1x2x32xbf16>
    tpu.vector_store %arg5[%168, %c0_52, %c0_53], %171 {strides = array<i32>} : memref<8x2x64xbf16, #tpu.memory_space<vmem>>, vector<1x2x32xbf16>,
    %c7_i32_54 = arith.constant 7 : i32
    %172 = arith.subi %c7_i32_54, %c2_i32 : i32
    %173 = arith.index_cast %172 : i32 to index
    %c0_55 = arith.constant 0 : index
    %c128_56 = arith.constant 128 : index
    %174 = vector.load %arg7[%173, %c0_55, %c128_56] : memref<8x2x256xf32, #tpu.memory_space<vmem>>, vector<1x2x128xf32>
    %175 = vector.shape_cast %174 : vector<1x2x128xf32> to vector<2x128xf32>
    %176 = arith.truncf %136 : vector<2x32xf32> to vector<2x32xbf16>
    %cst_57 = arith.constant dense<0.000000e+00> : vector<2x128xf32>
    %177 = tpu.matmul %176, %12, %cst_57 {dimension_numbers = #tpu.dot_dimension_numbers<[1], [0], [0], [1], [0, 0, 1, 1], [], []>} : vector<2x32xbf16>, vector<32x128xbf16>, vector<2x128xf32> -> vector<2x128xf32>
    %178 = arith.addf %175, %177 : vector<2x128xf32>
    %179 = arith.negf %178 : vector<2x128xf32>
    %180 = math.exp %179 : vector<2x128xf32>
    %cst_58 = arith.constant 1.000000e+00 : f32
    %181 = vector.broadcast %cst_58 : f32 to vector<2x128xf32>
    %182 = arith.addf %181, %180 : vector<2x128xf32>
    %183 = arith.divf %181, %182 : vector<2x128xf32>
    %cst_59 = arith.constant 2.000000e+00 : f32
    %184 = vector.broadcast %cst_59 : f32 to vector<2x128xf32>
    %185 = arith.mulf %184, %183 : vector<2x128xf32>
    %cst_60 = arith.constant 1.000000e+00 : f32
    %186 = vector.broadcast %cst_60 : f32 to vector<2x128xf32>
    %187 = arith.subf %185, %186 : vector<2x128xf32>
    %188 = arith.select %18, %187, %183 : vector<2x128xi1>, vector<2x128xf32>
    %189 = vector.extract_strided_slice %188 {offsets = [0, 0], sizes = [2, 32], strides = [1, 1]} : vector<2x128xf32> to vector<2x32xf32>
    %190 = vector.extract_strided_slice %188 {offsets = [0, 32], sizes = [2, 32], strides = [1, 1]} : vector<2x128xf32> to vector<2x32xf32>
    %191 = vector.extract_strided_slice %188 {offsets = [0, 64], sizes = [2, 32], strides = [1, 1]} : vector<2x128xf32> to vector<2x32xf32>
    %192 = vector.extract_strided_slice %188 {offsets = [0, 96], sizes = [2, 32], strides = [1, 1]} : vector<2x128xf32> to vector<2x32xf32>
    %193 = arith.mulf %190, %134 : vector<2x32xf32>
    %194 = arith.mulf %189, %191 : vector<2x32xf32>
    %195 = arith.addf %193, %194 : vector<2x32xf32>
    %196 = math.tanh %195 : vector<2x32xf32>
    %197 = arith.mulf %192, %196 : vector<2x32xf32>
    %198 = arith.truncf %197 : vector<2x32xf32> to vector<2x32xbf16>
    %199 = arith.index_cast %172 : i32 to index
    %c0_61 = arith.constant 0 : index
    %c32_62 = arith.constant 32 : index
    %200 = vector.load %arg5[%199, %c0_61, %c32_62] : memref<8x2x64xbf16, #tpu.memory_space<vmem>>, vector<1x2x32xbf16>
    %201 = vector.shape_cast %200 : vector<1x2x32xbf16> to vector<2x32xbf16>
    %202 = vector.shape_cast %198 : vector<2x32xbf16> to vector<1x2x32xbf16>
    tpu.vector_store %arg5[%199, %c0_61, %c32_62], %202 {strides = array<i32>} : memref<8x2x64xbf16, #tpu.memory_space<vmem>>, vector<1x2x32xbf16>,
    %c3_i32 = arith.constant 3 : i32
    %203 = arith.index_cast %c3_i32 : i32 to index
    %c0_63 = arith.constant 0 : index
    %c0_64 = arith.constant 0 : index
    %204 = vector.load %arg7[%203, %c0_63, %c0_64] : memref<8x2x256xf32, #tpu.memory_space<vmem>>, vector<1x2x128xf32>
    %205 = vector.shape_cast %204 : vector<1x2x128xf32> to vector<2x128xf32>
    %206 = arith.truncf %166 : vector<2x32xf32> to vector<2x32xbf16>
    %cst_65 = arith.constant dense<0.000000e+00> : vector<2x128xf32>
    %207 = tpu.matmul %206, %10, %cst_65 {dimension_numbers = #tpu.dot_dimension_numbers<[1], [0], [0], [1], [0, 0, 1, 1], [], []>} : vector<2x32xbf16>, vector<32x128xbf16>, vector<2x128xf32> -> vector<2x128xf32>
    %208 = arith.addf %205, %207 : vector<2x128xf32>
    %209 = arith.negf %208 : vector<2x128xf32>
    %210 = math.exp %209 : vector<2x128xf32>
    %cst_66 = arith.constant 1.000000e+00 : f32
    %211 = vector.broadcast %cst_66 : f32 to vector<2x128xf32>
    %212 = arith.addf %211, %210 : vector<2x128xf32>
    %213 = arith.divf %211, %212 : vector<2x128xf32>
    %cst_67 = arith.constant 2.000000e+00 : f32
    %214 = vector.broadcast %cst_67 : f32 to vector<2x128xf32>
    %215 = arith.mulf %214, %213 : vector<2x128xf32>
    %cst_68 = arith.constant 1.000000e+00 : f32
    %216 = vector.broadcast %cst_68 : f32 to vector<2x128xf32>
    %217 = arith.subf %215, %216 : vector<2x128xf32>
    %218 = arith.select %18, %217, %213 : vector<2x128xi1>, vector<2x128xf32>
    %219 = vector.extract_strided_slice %218 {offsets = [0, 0], sizes = [2, 32], strides = [1, 1]} : vector<2x128xf32> to vector<2x32xf32>
    %220 = vector.extract_strided_slice %218 {offsets = [0, 32], sizes = [2, 32], strides = [1, 1]} : vector<2x128xf32> to vector<2x32xf32>
    %221 = vector.extract_strided_slice %218 {offsets = [0, 64], sizes = [2, 32], strides = [1, 1]} : vector<2x128xf32> to vector<2x32xf32>
    %222 = vector.extract_strided_slice %218 {offsets = [0, 96], sizes = [2, 32], strides = [1, 1]} : vector<2x128xf32> to vector<2x32xf32>
    %223 = arith.mulf %220, %164 : vector<2x32xf32>
    %224 = arith.mulf %219, %221 : vector<2x32xf32>
    %225 = arith.addf %223, %224 : vector<2x32xf32>
    %226 = math.tanh %225 : vector<2x32xf32>
    %227 = arith.mulf %222, %226 : vector<2x32xf32>
    %228 = arith.truncf %227 : vector<2x32xf32> to vector<2x32xbf16>
    %229 = arith.index_cast %c3_i32 : i32 to index
    %c0_69 = arith.constant 0 : index
    %c0_70 = arith.constant 0 : index
    %230 = vector.load %arg5[%229, %c0_69, %c0_70] : memref<8x2x64xbf16, #tpu.memory_space<vmem>>, vector<1x2x32xbf16>
    %231 = vector.shape_cast %230 : vector<1x2x32xbf16> to vector<2x32xbf16>
    %232 = vector.shape_cast %228 : vector<2x32xbf16> to vector<1x2x32xbf16>
    tpu.vector_store %arg5[%229, %c0_69, %c0_70], %232 {strides = array<i32>} : memref<8x2x64xbf16, #tpu.memory_space<vmem>>, vector<1x2x32xbf16>,
    %c7_i32_71 = arith.constant 7 : i32
    %233 = arith.subi %c7_i32_71, %c3_i32 : i32
    %234 = arith.index_cast %233 : i32 to index
    %c0_72 = arith.constant 0 : index
    %c128_73 = arith.constant 128 : index
    %235 = vector.load %arg7[%234, %c0_72, %c128_73] : memref<8x2x256xf32, #tpu.memory_space<vmem>>, vector<1x2x128xf32>
    %236 = vector.shape_cast %235 : vector<1x2x128xf32> to vector<2x128xf32>
    %237 = arith.truncf %197 : vector<2x32xf32> to vector<2x32xbf16>
    %cst_74 = arith.constant dense<0.000000e+00> : vector<2x128xf32>
    %238 = tpu.matmul %237, %12, %cst_74 {dimension_numbers = #tpu.dot_dimension_numbers<[1], [0], [0], [1], [0, 0, 1, 1], [], []>} : vector<2x32xbf16>, vector<32x128xbf16>, vector<2x128xf32> -> vector<2x128xf32>
    %239 = arith.addf %236, %238 : vector<2x128xf32>
    %240 = arith.negf %239 : vector<2x128xf32>
    %241 = math.exp %240 : vector<2x128xf32>
    %cst_75 = arith.constant 1.000000e+00 : f32
    %242 = vector.broadcast %cst_75 : f32 to vector<2x128xf32>
    %243 = arith.addf %242, %241 : vector<2x128xf32>
    %244 = arith.divf %242, %243 : vector<2x128xf32>
    %cst_76 = arith.constant 2.000000e+00 : f32
    %245 = vector.broadcast %cst_76 : f32 to vector<2x128xf32>
    %246 = arith.mulf %245, %244 : vector<2x128xf32>
    %cst_77 = arith.constant 1.000000e+00 : f32
    %247 = vector.broadcast %cst_77 : f32 to vector<2x128xf32>
    %248 = arith.subf %246, %247 : vector<2x128xf32>
    %249 = arith.select %18, %248, %244 : vector<2x128xi1>, vector<2x128xf32>
    %250 = vector.extract_strided_slice %249 {offsets = [0, 0], sizes = [2, 32], strides = [1, 1]} : vector<2x128xf32> to vector<2x32xf32>
    %251 = vector.extract_strided_slice %249 {offsets = [0, 32], sizes = [2, 32], strides = [1, 1]} : vector<2x128xf32> to vector<2x32xf32>
    %252 = vector.extract_strided_slice %249 {offsets = [0, 64], sizes = [2, 32], strides = [1, 1]} : vector<2x128xf32> to vector<2x32xf32>
    %253 = vector.extract_strided_slice %249 {offsets = [0, 96], sizes = [2, 32], strides = [1, 1]} : vector<2x128xf32> to vector<2x32xf32>
    %254 = arith.mulf %251, %195 : vector<2x32xf32>
    %255 = arith.mulf %250, %252 : vector<2x32xf32>
    %256 = arith.addf %254, %255 : vector<2x32xf32>
    %257 = math.tanh %256 : vector<2x32xf32>
    %258 = arith.mulf %253, %257 : vector<2x32xf32>
    %259 = arith.truncf %258 : vector<2x32xf32> to vector<2x32xbf16>
    %260 = arith.index_cast %233 : i32 to index
    %c0_78 = arith.constant 0 : index
    %c32_79 = arith.constant 32 : index
    %261 = vector.load %arg5[%260, %c0_78, %c32_79] : memref<8x2x64xbf16, #tpu.memory_space<vmem>>, vector<1x2x32xbf16>
    %262 = vector.shape_cast %261 : vector<1x2x32xbf16> to vector<2x32xbf16>
    %263 = vector.shape_cast %259 : vector<2x32xbf16> to vector<1x2x32xbf16>
    tpu.vector_store %arg5[%260, %c0_78, %c32_79], %263 {strides = array<i32>} : memref<8x2x64xbf16, #tpu.memory_space<vmem>>, vector<1x2x32xbf16>,
    %c4_i32 = arith.constant 4 : i32
    %264 = arith.index_cast %c4_i32 : i32 to index
    %c0_80 = arith.constant 0 : index
    %c0_81 = arith.constant 0 : index
    %265 = vector.load %arg7[%264, %c0_80, %c0_81] : memref<8x2x256xf32, #tpu.memory_space<vmem>>, vector<1x2x128xf32>
    %266 = vector.shape_cast %265 : vector<1x2x128xf32> to vector<2x128xf32>
    %267 = arith.truncf %227 : vector<2x32xf32> to vector<2x32xbf16>
    %cst_82 = arith.constant dense<0.000000e+00> : vector<2x128xf32>
    %268 = tpu.matmul %267, %10, %cst_82 {dimension_numbers = #tpu.dot_dimension_numbers<[1], [0], [0], [1], [0, 0, 1, 1], [], []>} : vector<2x32xbf16>, vector<32x128xbf16>, vector<2x128xf32> -> vector<2x128xf32>
    %269 = arith.addf %266, %268 : vector<2x128xf32>
    %270 = arith.negf %269 : vector<2x128xf32>
    %271 = math.exp %270 : vector<2x128xf32>
    %cst_83 = arith.constant 1.000000e+00 : f32
    %272 = vector.broadcast %cst_83 : f32 to vector<2x128xf32>
    %273 = arith.addf %272, %271 : vector<2x128xf32>
    %274 = arith.divf %272, %273 : vector<2x128xf32>
    %cst_84 = arith.constant 2.000000e+00 : f32
    %275 = vector.broadcast %cst_84 : f32 to vector<2x128xf32>
    %276 = arith.mulf %275, %274 : vector<2x128xf32>
    %cst_85 = arith.constant 1.000000e+00 : f32
    %277 = vector.broadcast %cst_85 : f32 to vector<2x128xf32>
    %278 = arith.subf %276, %277 : vector<2x128xf32>
    %279 = arith.select %18, %278, %274 : vector<2x128xi1>, vector<2x128xf32>
    %280 = vector.extract_strided_slice %279 {offsets = [0, 0], sizes = [2, 32], strides = [1, 1]} : vector<2x128xf32> to vector<2x32xf32>
    %281 = vector.extract_strided_slice %279 {offsets = [0, 32], sizes = [2, 32], strides = [1, 1]} : vector<2x128xf32> to vector<2x32xf32>
    %282 = vector.extract_strided_slice %279 {offsets = [0, 64], sizes = [2, 32], strides = [1, 1]} : vector<2x128xf32> to vector<2x32xf32>
    %283 = vector.extract_strided_slice %279 {offsets = [0, 96], sizes = [2, 32], strides = [1, 1]} : vector<2x128xf32> to vector<2x32xf32>
    %284 = arith.mulf %281, %225 : vector<2x32xf32>
    %285 = arith.mulf %280, %282 : vector<2x32xf32>
    %286 = arith.addf %284, %285 : vector<2x32xf32>
    %287 = math.tanh %286 : vector<2x32xf32>
    %288 = arith.mulf %283, %287 : vector<2x32xf32>
    %289 = arith.truncf %288 : vector<2x32xf32> to vector<2x32xbf16>
    %290 = arith.index_cast %c4_i32 : i32 to index
    %c0_86 = arith.constant 0 : index
    %c0_87 = arith.constant 0 : index
    %291 = vector.load %arg5[%290, %c0_86, %c0_87] : memref<8x2x64xbf16, #tpu.memory_space<vmem>>, vector<1x2x32xbf16>
    %292 = vector.shape_cast %291 : vector<1x2x32xbf16> to vector<2x32xbf16>
    %293 = vector.shape_cast %289 : vector<2x32xbf16> to vector<1x2x32xbf16>
    tpu.vector_store %arg5[%290, %c0_86, %c0_87], %293 {strides = array<i32>} : memref<8x2x64xbf16, #tpu.memory_space<vmem>>, vector<1x2x32xbf16>,
    %c7_i32_88 = arith.constant 7 : i32
    %294 = arith.subi %c7_i32_88, %c4_i32 : i32
    %295 = arith.index_cast %294 : i32 to index
    %c0_89 = arith.constant 0 : index
    %c128_90 = arith.constant 128 : index
    %296 = vector.load %arg7[%295, %c0_89, %c128_90] : memref<8x2x256xf32, #tpu.memory_space<vmem>>, vector<1x2x128xf32>
    %297 = vector.shape_cast %296 : vector<1x2x128xf32> to vector<2x128xf32>
    %298 = arith.truncf %258 : vector<2x32xf32> to vector<2x32xbf16>
    %cst_91 = arith.constant dense<0.000000e+00> : vector<2x128xf32>
    %299 = tpu.matmul %298, %12, %cst_91 {dimension_numbers = #tpu.dot_dimension_numbers<[1], [0], [0], [1], [0, 0, 1, 1], [], []>} : vector<2x32xbf16>, vector<32x128xbf16>, vector<2x128xf32> -> vector<2x128xf32>
    %300 = arith.addf %297, %299 : vector<2x128xf32>
    %301 = arith.negf %300 : vector<2x128xf32>
    %302 = math.exp %301 : vector<2x128xf32>
    %cst_92 = arith.constant 1.000000e+00 : f32
    %303 = vector.broadcast %cst_92 : f32 to vector<2x128xf32>
    %304 = arith.addf %303, %302 : vector<2x128xf32>
    %305 = arith.divf %303, %304 : vector<2x128xf32>
    %cst_93 = arith.constant 2.000000e+00 : f32
    %306 = vector.broadcast %cst_93 : f32 to vector<2x128xf32>
    %307 = arith.mulf %306, %305 : vector<2x128xf32>
    %cst_94 = arith.constant 1.000000e+00 : f32
    %308 = vector.broadcast %cst_94 : f32 to vector<2x128xf32>
    %309 = arith.subf %307, %308 : vector<2x128xf32>
    %310 = arith.select %18, %309, %305 : vector<2x128xi1>, vector<2x128xf32>
    %311 = vector.extract_strided_slice %310 {offsets = [0, 0], sizes = [2, 32], strides = [1, 1]} : vector<2x128xf32> to vector<2x32xf32>
    %312 = vector.extract_strided_slice %310 {offsets = [0, 32], sizes = [2, 32], strides = [1, 1]} : vector<2x128xf32> to vector<2x32xf32>
    %313 = vector.extract_strided_slice %310 {offsets = [0, 64], sizes = [2, 32], strides = [1, 1]} : vector<2x128xf32> to vector<2x32xf32>
    %314 = vector.extract_strided_slice %310 {offsets = [0, 96], sizes = [2, 32], strides = [1, 1]} : vector<2x128xf32> to vector<2x32xf32>
    %315 = arith.mulf %312, %256 : vector<2x32xf32>
    %316 = arith.mulf %311, %313 : vector<2x32xf32>
    %317 = arith.addf %315, %316 : vector<2x32xf32>
    %318 = math.tanh %317 : vector<2x32xf32>
    %319 = arith.mulf %314, %318 : vector<2x32xf32>
    %320 = arith.truncf %319 : vector<2x32xf32> to vector<2x32xbf16>
    %321 = arith.index_cast %294 : i32 to index
    %c0_95 = arith.constant 0 : index
    %c32_96 = arith.constant 32 : index
    %322 = vector.load %arg5[%321, %c0_95, %c32_96] : memref<8x2x64xbf16, #tpu.memory_space<vmem>>, vector<1x2x32xbf16>
    %323 = vector.shape_cast %322 : vector<1x2x32xbf16> to vector<2x32xbf16>
    %324 = vector.shape_cast %320 : vector<2x32xbf16> to vector<1x2x32xbf16>
    tpu.vector_store %arg5[%321, %c0_95, %c32_96], %324 {strides = array<i32>} : memref<8x2x64xbf16, #tpu.memory_space<vmem>>, vector<1x2x32xbf16>,
    %c5_i32 = arith.constant 5 : i32
    %325 = arith.index_cast %c5_i32 : i32 to index
    %c0_97 = arith.constant 0 : index
    %c0_98 = arith.constant 0 : index
    %326 = vector.load %arg7[%325, %c0_97, %c0_98] : memref<8x2x256xf32, #tpu.memory_space<vmem>>, vector<1x2x128xf32>
    %327 = vector.shape_cast %326 : vector<1x2x128xf32> to vector<2x128xf32>
    %328 = arith.truncf %288 : vector<2x32xf32> to vector<2x32xbf16>
    %cst_99 = arith.constant dense<0.000000e+00> : vector<2x128xf32>
    %329 = tpu.matmul %328, %10, %cst_99 {dimension_numbers = #tpu.dot_dimension_numbers<[1], [0], [0], [1], [0, 0, 1, 1], [], []>} : vector<2x32xbf16>, vector<32x128xbf16>, vector<2x128xf32> -> vector<2x128xf32>
    %330 = arith.addf %327, %329 : vector<2x128xf32>
    %331 = arith.negf %330 : vector<2x128xf32>
    %332 = math.exp %331 : vector<2x128xf32>
    %cst_100 = arith.constant 1.000000e+00 : f32
    %333 = vector.broadcast %cst_100 : f32 to vector<2x128xf32>
    %334 = arith.addf %333, %332 : vector<2x128xf32>
    %335 = arith.divf %333, %334 : vector<2x128xf32>
    %cst_101 = arith.constant 2.000000e+00 : f32
    %336 = vector.broadcast %cst_101 : f32 to vector<2x128xf32>
    %337 = arith.mulf %336, %335 : vector<2x128xf32>
    %cst_102 = arith.constant 1.000000e+00 : f32
    %338 = vector.broadcast %cst_102 : f32 to vector<2x128xf32>
    %339 = arith.subf %337, %338 : vector<2x128xf32>
    %340 = arith.select %18, %339, %335 : vector<2x128xi1>, vector<2x128xf32>
    %341 = vector.extract_strided_slice %340 {offsets = [0, 0], sizes = [2, 32], strides = [1, 1]} : vector<2x128xf32> to vector<2x32xf32>
    %342 = vector.extract_strided_slice %340 {offsets = [0, 32], sizes = [2, 32], strides = [1, 1]} : vector<2x128xf32> to vector<2x32xf32>
    %343 = vector.extract_strided_slice %340 {offsets = [0, 64], sizes = [2, 32], strides = [1, 1]} : vector<2x128xf32> to vector<2x32xf32>
    %344 = vector.extract_strided_slice %340 {offsets = [0, 96], sizes = [2, 32], strides = [1, 1]} : vector<2x128xf32> to vector<2x32xf32>
    %345 = arith.mulf %342, %286 : vector<2x32xf32>
    %346 = arith.mulf %341, %343 : vector<2x32xf32>
    %347 = arith.addf %345, %346 : vector<2x32xf32>
    %348 = math.tanh %347 : vector<2x32xf32>
    %349 = arith.mulf %344, %348 : vector<2x32xf32>
    %350 = arith.truncf %349 : vector<2x32xf32> to vector<2x32xbf16>
    %351 = arith.index_cast %c5_i32 : i32 to index
    %c0_103 = arith.constant 0 : index
    %c0_104 = arith.constant 0 : index
    %352 = vector.load %arg5[%351, %c0_103, %c0_104] : memref<8x2x64xbf16, #tpu.memory_space<vmem>>, vector<1x2x32xbf16>
    %353 = vector.shape_cast %352 : vector<1x2x32xbf16> to vector<2x32xbf16>
    %354 = vector.shape_cast %350 : vector<2x32xbf16> to vector<1x2x32xbf16>
    tpu.vector_store %arg5[%351, %c0_103, %c0_104], %354 {strides = array<i32>} : memref<8x2x64xbf16, #tpu.memory_space<vmem>>, vector<1x2x32xbf16>,
    %c7_i32_105 = arith.constant 7 : i32
    %355 = arith.subi %c7_i32_105, %c5_i32 : i32
    %356 = arith.index_cast %355 : i32 to index
    %c0_106 = arith.constant 0 : index
    %c128_107 = arith.constant 128 : index
    %357 = vector.load %arg7[%356, %c0_106, %c128_107] : memref<8x2x256xf32, #tpu.memory_space<vmem>>, vector<1x2x128xf32>
    %358 = vector.shape_cast %357 : vector<1x2x128xf32> to vector<2x128xf32>
    %359 = arith.truncf %319 : vector<2x32xf32> to vector<2x32xbf16>
    %cst_108 = arith.constant dense<0.000000e+00> : vector<2x128xf32>
    %360 = tpu.matmul %359, %12, %cst_108 {dimension_numbers = #tpu.dot_dimension_numbers<[1], [0], [0], [1], [0, 0, 1, 1], [], []>} : vector<2x32xbf16>, vector<32x128xbf16>, vector<2x128xf32> -> vector<2x128xf32>
    %361 = arith.addf %358, %360 : vector<2x128xf32>
    %362 = arith.negf %361 : vector<2x128xf32>
    %363 = math.exp %362 : vector<2x128xf32>
    %cst_109 = arith.constant 1.000000e+00 : f32
    %364 = vector.broadcast %cst_109 : f32 to vector<2x128xf32>
    %365 = arith.addf %364, %363 : vector<2x128xf32>
    %366 = arith.divf %364, %365 : vector<2x128xf32>
    %cst_110 = arith.constant 2.000000e+00 : f32
    %367 = vector.broadcast %cst_110 : f32 to vector<2x128xf32>
    %368 = arith.mulf %367, %366 : vector<2x128xf32>
    %cst_111 = arith.constant 1.000000e+00 : f32
    %369 = vector.broadcast %cst_111 : f32 to vector<2x128xf32>
    %370 = arith.subf %368, %369 : vector<2x128xf32>
    %371 = arith.select %18, %370, %366 : vector<2x128xi1>, vector<2x128xf32>
    %372 = vector.extract_strided_slice %371 {offsets = [0, 0], sizes = [2, 32], strides = [1, 1]} : vector<2x128xf32> to vector<2x32xf32>
    %373 = vector.extract_strided_slice %371 {offsets = [0, 32], sizes = [2, 32], strides = [1, 1]} : vector<2x128xf32> to vector<2x32xf32>
    %374 = vector.extract_strided_slice %371 {offsets = [0, 64], sizes = [2, 32], strides = [1, 1]} : vector<2x128xf32> to vector<2x32xf32>
    %375 = vector.extract_strided_slice %371 {offsets = [0, 96], sizes = [2, 32], strides = [1, 1]} : vector<2x128xf32> to vector<2x32xf32>
    %376 = arith.mulf %373, %317 : vector<2x32xf32>
    %377 = arith.mulf %372, %374 : vector<2x32xf32>
    %378 = arith.addf %376, %377 : vector<2x32xf32>
    %379 = math.tanh %378 : vector<2x32xf32>
    %380 = arith.mulf %375, %379 : vector<2x32xf32>
    %381 = arith.truncf %380 : vector<2x32xf32> to vector<2x32xbf16>
    %382 = arith.index_cast %355 : i32 to index
    %c0_112 = arith.constant 0 : index
    %c32_113 = arith.constant 32 : index
    %383 = vector.load %arg5[%382, %c0_112, %c32_113] : memref<8x2x64xbf16, #tpu.memory_space<vmem>>, vector<1x2x32xbf16>
    %384 = vector.shape_cast %383 : vector<1x2x32xbf16> to vector<2x32xbf16>
    %385 = vector.shape_cast %381 : vector<2x32xbf16> to vector<1x2x32xbf16>
    tpu.vector_store %arg5[%382, %c0_112, %c32_113], %385 {strides = array<i32>} : memref<8x2x64xbf16, #tpu.memory_space<vmem>>, vector<1x2x32xbf16>,
    %c6_i32 = arith.constant 6 : i32
    %386 = arith.index_cast %c6_i32 : i32 to index
    %c0_114 = arith.constant 0 : index
    %c0_115 = arith.constant 0 : index
    %387 = vector.load %arg7[%386, %c0_114, %c0_115] : memref<8x2x256xf32, #tpu.memory_space<vmem>>, vector<1x2x128xf32>
    %388 = vector.shape_cast %387 : vector<1x2x128xf32> to vector<2x128xf32>
    %389 = arith.truncf %349 : vector<2x32xf32> to vector<2x32xbf16>
    %cst_116 = arith.constant dense<0.000000e+00> : vector<2x128xf32>
    %390 = tpu.matmul %389, %10, %cst_116 {dimension_numbers = #tpu.dot_dimension_numbers<[1], [0], [0], [1], [0, 0, 1, 1], [], []>} : vector<2x32xbf16>, vector<32x128xbf16>, vector<2x128xf32> -> vector<2x128xf32>
    %391 = arith.addf %388, %390 : vector<2x128xf32>
    %392 = arith.negf %391 : vector<2x128xf32>
    %393 = math.exp %392 : vector<2x128xf32>
    %cst_117 = arith.constant 1.000000e+00 : f32
    %394 = vector.broadcast %cst_117 : f32 to vector<2x128xf32>
    %395 = arith.addf %394, %393 : vector<2x128xf32>
    %396 = arith.divf %394, %395 : vector<2x128xf32>
    %cst_118 = arith.constant 2.000000e+00 : f32
    %397 = vector.broadcast %cst_118 : f32 to vector<2x128xf32>
    %398 = arith.mulf %397, %396 : vector<2x128xf32>
    %cst_119 = arith.constant 1.000000e+00 : f32
    %399 = vector.broadcast %cst_119 : f32 to vector<2x128xf32>
    %400 = arith.subf %398, %399 : vector<2x128xf32>
    %401 = arith.select %18, %400, %396 : vector<2x128xi1>, vector<2x128xf32>
    %402 = vector.extract_strided_slice %401 {offsets = [0, 0], sizes = [2, 32], strides = [1, 1]} : vector<2x128xf32> to vector<2x32xf32>
    %403 = vector.extract_strided_slice %401 {offsets = [0, 32], sizes = [2, 32], strides = [1, 1]} : vector<2x128xf32> to vector<2x32xf32>
    %404 = vector.extract_strided_slice %401 {offsets = [0, 64], sizes = [2, 32], strides = [1, 1]} : vector<2x128xf32> to vector<2x32xf32>
    %405 = vector.extract_strided_slice %401 {offsets = [0, 96], sizes = [2, 32], strides = [1, 1]} : vector<2x128xf32> to vector<2x32xf32>
    %406 = arith.mulf %403, %347 : vector<2x32xf32>
    %407 = arith.mulf %402, %404 : vector<2x32xf32>
    %408 = arith.addf %406, %407 : vector<2x32xf32>
    %409 = math.tanh %408 : vector<2x32xf32>
    %410 = arith.mulf %405, %409 : vector<2x32xf32>
    %411 = arith.truncf %410 : vector<2x32xf32> to vector<2x32xbf16>
    %412 = arith.index_cast %c6_i32 : i32 to index
    %c0_120 = arith.constant 0 : index
    %c0_121 = arith.constant 0 : index
    %413 = vector.load %arg5[%412, %c0_120, %c0_121] : memref<8x2x64xbf16, #tpu.memory_space<vmem>>, vector<1x2x32xbf16>
    %414 = vector.shape_cast %413 : vector<1x2x32xbf16> to vector<2x32xbf16>
    %415 = vector.shape_cast %411 : vector<2x32xbf16> to vector<1x2x32xbf16>
    tpu.vector_store %arg5[%412, %c0_120, %c0_121], %415 {strides = array<i32>} : memref<8x2x64xbf16, #tpu.memory_space<vmem>>, vector<1x2x32xbf16>,
    %c7_i32_122 = arith.constant 7 : i32
    %416 = arith.subi %c7_i32_122, %c6_i32 : i32
    %417 = arith.index_cast %416 : i32 to index
    %c0_123 = arith.constant 0 : index
    %c128_124 = arith.constant 128 : index
    %418 = vector.load %arg7[%417, %c0_123, %c128_124] : memref<8x2x256xf32, #tpu.memory_space<vmem>>, vector<1x2x128xf32>
    %419 = vector.shape_cast %418 : vector<1x2x128xf32> to vector<2x128xf32>
    %420 = arith.truncf %380 : vector<2x32xf32> to vector<2x32xbf16>
    %cst_125 = arith.constant dense<0.000000e+00> : vector<2x128xf32>
    %421 = tpu.matmul %420, %12, %cst_125 {dimension_numbers = #tpu.dot_dimension_numbers<[1], [0], [0], [1], [0, 0, 1, 1], [], []>} : vector<2x32xbf16>, vector<32x128xbf16>, vector<2x128xf32> -> vector<2x128xf32>
    %422 = arith.addf %419, %421 : vector<2x128xf32>
    %423 = arith.negf %422 : vector<2x128xf32>
    %424 = math.exp %423 : vector<2x128xf32>
    %cst_126 = arith.constant 1.000000e+00 : f32
    %425 = vector.broadcast %cst_126 : f32 to vector<2x128xf32>
    %426 = arith.addf %425, %424 : vector<2x128xf32>
    %427 = arith.divf %425, %426 : vector<2x128xf32>
    %cst_127 = arith.constant 2.000000e+00 : f32
    %428 = vector.broadcast %cst_127 : f32 to vector<2x128xf32>
    %429 = arith.mulf %428, %427 : vector<2x128xf32>
    %cst_128 = arith.constant 1.000000e+00 : f32
    %430 = vector.broadcast %cst_128 : f32 to vector<2x128xf32>
    %431 = arith.subf %429, %430 : vector<2x128xf32>
    %432 = arith.select %18, %431, %427 : vector<2x128xi1>, vector<2x128xf32>
    %433 = vector.extract_strided_slice %432 {offsets = [0, 0], sizes = [2, 32], strides = [1, 1]} : vector<2x128xf32> to vector<2x32xf32>
    %434 = vector.extract_strided_slice %432 {offsets = [0, 32], sizes = [2, 32], strides = [1, 1]} : vector<2x128xf32> to vector<2x32xf32>
    %435 = vector.extract_strided_slice %432 {offsets = [0, 64], sizes = [2, 32], strides = [1, 1]} : vector<2x128xf32> to vector<2x32xf32>
    %436 = vector.extract_strided_slice %432 {offsets = [0, 96], sizes = [2, 32], strides = [1, 1]} : vector<2x128xf32> to vector<2x32xf32>
    %437 = arith.mulf %434, %378 : vector<2x32xf32>
    %438 = arith.mulf %433, %435 : vector<2x32xf32>
    %439 = arith.addf %437, %438 : vector<2x32xf32>
    %440 = math.tanh %439 : vector<2x32xf32>
    %441 = arith.mulf %436, %440 : vector<2x32xf32>
    %442 = arith.truncf %441 : vector<2x32xf32> to vector<2x32xbf16>
    %443 = arith.index_cast %416 : i32 to index
    %c0_129 = arith.constant 0 : index
    %c32_130 = arith.constant 32 : index
    %444 = vector.load %arg5[%443, %c0_129, %c32_130] : memref<8x2x64xbf16, #tpu.memory_space<vmem>>, vector<1x2x32xbf16>
    %445 = vector.shape_cast %444 : vector<1x2x32xbf16> to vector<2x32xbf16>
    %446 = vector.shape_cast %442 : vector<2x32xbf16> to vector<1x2x32xbf16>
    tpu.vector_store %arg5[%443, %c0_129, %c32_130], %446 {strides = array<i32>} : memref<8x2x64xbf16, #tpu.memory_space<vmem>>, vector<1x2x32xbf16>,
    %c7_i32_131 = arith.constant 7 : i32
    %447 = arith.index_cast %c7_i32_131 : i32 to index
    %c0_132 = arith.constant 0 : index
    %c0_133 = arith.constant 0 : index
    %448 = vector.load %arg7[%447, %c0_132, %c0_133] : memref<8x2x256xf32, #tpu.memory_space<vmem>>, vector<1x2x128xf32>
    %449 = vector.shape_cast %448 : vector<1x2x128xf32> to vector<2x128xf32>
    %450 = arith.truncf %410 : vector<2x32xf32> to vector<2x32xbf16>
    %cst_134 = arith.constant dense<0.000000e+00> : vector<2x128xf32>
    %451 = tpu.matmul %450, %10, %cst_134 {dimension_numbers = #tpu.dot_dimension_numbers<[1], [0], [0], [1], [0, 0, 1, 1], [], []>} : vector<2x32xbf16>, vector<32x128xbf16>, vector<2x128xf32> -> vector<2x128xf32>
    %452 = arith.addf %449, %451 : vector<2x128xf32>
    %453 = arith.negf %452 : vector<2x128xf32>
    %454 = math.exp %453 : vector<2x128xf32>
    %cst_135 = arith.constant 1.000000e+00 : f32
    %455 = vector.broadcast %cst_135 : f32 to vector<2x128xf32>
    %456 = arith.addf %455, %454 : vector<2x128xf32>
    %457 = arith.divf %455, %456 : vector<2x128xf32>
    %cst_136 = arith.constant 2.000000e+00 : f32
    %458 = vector.broadcast %cst_136 : f32 to vector<2x128xf32>
    %459 = arith.mulf %458, %457 : vector<2x128xf32>
    %cst_137 = arith.constant 1.000000e+00 : f32
    %460 = vector.broadcast %cst_137 : f32 to vector<2x128xf32>
    %461 = arith.subf %459, %460 : vector<2x128xf32>
    %462 = arith.select %18, %461, %457 : vector<2x128xi1>, vector<2x128xf32>
    %463 = vector.extract_strided_slice %462 {offsets = [0, 0], sizes = [2, 32], strides = [1, 1]} : vector<2x128xf32> to vector<2x32xf32>
    %464 = vector.extract_strided_slice %462 {offsets = [0, 32], sizes = [2, 32], strides = [1, 1]} : vector<2x128xf32> to vector<2x32xf32>
    %465 = vector.extract_strided_slice %462 {offsets = [0, 64], sizes = [2, 32], strides = [1, 1]} : vector<2x128xf32> to vector<2x32xf32>
    %466 = vector.extract_strided_slice %462 {offsets = [0, 96], sizes = [2, 32], strides = [1, 1]} : vector<2x128xf32> to vector<2x32xf32>
    %467 = arith.mulf %464, %408 : vector<2x32xf32>
    %468 = arith.mulf %463, %465 : vector<2x32xf32>
    %469 = arith.addf %467, %468 : vector<2x32xf32>
    %470 = math.tanh %469 : vector<2x32xf32>
    %471 = arith.mulf %466, %470 : vector<2x32xf32>
    %472 = arith.truncf %471 : vector<2x32xf32> to vector<2x32xbf16>
    %473 = arith.index_cast %c7_i32_131 : i32 to index
    %c0_138 = arith.constant 0 : index
    %c0_139 = arith.constant 0 : index
    %474 = vector.load %arg5[%473, %c0_138, %c0_139] : memref<8x2x64xbf16, #tpu.memory_space<vmem>>, vector<1x2x32xbf16>
    %475 = vector.shape_cast %474 : vector<1x2x32xbf16> to vector<2x32xbf16>
    %476 = vector.shape_cast %472 : vector<2x32xbf16> to vector<1x2x32xbf16>
    tpu.vector_store %arg5[%473, %c0_138, %c0_139], %476 {strides = array<i32>} : memref<8x2x64xbf16, #tpu.memory_space<vmem>>, vector<1x2x32xbf16>,
    %c7_i32_140 = arith.constant 7 : i32
    %477 = arith.subi %c7_i32_140, %c7_i32_131 : i32
    %478 = arith.index_cast %477 : i32 to index
    %c0_141 = arith.constant 0 : index
    %c128_142 = arith.constant 128 : index
    %479 = vector.load %arg7[%478, %c0_141, %c128_142] : memref<8x2x256xf32, #tpu.memory_space<vmem>>, vector<1x2x128xf32>
    %480 = vector.shape_cast %479 : vector<1x2x128xf32> to vector<2x128xf32>
    %481 = arith.truncf %441 : vector<2x32xf32> to vector<2x32xbf16>
    %cst_143 = arith.constant dense<0.000000e+00> : vector<2x128xf32>
    %482 = tpu.matmul %481, %12, %cst_143 {dimension_numbers = #tpu.dot_dimension_numbers<[1], [0], [0], [1], [0, 0, 1, 1], [], []>} : vector<2x32xbf16>, vector<32x128xbf16>, vector<2x128xf32> -> vector<2x128xf32>
    %483 = arith.addf %480, %482 : vector<2x128xf32>
    %484 = arith.negf %483 : vector<2x128xf32>
    %485 = math.exp %484 : vector<2x128xf32>
    %cst_144 = arith.constant 1.000000e+00 : f32
    %486 = vector.broadcast %cst_144 : f32 to vector<2x128xf32>
    %487 = arith.addf %486, %485 : vector<2x128xf32>
    %488 = arith.divf %486, %487 : vector<2x128xf32>
    %cst_145 = arith.constant 2.000000e+00 : f32
    %489 = vector.broadcast %cst_145 : f32 to vector<2x128xf32>
    %490 = arith.mulf %489, %488 : vector<2x128xf32>
    %cst_146 = arith.constant 1.000000e+00 : f32
    %491 = vector.broadcast %cst_146 : f32 to vector<2x128xf32>
    %492 = arith.subf %490, %491 : vector<2x128xf32>
    %493 = arith.select %18, %492, %488 : vector<2x128xi1>, vector<2x128xf32>
    %494 = vector.extract_strided_slice %493 {offsets = [0, 0], sizes = [2, 32], strides = [1, 1]} : vector<2x128xf32> to vector<2x32xf32>
    %495 = vector.extract_strided_slice %493 {offsets = [0, 32], sizes = [2, 32], strides = [1, 1]} : vector<2x128xf32> to vector<2x32xf32>
    %496 = vector.extract_strided_slice %493 {offsets = [0, 64], sizes = [2, 32], strides = [1, 1]} : vector<2x128xf32> to vector<2x32xf32>
    %497 = vector.extract_strided_slice %493 {offsets = [0, 96], sizes = [2, 32], strides = [1, 1]} : vector<2x128xf32> to vector<2x32xf32>
    %498 = arith.mulf %495, %439 : vector<2x32xf32>
    %499 = arith.mulf %494, %496 : vector<2x32xf32>
    %500 = arith.addf %498, %499 : vector<2x32xf32>
    %501 = math.tanh %500 : vector<2x32xf32>
    %502 = arith.mulf %497, %501 : vector<2x32xf32>
    %503 = arith.truncf %502 : vector<2x32xf32> to vector<2x32xbf16>
    %504 = arith.index_cast %477 : i32 to index
    %c0_147 = arith.constant 0 : index
    %c32_148 = arith.constant 32 : index
    %505 = vector.load %arg5[%504, %c0_147, %c32_148] : memref<8x2x64xbf16, #tpu.memory_space<vmem>>, vector<1x2x32xbf16>
    %506 = vector.shape_cast %505 : vector<1x2x32xbf16> to vector<2x32xbf16>
    %507 = vector.shape_cast %503 : vector<2x32xbf16> to vector<1x2x32xbf16>
    tpu.vector_store %arg5[%504, %c0_147, %c32_148], %507 {strides = array<i32>} : memref<8x2x64xbf16, #tpu.memory_space<vmem>>, vector<1x2x32xbf16>,
    %c8_i32 = arith.constant 8 : i32
    %c0_149 = arith.constant 0 : index
    %c0_150 = arith.constant 0 : index
    %c0_151 = arith.constant 0 : index
    %508 = vector.load %arg6[%c0_149, %c0_150, %c0_151] : memref<2x2x32xf32, #tpu.memory_space<vmem>>, vector<1x2x32xf32>
    %509 = vector.shape_cast %508 : vector<1x2x32xf32> to vector<2x32xf32>
    %510 = vector.shape_cast %471 : vector<2x32xf32> to vector<1x2x32xf32>
    tpu.vector_store %arg6[%c0_149, %c0_150, %c0_151], %510 {strides = array<i32>} : memref<2x2x32xf32, #tpu.memory_space<vmem>>, vector<1x2x32xf32>,
    %c1_152 = arith.constant 1 : index
    %c0_153 = arith.constant 0 : index
    %c0_154 = arith.constant 0 : index
    %511 = vector.load %arg6[%c1_152, %c0_153, %c0_154] : memref<2x2x32xf32, #tpu.memory_space<vmem>>, vector<1x2x32xf32>
    %512 = vector.shape_cast %511 : vector<1x2x32xf32> to vector<2x32xf32>
    %513 = vector.shape_cast %502 : vector<2x32xf32> to vector<1x2x32xf32>
    tpu.vector_store %arg6[%c1_152, %c0_153, %c0_154], %513 {strides = array<i32>} : memref<2x2x32xf32, #tpu.memory_space<vmem>>, vector<1x2x32xf32>,
    return
  }
  func.func @transform_0(%arg0: i32) -> (i32, i32, i32) {
    %c0_i32 = arith.constant 0 : i32
    %c0_i32_0 = arith.constant 0 : i32
    %c0_i32_1 = arith.constant 0 : i32
    %c0_i32_2 = arith.constant 0 : i32
    return %c0_i32, %c0_i32_0, %c0_i32_1 : i32, i32, i32
  }
  func.func @transform_1(%arg0: i32) -> (i32, i32) {
    %c0_i32 = arith.constant 0 : i32
    %c0_i32_0 = arith.constant 0 : i32
    %c0_i32_1 = arith.constant 0 : i32
    return %c0_i32, %c0_i32_0 : i32, i32
  }
  func.func @transform_2(%arg0: i32) -> (i32, i32, i32) {
    %c0_i32 = arith.constant 0 : i32
    %c0_i32_0 = arith.constant 0 : i32
    %c0_i32_1 = arith.constant 0 : i32
    %c0_i32_2 = arith.constant 0 : i32
    return %c0_i32, %c0_i32_0, %c0_i32_1 : i32, i32, i32
  }
  func.func @transform_3(%arg0: i32) -> (i32, i32) {
    %c0_i32 = arith.constant 0 : i32
    %c0_i32_0 = arith.constant 0 : i32
    %c0_i32_1 = arith.constant 0 : i32
    return %c0_i32, %c0_i32_0 : i32, i32
  }
  func.func @transform_4(%arg0: i32) -> (i32, i32, i32) {
    %c0_i32 = arith.constant 0 : i32
    %c0_i32_0 = arith.constant 0 : i32
    %c0_i32_1 = arith.constant 0 : i32
    %c0_i32_2 = arith.constant 0 : i32
    return %c0_i32, %c0_i32_0, %c0_i32_1 : i32, i32, i32
  }
  func.func @transform_5(%arg0: i32) -> (i32, i32, i32) {
    %c0_i32 = arith.constant 0 : i32
    %c0_i32_0 = arith.constant 0 : i32
    %c0_i32_1 = arith.constant 0 : i32
    %c0_i32_2 = arith.constant 0 : i32
    return %c0_i32, %c0_i32_0, %c0_i32_1 : i32, i32, i32
  }
}

module attributes {stable_mosaic.version = 11 : i64} {
  func.func @_lstm_layer_kernel(%arg0: i32, %arg1: memref<8x2x64xbf16, #tpu.memory_space<vmem>>, %arg2: memref<64x256xbf16, #tpu.memory_space<vmem>>, %arg3: memref<2x32x128xbf16, #tpu.memory_space<vmem>>, %arg4: memref<1x256xf32, #tpu.memory_space<vmem>>, %arg5: memref<8x2x64xbf16, #tpu.memory_space<vmem>>, %arg6: memref<2x2x32xf32, #tpu.memory_space<vmem>>, %arg7: memref<8x2x256xf32, #tpu.memory_space<vmem>>) attributes {dimension_semantics = [#tpu.dimension_semantics<arbitrary>], iteration_bounds = array<i64: 1>, scalar_prefetch = 0 : i64, scratch_operands = 1 : i64, tpu.core_type = #tpu.core_type<tc>, window_params = [{pipeline_mode = #tpu.pipeline_mode<synchronous>, transform_indices = @transform_0, window_bounds = array<i64: 8, 2, 64>}, {pipeline_mode = #tpu.pipeline_mode<synchronous>, transform_indices = @transform_1, window_bounds = array<i64: 64, 256>}, {pipeline_mode = #tpu.pipeline_mode<synchronous>, transform_indices = @transform_2, window_bounds = array<i64: 2, 32, 128>}, {pipeline_mode = #tpu.pipeline_mode<synchronous>, transform_indices = @transform_3, window_bounds = array<i64: 1, 256>}, {pipeline_mode = #tpu.pipeline_mode<synchronous>, transform_indices = @transform_4, window_bounds = array<i64: 8, 2, 64>}, {pipeline_mode = #tpu.pipeline_mode<synchronous>, transform_indices = @transform_5, window_bounds = array<i64: 2, 2, 32>}]} {
    %c0 = arith.constant 0 : index
    %c0_0 = arith.constant 0 : index
    %c0_1 = arith.constant 0 : index
    %0 = vector.load %arg1[%c0, %c0_0, %c0_1] : memref<8x2x64xbf16, #tpu.memory_space<vmem>>, vector<8x2x64xbf16>
    %1 = vector.shape_cast %0 : vector<8x2x64xbf16> to vector<16x64xbf16>
    %c0_2 = arith.constant 0 : index
    %c0_3 = arith.constant 0 : index
    %2 = vector.load %arg2[%c0_2, %c0_3] : memref<64x256xbf16, #tpu.memory_space<vmem>>, vector<64x256xbf16>
    %cst = arith.constant dense<0.000000e+00> : vector<16x256xf32>
    %3 = tpu.matmul %1, %2, %cst {dimension_numbers = #tpu.dot_dimension_numbers<[1], [0], [0], [1], [0, 0, 1, 1], [], []>} : vector<16x64xbf16>, vector<64x256xbf16>, vector<16x256xf32> -> vector<16x256xf32>
    %c0_4 = arith.constant 0 : index
    %c0_5 = arith.constant 0 : index
    %4 = vector.load %arg4[%c0_4, %c0_5] : memref<1x256xf32, #tpu.memory_space<vmem>>, vector<1x256xf32>
    %5 = vector.broadcast %4 : vector<1x256xf32> to vector<16x256xf32>
    %6 = arith.addf %3, %5 : vector<16x256xf32>
    %7 = vector.shape_cast %6 : vector<16x256xf32> to vector<8x2x256xf32>
    %c0_6 = arith.constant 0 : index
    %c0_7 = arith.constant 0 : index
    %c0_8 = arith.constant 0 : index
    %8 = vector.load %arg7[%c0_6, %c0_7, %c0_8] : memref<8x2x256xf32, #tpu.memory_space<vmem>>, vector<8x2x256xf32>
    tpu.vector_store %arg7[%c0_6, %c0_7, %c0_8], %7 {strides = array<i32>} : memref<8x2x256xf32, #tpu.memory_space<vmem>>, vector<8x2x256xf32>,
    %c0_9 = arith.constant 0 : index
    %c0_10 = arith.constant 0 : index
    %c0_11 = arith.constant 0 : index
    %9 = vector.load %arg3[%c0_9, %c0_10, %c0_11] : memref<2x32x128xbf16, #tpu.memory_space<vmem>>, vector<1x32x128xbf16>
    %10 = vector.shape_cast %9 : vector<1x32x128xbf16> to vector<32x128xbf16>
    %c1 = arith.constant 1 : index
    %c0_12 = arith.constant 0 : index
    %c0_13 = arith.constant 0 : index
    %11 = vector.load %arg3[%c1, %c0_12, %c0_13] : memref<2x32x128xbf16, #tpu.memory_space<vmem>>, vector<1x32x128xbf16>
    %12 = vector.shape_cast %11 : vector<1x32x128xbf16> to vector<32x128xbf16>
    %13 = tpu.iota {dimensions = array<i32: 1>} : vector<2x128xi32>
    %c64_i32 = arith.constant 64 : i32
    %14 = vector.broadcast %c64_i32 : i32 to vector<2x128xi32>
    %15 = arith.cmpi sge, %13, %14 : vector<2x128xi32>
    %c96_i32 = arith.constant 96 : i32
    %16 = vector.broadcast %c96_i32 : i32 to vector<2x128xi32>
    %17 = arith.cmpi slt, %13, %16 : vector<2x128xi32>
    %18 = arith.andi %15, %17 : vector<2x128xi1>
    %cst_14 = arith.constant 0.000000e+00 : f32
    %19 = vector.broadcast %cst_14 : f32 to vector<2x32xf32>
    %c0_i32 = arith.constant 0 : i32
    %20 = arith.index_cast %c0_i32 : i32 to index
    %c0_15 = arith.constant 0 : index
    %c0_16 = arith.constant 0 : index
    %21 = vector.load %arg7[%20, %c0_15, %c0_16] : memref<8x2x256xf32, #tpu.memory_space<vmem>>, vector<1x2x128xf32>
    %22 = vector.shape_cast %21 : vector<1x2x128xf32> to vector<2x128xf32>
    %23 = arith.truncf %19 : vector<2x32xf32> to vector<2x32xbf16>
    %cst_17 = arith.constant dense<0.000000e+00> : vector<2x128xf32>
    %24 = tpu.matmul %23, %10, %cst_17 {dimension_numbers = #tpu.dot_dimension_numbers<[1], [0], [0], [1], [0, 0, 1, 1], [], []>} : vector<2x32xbf16>, vector<32x128xbf16>, vector<2x128xf32> -> vector<2x128xf32>
    %25 = arith.addf %22, %24 : vector<2x128xf32>
    %26 = arith.negf %25 : vector<2x128xf32>
    %27 = math.exp %26 : vector<2x128xf32>
    %cst_18 = arith.constant 1.000000e+00 : f32
    %28 = vector.broadcast %cst_18 : f32 to vector<2x128xf32>
    %29 = arith.addf %28, %27 : vector<2x128xf32>
    %30 = arith.divf %28, %29 : vector<2x128xf32>
    %cst_19 = arith.constant 2.000000e+00 : f32
    %31 = vector.broadcast %cst_19 : f32 to vector<2x128xf32>
    %32 = arith.mulf %31, %30 : vector<2x128xf32>
    %cst_20 = arith.constant 1.000000e+00 : f32
    %33 = vector.broadcast %cst_20 : f32 to vector<2x128xf32>
    %34 = arith.subf %32, %33 : vector<2x128xf32>
    %35 = arith.select %18, %34, %30 : vector<2x128xi1>, vector<2x128xf32>
    %36 = vector.extract_strided_slice %35 {offsets = [0, 0], sizes = [2, 32], strides = [1, 1]} : vector<2x128xf32> to vector<2x32xf32>
    %37 = vector.extract_strided_slice %35 {offsets = [0, 32], sizes = [2, 32], strides = [1, 1]} : vector<2x128xf32> to vector<2x32xf32>
    %38 = vector.extract_strided_slice %35 {offsets = [0, 64], sizes = [2, 32], strides = [1, 1]} : vector<2x128xf32> to vector<2x32xf32>
    %39 = vector.extract_strided_slice %35 {offsets = [0, 96], sizes = [2, 32], strides = [1, 1]} : vector<2x128xf32> to vector<2x32xf32>
    %40 = arith.mulf %37, %19 : vector<2x32xf32>
    %41 = arith.mulf %36, %38 : vector<2x32xf32>
    %42 = arith.addf %40, %41 : vector<2x32xf32>
    %43 = math.tanh %42 : vector<2x32xf32>
    %44 = arith.mulf %39, %43 : vector<2x32xf32>
    %45 = arith.truncf %44 : vector<2x32xf32> to vector<2x32xbf16>
    %46 = arith.index_cast %c0_i32 : i32 to index
    %c0_21 = arith.constant 0 : index
    %c0_22 = arith.constant 0 : index
    %47 = vector.load %arg5[%46, %c0_21, %c0_22] : memref<8x2x64xbf16, #tpu.memory_space<vmem>>, vector<1x2x32xbf16>
    %48 = vector.shape_cast %47 : vector<1x2x32xbf16> to vector<2x32xbf16>
    %49 = vector.shape_cast %45 : vector<2x32xbf16> to vector<1x2x32xbf16>
    tpu.vector_store %arg5[%46, %c0_21, %c0_22], %49 {strides = array<i32>} : memref<8x2x64xbf16, #tpu.memory_space<vmem>>, vector<1x2x32xbf16>,
    %c7_i32 = arith.constant 7 : i32
    %50 = arith.subi %c7_i32, %c0_i32 : i32
    %51 = arith.index_cast %50 : i32 to index
    %c0_23 = arith.constant 0 : index
    %c128 = arith.constant 128 : index
    %52 = vector.load %arg7[%51, %c0_23, %c128] : memref<8x2x256xf32, #tpu.memory_space<vmem>>, vector<1x2x128xf32>
    %53 = vector.shape_cast %52 : vector<1x2x128xf32> to vector<2x128xf32>
    %54 = arith.truncf %19 : vector<2x32xf32> to vector<2x32xbf16>
    %cst_24 = arith.constant dense<0.000000e+00> : vector<2x128xf32>
    %55 = tpu.matmul %54, %12, %cst_24 {dimension_numbers = #tpu.dot_dimension_numbers<[1], [0], [0], [1], [0, 0, 1, 1], [], []>} : vector<2x32xbf16>, vector<32x128xbf16>, vector<2x128xf32> -> vector<2x128xf32>
    %56 = arith.addf %53, %55 : vector<2x128xf32>
    %57 = arith.negf %56 : vector<2x128xf32>
    %58 = math.exp %57 : vector<2x128xf32>
    %cst_25 = arith.constant 1.000000e+00 : f32
    %59 = vector.broadcast %cst_25 : f32 to vector<2x128xf32>
    %60 = arith.addf %59, %58 : vector<2x128xf32>
    %61 = arith.divf %59, %60 : vector<2x128xf32>
    %cst_26 = arith.constant 2.000000e+00 : f32
    %62 = vector.broadcast %cst_26 : f32 to vector<2x128xf32>
    %63 = arith.mulf %62, %61 : vector<2x128xf32>
    %cst_27 = arith.constant 1.000000e+00 : f32
    %64 = vector.broadcast %cst_27 : f32 to vector<2x128xf32>
    %65 = arith.subf %63, %64 : vector<2x128xf32>
    %66 = arith.select %18, %65, %61 : vector<2x128xi1>, vector<2x128xf32>
    %67 = vector.extract_strided_slice %66 {offsets = [0, 0], sizes = [2, 32], strides = [1, 1]} : vector<2x128xf32> to vector<2x32xf32>
    %68 = vector.extract_strided_slice %66 {offsets = [0, 32], sizes = [2, 32], strides = [1, 1]} : vector<2x128xf32> to vector<2x32xf32>
    %69 = vector.extract_strided_slice %66 {offsets = [0, 64], sizes = [2, 32], strides = [1, 1]} : vector<2x128xf32> to vector<2x32xf32>
    %70 = vector.extract_strided_slice %66 {offsets = [0, 96], sizes = [2, 32], strides = [1, 1]} : vector<2x128xf32> to vector<2x32xf32>
    %71 = arith.mulf %68, %19 : vector<2x32xf32>
    %72 = arith.mulf %67, %69 : vector<2x32xf32>
    %73 = arith.addf %71, %72 : vector<2x32xf32>
    %74 = math.tanh %73 : vector<2x32xf32>
    %75 = arith.mulf %70, %74 : vector<2x32xf32>
    %76 = arith.truncf %75 : vector<2x32xf32> to vector<2x32xbf16>
    %77 = arith.index_cast %50 : i32 to index
    %c0_28 = arith.constant 0 : index
    %c32 = arith.constant 32 : index
    %78 = vector.load %arg5[%77, %c0_28, %c32] : memref<8x2x64xbf16, #tpu.memory_space<vmem>>, vector<1x2x32xbf16>
    %79 = vector.shape_cast %78 : vector<1x2x32xbf16> to vector<2x32xbf16>
    %80 = vector.shape_cast %76 : vector<2x32xbf16> to vector<1x2x32xbf16>
    tpu.vector_store %arg5[%77, %c0_28, %c32], %80 {strides = array<i32>} : memref<8x2x64xbf16, #tpu.memory_space<vmem>>, vector<1x2x32xbf16>,
    %c1_i32 = arith.constant 1 : i32
    %81 = arith.index_cast %c1_i32 : i32 to index
    %c0_29 = arith.constant 0 : index
    %c0_30 = arith.constant 0 : index
    %82 = vector.load %arg7[%81, %c0_29, %c0_30] : memref<8x2x256xf32, #tpu.memory_space<vmem>>, vector<1x2x128xf32>
    %83 = vector.shape_cast %82 : vector<1x2x128xf32> to vector<2x128xf32>
    %84 = arith.truncf %44 : vector<2x32xf32> to vector<2x32xbf16>
    %cst_31 = arith.constant dense<0.000000e+00> : vector<2x128xf32>
    %85 = tpu.matmul %84, %10, %cst_31 {dimension_numbers = #tpu.dot_dimension_numbers<[1], [0], [0], [1], [0, 0, 1, 1], [], []>} : vector<2x32xbf16>, vector<32x128xbf16>, vector<2x128xf32> -> vector<2x128xf32>
    %86 = arith.addf %83, %85 : vector<2x128xf32>
    %87 = arith.negf %86 : vector<2x128xf32>
    %88 = math.exp %87 : vector<2x128xf32>
    %cst_32 = arith.constant 1.000000e+00 : f32
    %89 = vector.broadcast %cst_32 : f32 to vector<2x128xf32>
    %90 = arith.addf %89, %88 : vector<2x128xf32>
    %91 = arith.divf %89, %90 : vector<2x128xf32>
    %cst_33 = arith.constant 2.000000e+00 : f32
    %92 = vector.broadcast %cst_33 : f32 to vector<2x128xf32>
    %93 = arith.mulf %92, %91 : vector<2x128xf32>
    %cst_34 = arith.constant 1.000000e+00 : f32
    %94 = vector.broadcast %cst_34 : f32 to vector<2x128xf32>
    %95 = arith.subf %93, %94 : vector<2x128xf32>
    %96 = arith.select %18, %95, %91 : vector<2x128xi1>, vector<2x128xf32>
    %97 = vector.extract_strided_slice %96 {offsets = [0, 0], sizes = [2, 32], strides = [1, 1]} : vector<2x128xf32> to vector<2x32xf32>
    %98 = vector.extract_strided_slice %96 {offsets = [0, 32], sizes = [2, 32], strides = [1, 1]} : vector<2x128xf32> to vector<2x32xf32>
    %99 = vector.extract_strided_slice %96 {offsets = [0, 64], sizes = [2, 32], strides = [1, 1]} : vector<2x128xf32> to vector<2x32xf32>
    %100 = vector.extract_strided_slice %96 {offsets = [0, 96], sizes = [2, 32], strides = [1, 1]} : vector<2x128xf32> to vector<2x32xf32>
    %101 = arith.mulf %98, %42 : vector<2x32xf32>
    %102 = arith.mulf %97, %99 : vector<2x32xf32>
    %103 = arith.addf %101, %102 : vector<2x32xf32>
    %104 = math.tanh %103 : vector<2x32xf32>
    %105 = arith.mulf %100, %104 : vector<2x32xf32>
    %106 = arith.truncf %105 : vector<2x32xf32> to vector<2x32xbf16>
    %107 = arith.index_cast %c1_i32 : i32 to index
    %c0_35 = arith.constant 0 : index
    %c0_36 = arith.constant 0 : index
    %108 = vector.load %arg5[%107, %c0_35, %c0_36] : memref<8x2x64xbf16, #tpu.memory_space<vmem>>, vector<1x2x32xbf16>
    %109 = vector.shape_cast %108 : vector<1x2x32xbf16> to vector<2x32xbf16>
    %110 = vector.shape_cast %106 : vector<2x32xbf16> to vector<1x2x32xbf16>
    tpu.vector_store %arg5[%107, %c0_35, %c0_36], %110 {strides = array<i32>} : memref<8x2x64xbf16, #tpu.memory_space<vmem>>, vector<1x2x32xbf16>,
    %c7_i32_37 = arith.constant 7 : i32
    %111 = arith.subi %c7_i32_37, %c1_i32 : i32
    %112 = arith.index_cast %111 : i32 to index
    %c0_38 = arith.constant 0 : index
    %c128_39 = arith.constant 128 : index
    %113 = vector.load %arg7[%112, %c0_38, %c128_39] : memref<8x2x256xf32, #tpu.memory_space<vmem>>, vector<1x2x128xf32>
    %114 = vector.shape_cast %113 : vector<1x2x128xf32> to vector<2x128xf32>
    %115 = arith.truncf %75 : vector<2x32xf32> to vector<2x32xbf16>
    %cst_40 = arith.constant dense<0.000000e+00> : vector<2x128xf32>
    %116 = tpu.matmul %115, %12, %cst_40 {dimension_numbers = #tpu.dot_dimension_numbers<[1], [0], [0], [1], [0, 0, 1, 1], [], []>} : vector<2x32xbf16>, vector<32x128xbf16>, vector<2x128xf32> -> vector<2x128xf32>
    %117 = arith.addf %114, %116 : vector<2x128xf32>
    %118 = arith.negf %117 : vector<2x128xf32>
    %119 = math.exp %118 : vector<2x128xf32>
    %cst_41 = arith.constant 1.000000e+00 : f32
    %120 = vector.broadcast %cst_41 : f32 to vector<2x128xf32>
    %121 = arith.addf %120, %119 : vector<2x128xf32>
    %122 = arith.divf %120, %121 : vector<2x128xf32>
    %cst_42 = arith.constant 2.000000e+00 : f32
    %123 = vector.broadcast %cst_42 : f32 to vector<2x128xf32>
    %124 = arith.mulf %123, %122 : vector<2x128xf32>
    %cst_43 = arith.constant 1.000000e+00 : f32
    %125 = vector.broadcast %cst_43 : f32 to vector<2x128xf32>
    %126 = arith.subf %124, %125 : vector<2x128xf32>
    %127 = arith.select %18, %126, %122 : vector<2x128xi1>, vector<2x128xf32>
    %128 = vector.extract_strided_slice %127 {offsets = [0, 0], sizes = [2, 32], strides = [1, 1]} : vector<2x128xf32> to vector<2x32xf32>
    %129 = vector.extract_strided_slice %127 {offsets = [0, 32], sizes = [2, 32], strides = [1, 1]} : vector<2x128xf32> to vector<2x32xf32>
    %130 = vector.extract_strided_slice %127 {offsets = [0, 64], sizes = [2, 32], strides = [1, 1]} : vector<2x128xf32> to vector<2x32xf32>
    %131 = vector.extract_strided_slice %127 {offsets = [0, 96], sizes = [2, 32], strides = [1, 1]} : vector<2x128xf32> to vector<2x32xf32>
    %132 = arith.mulf %129, %73 : vector<2x32xf32>
    %133 = arith.mulf %128, %130 : vector<2x32xf32>
    %134 = arith.addf %132, %133 : vector<2x32xf32>
    %135 = math.tanh %134 : vector<2x32xf32>
    %136 = arith.mulf %131, %135 : vector<2x32xf32>
    %137 = arith.truncf %136 : vector<2x32xf32> to vector<2x32xbf16>
    %138 = arith.index_cast %111 : i32 to index
    %c0_44 = arith.constant 0 : index
    %c32_45 = arith.constant 32 : index
    %139 = vector.load %arg5[%138, %c0_44, %c32_45] : memref<8x2x64xbf16, #tpu.memory_space<vmem>>, vector<1x2x32xbf16>
    %140 = vector.shape_cast %139 : vector<1x2x32xbf16> to vector<2x32xbf16>
    %141 = vector.shape_cast %137 : vector<2x32xbf16> to vector<1x2x32xbf16>
    tpu.vector_store %arg5[%138, %c0_44, %c32_45], %141 {strides = array<i32>} : memref<8x2x64xbf16, #tpu.memory_space<vmem>>, vector<1x2x32xbf16>,
    %c2_i32 = arith.constant 2 : i32
    %142 = arith.index_cast %c2_i32 : i32 to index
    %c0_46 = arith.constant 0 : index
    %c0_47 = arith.constant 0 : index
    %143 = vector.load %arg7[%142, %c0_46, %c0_47] : memref<8x2x256xf32, #tpu.memory_space<vmem>>, vector<1x2x128xf32>
    %144 = vector.shape_cast %143 : vector<1x2x128xf32> to vector<2x128xf32>
    %145 = arith.truncf %105 : vector<2x32xf32> to vector<2x32xbf16>
    %cst_48 = arith.constant dense<0.000000e+00> : vector<2x128xf32>
    %146 = tpu.matmul %145, %10, %cst_48 {dimension_numbers = #tpu.dot_dimension_numbers<[1], [0], [0], [1], [0, 0, 1, 1], [], []>} : vector<2x32xbf16>, vector<32x128xbf16>, vector<2x128xf32> -> vector<2x128xf32>
    %147 = arith.addf %144, %146 : vector<2x128xf32>
    %148 = arith.negf %147 : vector<2x128xf32>
    %149 = math.exp %148 : vector<2x128xf32>
    %cst_49 = arith.constant 1.000000e+00 : f32
    %150 = vector.broadcast %cst_49 : f32 to vector<2x128xf32>
    %151 = arith.addf %150, %149 : vector<2x128xf32>
    %152 = arith.divf %150, %151 : vector<2x128xf32>
    %cst_50 = arith.constant 2.000000e+00 : f32
    %153 = vector.broadcast %cst_50 : f32 to vector<2x128xf32>
    %154 = arith.mulf %153, %152 : vector<2x128xf32>
    %cst_51 = arith.constant 1.000000e+00 : f32
    %155 = vector.broadcast %cst_51 : f32 to vector<2x128xf32>
    %156 = arith.subf %154, %155 : vector<2x128xf32>
    %157 = arith.select %18, %156, %152 : vector<2x128xi1>, vector<2x128xf32>
    %158 = vector.extract_strided_slice %157 {offsets = [0, 0], sizes = [2, 32], strides = [1, 1]} : vector<2x128xf32> to vector<2x32xf32>
    %159 = vector.extract_strided_slice %157 {offsets = [0, 32], sizes = [2, 32], strides = [1, 1]} : vector<2x128xf32> to vector<2x32xf32>
    %160 = vector.extract_strided_slice %157 {offsets = [0, 64], sizes = [2, 32], strides = [1, 1]} : vector<2x128xf32> to vector<2x32xf32>
    %161 = vector.extract_strided_slice %157 {offsets = [0, 96], sizes = [2, 32], strides = [1, 1]} : vector<2x128xf32> to vector<2x32xf32>
    %162 = arith.mulf %159, %103 : vector<2x32xf32>
    %163 = arith.mulf %158, %160 : vector<2x32xf32>
    %164 = arith.addf %162, %163 : vector<2x32xf32>
    %165 = math.tanh %164 : vector<2x32xf32>
    %166 = arith.mulf %161, %165 : vector<2x32xf32>
    %167 = arith.truncf %166 : vector<2x32xf32> to vector<2x32xbf16>
    %168 = arith.index_cast %c2_i32 : i32 to index
    %c0_52 = arith.constant 0 : index
    %c0_53 = arith.constant 0 : index
    %169 = vector.load %arg5[%168, %c0_52, %c0_53] : memref<8x2x64xbf16, #tpu.memory_space<vmem>>, vector<1x2x32xbf16>
    %170 = vector.shape_cast %169 : vector<1x2x32xbf16> to vector<2x32xbf16>
    %171 = vector.shape_cast %167 : vector<2x32xbf16> to vector<1x2x32xbf16>
    tpu.vector_store %arg5[%168, %c0_52, %c0_53], %171 {strides = array<i32>} : memref<8x2x64xbf16, #tpu.memory_space<vmem>>, vector<1x2x32xbf16>,
    %c7_i32_54 = arith.constant 7 : i32
    %172 = arith.subi %c7_i32_54, %c2_i32 : i32
    %173 = arith.index_cast %172 : i32 to index
    %c0_55 = arith.constant 0 : index
    %c128_56 = arith.constant 128 : index
    %174 = vector.load %arg7[%173, %c0_55, %c128_56] : memref<8x2x256xf32, #tpu.memory_space<vmem>>, vector<1x2x128xf32>
    %175 = vector.shape_cast %174 : vector<1x2x128xf32> to vector<2x128xf32>
    %176 = arith.truncf %136 : vector<2x32xf32> to vector<2x32xbf16>
    %cst_57 = arith.constant dense<0.000000e+00> : vector<2x128xf32>
    %177 = tpu.matmul %176, %12, %cst_57 {dimension_numbers = #tpu.dot_dimension_numbers<[1], [0], [0], [1], [0, 0, 1, 1], [], []>} : vector<2x32xbf16>, vector<32x128xbf16>, vector<2x128xf32> -> vector<2x128xf32>
    %178 = arith.addf %175, %177 : vector<2x128xf32>
    %179 = arith.negf %178 : vector<2x128xf32>
    %180 = math.exp %179 : vector<2x128xf32>
    %cst_58 = arith.constant 1.000000e+00 : f32
    %181 = vector.broadcast %cst_58 : f32 to vector<2x128xf32>
    %182 = arith.addf %181, %180 : vector<2x128xf32>
    %183 = arith.divf %181, %182 : vector<2x128xf32>
    %cst_59 = arith.constant 2.000000e+00 : f32
    %184 = vector.broadcast %cst_59 : f32 to vector<2x128xf32>
    %185 = arith.mulf %184, %183 : vector<2x128xf32>
    %cst_60 = arith.constant 1.000000e+00 : f32
    %186 = vector.broadcast %cst_60 : f32 to vector<2x128xf32>
    %187 = arith.subf %185, %186 : vector<2x128xf32>
    %188 = arith.select %18, %187, %183 : vector<2x128xi1>, vector<2x128xf32>
    %189 = vector.extract_strided_slice %188 {offsets = [0, 0], sizes = [2, 32], strides = [1, 1]} : vector<2x128xf32> to vector<2x32xf32>
    %190 = vector.extract_strided_slice %188 {offsets = [0, 32], sizes = [2, 32], strides = [1, 1]} : vector<2x128xf32> to vector<2x32xf32>
    %191 = vector.extract_strided_slice %188 {offsets = [0, 64], sizes = [2, 32], strides = [1, 1]} : vector<2x128xf32> to vector<2x32xf32>
    %192 = vector.extract_strided_slice %188 {offsets = [0, 96], sizes = [2, 32], strides = [1, 1]} : vector<2x128xf32> to vector<2x32xf32>
    %193 = arith.mulf %190, %134 : vector<2x32xf32>
    %194 = arith.mulf %189, %191 : vector<2x32xf32>
    %195 = arith.addf %193, %194 : vector<2x32xf32>
    %196 = math.tanh %195 : vector<2x32xf32>
    %197 = arith.mulf %192, %196 : vector<2x32xf32>
    %198 = arith.truncf %197 : vector<2x32xf32> to vector<2x32xbf16>
    %199 = arith.index_cast %172 : i32 to index
    %c0_61 = arith.constant 0 : index
    %c32_62 = arith.constant 32 : index
    %200 = vector.load %arg5[%199, %c0_61, %c32_62] : memref<8x2x64xbf16, #tpu.memory_space<vmem>>, vector<1x2x32xbf16>
    %201 = vector.shape_cast %200 : vector<1x2x32xbf16> to vector<2x32xbf16>
    %202 = vector.shape_cast %198 : vector<2x32xbf16> to vector<1x2x32xbf16>
    tpu.vector_store %arg5[%199, %c0_61, %c32_62], %202 {strides = array<i32>} : memref<8x2x64xbf16, #tpu.memory_space<vmem>>, vector<1x2x32xbf16>,
    %c3_i32 = arith.constant 3 : i32
    %203 = arith.index_cast %c3_i32 : i32 to index
    %c0_63 = arith.constant 0 : index
    %c0_64 = arith.constant 0 : index
    %204 = vector.load %arg7[%203, %c0_63, %c0_64] : memref<8x2x256xf32, #tpu.memory_space<vmem>>, vector<1x2x128xf32>
    %205 = vector.shape_cast %204 : vector<1x2x128xf32> to vector<2x128xf32>
    %206 = arith.truncf %166 : vector<2x32xf32> to vector<2x32xbf16>
    %cst_65 = arith.constant dense<0.000000e+00> : vector<2x128xf32>
    %207 = tpu.matmul %206, %10, %cst_65 {dimension_numbers = #tpu.dot_dimension_numbers<[1], [0], [0], [1], [0, 0, 1, 1], [], []>} : vector<2x32xbf16>, vector<32x128xbf16>, vector<2x128xf32> -> vector<2x128xf32>
    %208 = arith.addf %205, %207 : vector<2x128xf32>
    %209 = arith.negf %208 : vector<2x128xf32>
    %210 = math.exp %209 : vector<2x128xf32>
    %cst_66 = arith.constant 1.000000e+00 : f32
    %211 = vector.broadcast %cst_66 : f32 to vector<2x128xf32>
    %212 = arith.addf %211, %210 : vector<2x128xf32>
    %213 = arith.divf %211, %212 : vector<2x128xf32>
    %cst_67 = arith.constant 2.000000e+00 : f32
    %214 = vector.broadcast %cst_67 : f32 to vector<2x128xf32>
    %215 = arith.mulf %214, %213 : vector<2x128xf32>
    %cst_68 = arith.constant 1.000000e+00 : f32
    %216 = vector.broadcast %cst_68 : f32 to vector<2x128xf32>
    %217 = arith.subf %215, %216 : vector<2x128xf32>
    %218 = arith.select %18, %217, %213 : vector<2x128xi1>, vector<2x128xf32>
    %219 = vector.extract_strided_slice %218 {offsets = [0, 0], sizes = [2, 32], strides = [1, 1]} : vector<2x128xf32> to vector<2x32xf32>
    %220 = vector.extract_strided_slice %218 {offsets = [0, 32], sizes = [2, 32], strides = [1, 1]} : vector<2x128xf32> to vector<2x32xf32>
    %221 = vector.extract_strided_slice %218 {offsets = [0, 64], sizes = [2, 32], strides = [1, 1]} : vector<2x128xf32> to vector<2x32xf32>
    %222 = vector.extract_strided_slice %218 {offsets = [0, 96], sizes = [2, 32], strides = [1, 1]} : vector<2x128xf32> to vector<2x32xf32>
    %223 = arith.mulf %220, %164 : vector<2x32xf32>
    %224 = arith.mulf %219, %221 : vector<2x32xf32>
    %225 = arith.addf %223, %224 : vector<2x32xf32>
    %226 = math.tanh %225 : vector<2x32xf32>
    %227 = arith.mulf %222, %226 : vector<2x32xf32>
    %228 = arith.truncf %227 : vector<2x32xf32> to vector<2x32xbf16>
    %229 = arith.index_cast %c3_i32 : i32 to index
    %c0_69 = arith.constant 0 : index
    %c0_70 = arith.constant 0 : index
    %230 = vector.load %arg5[%229, %c0_69, %c0_70] : memref<8x2x64xbf16, #tpu.memory_space<vmem>>, vector<1x2x32xbf16>
    %231 = vector.shape_cast %230 : vector<1x2x32xbf16> to vector<2x32xbf16>
    %232 = vector.shape_cast %228 : vector<2x32xbf16> to vector<1x2x32xbf16>
    tpu.vector_store %arg5[%229, %c0_69, %c0_70], %232 {strides = array<i32>} : memref<8x2x64xbf16, #tpu.memory_space<vmem>>, vector<1x2x32xbf16>,
    %c7_i32_71 = arith.constant 7 : i32
    %233 = arith.subi %c7_i32_71, %c3_i32 : i32
    %234 = arith.index_cast %233 : i32 to index
    %c0_72 = arith.constant 0 : index
    %c128_73 = arith.constant 128 : index
    %235 = vector.load %arg7[%234, %c0_72, %c128_73] : memref<8x2x256xf32, #tpu.memory_space<vmem>>, vector<1x2x128xf32>
    %236 = vector.shape_cast %235 : vector<1x2x128xf32> to vector<2x128xf32>
    %237 = arith.truncf %197 : vector<2x32xf32> to vector<2x32xbf16>
    %cst_74 = arith.constant dense<0.000000e+00> : vector<2x128xf32>
    %238 = tpu.matmul %237, %12, %cst_74 {dimension_numbers = #tpu.dot_dimension_numbers<[1], [0], [0], [1], [0, 0, 1, 1], [], []>} : vector<2x32xbf16>, vector<32x128xbf16>, vector<2x128xf32> -> vector<2x128xf32>
    %239 = arith.addf %236, %238 : vector<2x128xf32>
    %240 = arith.negf %239 : vector<2x128xf32>
    %241 = math.exp %240 : vector<2x128xf32>
    %cst_75 = arith.constant 1.000000e+00 : f32
    %242 = vector.broadcast %cst_75 : f32 to vector<2x128xf32>
    %243 = arith.addf %242, %241 : vector<2x128xf32>
    %244 = arith.divf %242, %243 : vector<2x128xf32>
    %cst_76 = arith.constant 2.000000e+00 : f32
    %245 = vector.broadcast %cst_76 : f32 to vector<2x128xf32>
    %246 = arith.mulf %245, %244 : vector<2x128xf32>
    %cst_77 = arith.constant 1.000000e+00 : f32
    %247 = vector.broadcast %cst_77 : f32 to vector<2x128xf32>
    %248 = arith.subf %246, %247 : vector<2x128xf32>
    %249 = arith.select %18, %248, %244 : vector<2x128xi1>, vector<2x128xf32>
    %250 = vector.extract_strided_slice %249 {offsets = [0, 0], sizes = [2, 32], strides = [1, 1]} : vector<2x128xf32> to vector<2x32xf32>
    %251 = vector.extract_strided_slice %249 {offsets = [0, 32], sizes = [2, 32], strides = [1, 1]} : vector<2x128xf32> to vector<2x32xf32>
    %252 = vector.extract_strided_slice %249 {offsets = [0, 64], sizes = [2, 32], strides = [1, 1]} : vector<2x128xf32> to vector<2x32xf32>
    %253 = vector.extract_strided_slice %249 {offsets = [0, 96], sizes = [2, 32], strides = [1, 1]} : vector<2x128xf32> to vector<2x32xf32>
    %254 = arith.mulf %251, %195 : vector<2x32xf32>
    %255 = arith.mulf %250, %252 : vector<2x32xf32>
    %256 = arith.addf %254, %255 : vector<2x32xf32>
    %257 = math.tanh %256 : vector<2x32xf32>
    %258 = arith.mulf %253, %257 : vector<2x32xf32>
    %259 = arith.truncf %258 : vector<2x32xf32> to vector<2x32xbf16>
    %260 = arith.index_cast %233 : i32 to index
    %c0_78 = arith.constant 0 : index
    %c32_79 = arith.constant 32 : index
    %261 = vector.load %arg5[%260, %c0_78, %c32_79] : memref<8x2x64xbf16, #tpu.memory_space<vmem>>, vector<1x2x32xbf16>
    %262 = vector.shape_cast %261 : vector<1x2x32xbf16> to vector<2x32xbf16>
    %263 = vector.shape_cast %259 : vector<2x32xbf16> to vector<1x2x32xbf16>
    tpu.vector_store %arg5[%260, %c0_78, %c32_79], %263 {strides = array<i32>} : memref<8x2x64xbf16, #tpu.memory_space<vmem>>, vector<1x2x32xbf16>,
    %c4_i32 = arith.constant 4 : i32
    %264 = arith.index_cast %c4_i32 : i32 to index
    %c0_80 = arith.constant 0 : index
    %c0_81 = arith.constant 0 : index
    %265 = vector.load %arg7[%264, %c0_80, %c0_81] : memref<8x2x256xf32, #tpu.memory_space<vmem>>, vector<1x2x128xf32>
    %266 = vector.shape_cast %265 : vector<1x2x128xf32> to vector<2x128xf32>
    %267 = arith.truncf %227 : vector<2x32xf32> to vector<2x32xbf16>
    %cst_82 = arith.constant dense<0.000000e+00> : vector<2x128xf32>
    %268 = tpu.matmul %267, %10, %cst_82 {dimension_numbers = #tpu.dot_dimension_numbers<[1], [0], [0], [1], [0, 0, 1, 1], [], []>} : vector<2x32xbf16>, vector<32x128xbf16>, vector<2x128xf32> -> vector<2x128xf32>
    %269 = arith.addf %266, %268 : vector<2x128xf32>
    %270 = arith.negf %269 : vector<2x128xf32>
    %271 = math.exp %270 : vector<2x128xf32>
    %cst_83 = arith.constant 1.000000e+00 : f32
    %272 = vector.broadcast %cst_83 : f32 to vector<2x128xf32>
    %273 = arith.addf %272, %271 : vector<2x128xf32>
    %274 = arith.divf %272, %273 : vector<2x128xf32>
    %cst_84 = arith.constant 2.000000e+00 : f32
    %275 = vector.broadcast %cst_84 : f32 to vector<2x128xf32>
    %276 = arith.mulf %275, %274 : vector<2x128xf32>
    %cst_85 = arith.constant 1.000000e+00 : f32
    %277 = vector.broadcast %cst_85 : f32 to vector<2x128xf32>
    %278 = arith.subf %276, %277 : vector<2x128xf32>
    %279 = arith.select %18, %278, %274 : vector<2x128xi1>, vector<2x128xf32>
    %280 = vector.extract_strided_slice %279 {offsets = [0, 0], sizes = [2, 32], strides = [1, 1]} : vector<2x128xf32> to vector<2x32xf32>
    %281 = vector.extract_strided_slice %279 {offsets = [0, 32], sizes = [2, 32], strides = [1, 1]} : vector<2x128xf32> to vector<2x32xf32>
    %282 = vector.extract_strided_slice %279 {offsets = [0, 64], sizes = [2, 32], strides = [1, 1]} : vector<2x128xf32> to vector<2x32xf32>
    %283 = vector.extract_strided_slice %279 {offsets = [0, 96], sizes = [2, 32], strides = [1, 1]} : vector<2x128xf32> to vector<2x32xf32>
    %284 = arith.mulf %281, %225 : vector<2x32xf32>
    %285 = arith.mulf %280, %282 : vector<2x32xf32>
    %286 = arith.addf %284, %285 : vector<2x32xf32>
    %287 = math.tanh %286 : vector<2x32xf32>
    %288 = arith.mulf %283, %287 : vector<2x32xf32>
    %289 = arith.truncf %288 : vector<2x32xf32> to vector<2x32xbf16>
    %290 = arith.index_cast %c4_i32 : i32 to index
    %c0_86 = arith.constant 0 : index
    %c0_87 = arith.constant 0 : index
    %291 = vector.load %arg5[%290, %c0_86, %c0_87] : memref<8x2x64xbf16, #tpu.memory_space<vmem>>, vector<1x2x32xbf16>
    %292 = vector.shape_cast %291 : vector<1x2x32xbf16> to vector<2x32xbf16>
    %293 = vector.shape_cast %289 : vector<2x32xbf16> to vector<1x2x32xbf16>
    tpu.vector_store %arg5[%290, %c0_86, %c0_87], %293 {strides = array<i32>} : memref<8x2x64xbf16, #tpu.memory_space<vmem>>, vector<1x2x32xbf16>,
    %c7_i32_88 = arith.constant 7 : i32
    %294 = arith.subi %c7_i32_88, %c4_i32 : i32
    %295 = arith.index_cast %294 : i32 to index
    %c0_89 = arith.constant 0 : index
    %c128_90 = arith.constant 128 : index
    %296 = vector.load %arg7[%295, %c0_89, %c128_90] : memref<8x2x256xf32, #tpu.memory_space<vmem>>, vector<1x2x128xf32>
    %297 = vector.shape_cast %296 : vector<1x2x128xf32> to vector<2x128xf32>
    %298 = arith.truncf %258 : vector<2x32xf32> to vector<2x32xbf16>
    %cst_91 = arith.constant dense<0.000000e+00> : vector<2x128xf32>
    %299 = tpu.matmul %298, %12, %cst_91 {dimension_numbers = #tpu.dot_dimension_numbers<[1], [0], [0], [1], [0, 0, 1, 1], [], []>} : vector<2x32xbf16>, vector<32x128xbf16>, vector<2x128xf32> -> vector<2x128xf32>
    %300 = arith.addf %297, %299 : vector<2x128xf32>
    %301 = arith.negf %300 : vector<2x128xf32>
    %302 = math.exp %301 : vector<2x128xf32>
    %cst_92 = arith.constant 1.000000e+00 : f32
    %303 = vector.broadcast %cst_92 : f32 to vector<2x128xf32>
    %304 = arith.addf %303, %302 : vector<2x128xf32>
    %305 = arith.divf %303, %304 : vector<2x128xf32>
    %cst_93 = arith.constant 2.000000e+00 : f32
    %306 = vector.broadcast %cst_93 : f32 to vector<2x128xf32>
    %307 = arith.mulf %306, %305 : vector<2x128xf32>
    %cst_94 = arith.constant 1.000000e+00 : f32
    %308 = vector.broadcast %cst_94 : f32 to vector<2x128xf32>
    %309 = arith.subf %307, %308 : vector<2x128xf32>
    %310 = arith.select %18, %309, %305 : vector<2x128xi1>, vector<2x128xf32>
    %311 = vector.extract_strided_slice %310 {offsets = [0, 0], sizes = [2, 32], strides = [1, 1]} : vector<2x128xf32> to vector<2x32xf32>
    %312 = vector.extract_strided_slice %310 {offsets = [0, 32], sizes = [2, 32], strides = [1, 1]} : vector<2x128xf32> to vector<2x32xf32>
    %313 = vector.extract_strided_slice %310 {offsets = [0, 64], sizes = [2, 32], strides = [1, 1]} : vector<2x128xf32> to vector<2x32xf32>
    %314 = vector.extract_strided_slice %310 {offsets = [0, 96], sizes = [2, 32], strides = [1, 1]} : vector<2x128xf32> to vector<2x32xf32>
    %315 = arith.mulf %312, %256 : vector<2x32xf32>
    %316 = arith.mulf %311, %313 : vector<2x32xf32>
    %317 = arith.addf %315, %316 : vector<2x32xf32>
    %318 = math.tanh %317 : vector<2x32xf32>
    %319 = arith.mulf %314, %318 : vector<2x32xf32>
    %320 = arith.truncf %319 : vector<2x32xf32> to vector<2x32xbf16>
    %321 = arith.index_cast %294 : i32 to index
    %c0_95 = arith.constant 0 : index
    %c32_96 = arith.constant 32 : index
    %322 = vector.load %arg5[%321, %c0_95, %c32_96] : memref<8x2x64xbf16, #tpu.memory_space<vmem>>, vector<1x2x32xbf16>
    %323 = vector.shape_cast %322 : vector<1x2x32xbf16> to vector<2x32xbf16>
    %324 = vector.shape_cast %320 : vector<2x32xbf16> to vector<1x2x32xbf16>
    tpu.vector_store %arg5[%321, %c0_95, %c32_96], %324 {strides = array<i32>} : memref<8x2x64xbf16, #tpu.memory_space<vmem>>, vector<1x2x32xbf16>,
    %c5_i32 = arith.constant 5 : i32
    %325 = arith.index_cast %c5_i32 : i32 to index
    %c0_97 = arith.constant 0 : index
    %c0_98 = arith.constant 0 : index
    %326 = vector.load %arg7[%325, %c0_97, %c0_98] : memref<8x2x256xf32, #tpu.memory_space<vmem>>, vector<1x2x128xf32>
    %327 = vector.shape_cast %326 : vector<1x2x128xf32> to vector<2x128xf32>
    %328 = arith.truncf %288 : vector<2x32xf32> to vector<2x32xbf16>
    %cst_99 = arith.constant dense<0.000000e+00> : vector<2x128xf32>
    %329 = tpu.matmul %328, %10, %cst_99 {dimension_numbers = #tpu.dot_dimension_numbers<[1], [0], [0], [1], [0, 0, 1, 1], [], []>} : vector<2x32xbf16>, vector<32x128xbf16>, vector<2x128xf32> -> vector<2x128xf32>
    %330 = arith.addf %327, %329 : vector<2x128xf32>
    %331 = arith.negf %330 : vector<2x128xf32>
    %332 = math.exp %331 : vector<2x128xf32>
    %cst_100 = arith.constant 1.000000e+00 : f32
    %333 = vector.broadcast %cst_100 : f32 to vector<2x128xf32>
    %334 = arith.addf %333, %332 : vector<2x128xf32>
    %335 = arith.divf %333, %334 : vector<2x128xf32>
    %cst_101 = arith.constant 2.000000e+00 : f32
    %336 = vector.broadcast %cst_101 : f32 to vector<2x128xf32>
    %337 = arith.mulf %336, %335 : vector<2x128xf32>
    %cst_102 = arith.constant 1.000000e+00 : f32
    %338 = vector.broadcast %cst_102 : f32 to vector<2x128xf32>
    %339 = arith.subf %337, %338 : vector<2x128xf32>
    %340 = arith.select %18, %339, %335 : vector<2x128xi1>, vector<2x128xf32>
    %341 = vector.extract_strided_slice %340 {offsets = [0, 0], sizes = [2, 32], strides = [1, 1]} : vector<2x128xf32> to vector<2x32xf32>
    %342 = vector.extract_strided_slice %340 {offsets = [0, 32], sizes = [2, 32], strides = [1, 1]} : vector<2x128xf32> to vector<2x32xf32>
    %343 = vector.extract_strided_slice %340 {offsets = [0, 64], sizes = [2, 32], strides = [1, 1]} : vector<2x128xf32> to vector<2x32xf32>
    %344 = vector.extract_strided_slice %340 {offsets = [0, 96], sizes = [2, 32], strides = [1, 1]} : vector<2x128xf32> to vector<2x32xf32>
    %345 = arith.mulf %342, %286 : vector<2x32xf32>
    %346 = arith.mulf %341, %343 : vector<2x32xf32>
    %347 = arith.addf %345, %346 : vector<2x32xf32>
    %348 = math.tanh %347 : vector<2x32xf32>
    %349 = arith.mulf %344, %348 : vector<2x32xf32>
    %350 = arith.truncf %349 : vector<2x32xf32> to vector<2x32xbf16>
    %351 = arith.index_cast %c5_i32 : i32 to index
    %c0_103 = arith.constant 0 : index
    %c0_104 = arith.constant 0 : index
    %352 = vector.load %arg5[%351, %c0_103, %c0_104] : memref<8x2x64xbf16, #tpu.memory_space<vmem>>, vector<1x2x32xbf16>
    %353 = vector.shape_cast %352 : vector<1x2x32xbf16> to vector<2x32xbf16>
    %354 = vector.shape_cast %350 : vector<2x32xbf16> to vector<1x2x32xbf16>
    tpu.vector_store %arg5[%351, %c0_103, %c0_104], %354 {strides = array<i32>} : memref<8x2x64xbf16, #tpu.memory_space<vmem>>, vector<1x2x32xbf16>,
    %c7_i32_105 = arith.constant 7 : i32
    %355 = arith.subi %c7_i32_105, %c5_i32 : i32
    %356 = arith.index_cast %355 : i32 to index
    %c0_106 = arith.constant 0 : index
    %c128_107 = arith.constant 128 : index
    %357 = vector.load %arg7[%356, %c0_106, %c128_107] : memref<8x2x256xf32, #tpu.memory_space<vmem>>, vector<1x2x128xf32>
    %358 = vector.shape_cast %357 : vector<1x2x128xf32> to vector<2x128xf32>
    %359 = arith.truncf %319 : vector<2x32xf32> to vector<2x32xbf16>
    %cst_108 = arith.constant dense<0.000000e+00> : vector<2x128xf32>
    %360 = tpu.matmul %359, %12, %cst_108 {dimension_numbers = #tpu.dot_dimension_numbers<[1], [0], [0], [1], [0, 0, 1, 1], [], []>} : vector<2x32xbf16>, vector<32x128xbf16>, vector<2x128xf32> -> vector<2x128xf32>
    %361 = arith.addf %358, %360 : vector<2x128xf32>
    %362 = arith.negf %361 : vector<2x128xf32>
    %363 = math.exp %362 : vector<2x128xf32>
    %cst_109 = arith.constant 1.000000e+00 : f32
    %364 = vector.broadcast %cst_109 : f32 to vector<2x128xf32>
    %365 = arith.addf %364, %363 : vector<2x128xf32>
    %366 = arith.divf %364, %365 : vector<2x128xf32>
    %cst_110 = arith.constant 2.000000e+00 : f32
    %367 = vector.broadcast %cst_110 : f32 to vector<2x128xf32>
    %368 = arith.mulf %367, %366 : vector<2x128xf32>
    %cst_111 = arith.constant 1.000000e+00 : f32
    %369 = vector.broadcast %cst_111 : f32 to vector<2x128xf32>
    %370 = arith.subf %368, %369 : vector<2x128xf32>
    %371 = arith.select %18, %370, %366 : vector<2x128xi1>, vector<2x128xf32>
    %372 = vector.extract_strided_slice %371 {offsets = [0, 0], sizes = [2, 32], strides = [1, 1]} : vector<2x128xf32> to vector<2x32xf32>
    %373 = vector.extract_strided_slice %371 {offsets = [0, 32], sizes = [2, 32], strides = [1, 1]} : vector<2x128xf32> to vector<2x32xf32>
    %374 = vector.extract_strided_slice %371 {offsets = [0, 64], sizes = [2, 32], strides = [1, 1]} : vector<2x128xf32> to vector<2x32xf32>
    %375 = vector.extract_strided_slice %371 {offsets = [0, 96], sizes = [2, 32], strides = [1, 1]} : vector<2x128xf32> to vector<2x32xf32>
    %376 = arith.mulf %373, %317 : vector<2x32xf32>
    %377 = arith.mulf %372, %374 : vector<2x32xf32>
    %378 = arith.addf %376, %377 : vector<2x32xf32>
    %379 = math.tanh %378 : vector<2x32xf32>
    %380 = arith.mulf %375, %379 : vector<2x32xf32>
    %381 = arith.truncf %380 : vector<2x32xf32> to vector<2x32xbf16>
    %382 = arith.index_cast %355 : i32 to index
    %c0_112 = arith.constant 0 : index
    %c32_113 = arith.constant 32 : index
    %383 = vector.load %arg5[%382, %c0_112, %c32_113] : memref<8x2x64xbf16, #tpu.memory_space<vmem>>, vector<1x2x32xbf16>
    %384 = vector.shape_cast %383 : vector<1x2x32xbf16> to vector<2x32xbf16>
    %385 = vector.shape_cast %381 : vector<2x32xbf16> to vector<1x2x32xbf16>
    tpu.vector_store %arg5[%382, %c0_112, %c32_113], %385 {strides = array<i32>} : memref<8x2x64xbf16, #tpu.memory_space<vmem>>, vector<1x2x32xbf16>,
    %c6_i32 = arith.constant 6 : i32
    %386 = arith.index_cast %c6_i32 : i32 to index
    %c0_114 = arith.constant 0 : index
    %c0_115 = arith.constant 0 : index
    %387 = vector.load %arg7[%386, %c0_114, %c0_115] : memref<8x2x256xf32, #tpu.memory_space<vmem>>, vector<1x2x128xf32>
    %388 = vector.shape_cast %387 : vector<1x2x128xf32> to vector<2x128xf32>
    %389 = arith.truncf %349 : vector<2x32xf32> to vector<2x32xbf16>
    %cst_116 = arith.constant dense<0.000000e+00> : vector<2x128xf32>
    %390 = tpu.matmul %389, %10, %cst_116 {dimension_numbers = #tpu.dot_dimension_numbers<[1], [0], [0], [1], [0, 0, 1, 1], [], []>} : vector<2x32xbf16>, vector<32x128xbf16>, vector<2x128xf32> -> vector<2x128xf32>
    %391 = arith.addf %388, %390 : vector<2x128xf32>
    %392 = arith.negf %391 : vector<2x128xf32>
    %393 = math.exp %392 : vector<2x128xf32>
    %cst_117 = arith.constant 1.000000e+00 : f32
    %394 = vector.broadcast %cst_117 : f32 to vector<2x128xf32>
    %395 = arith.addf %394, %393 : vector<2x128xf32>
    %396 = arith.divf %394, %395 : vector<2x128xf32>
    %cst_118 = arith.constant 2.000000e+00 : f32
    %397 = vector.broadcast %cst_118 : f32 to vector<2x128xf32>
    %398 = arith.mulf %397, %396 : vector<2x128xf32>
    %cst_119 = arith.constant 1.000000e+00 : f32
    %399 = vector.broadcast %cst_119 : f32 to vector<2x128xf32>
    %400 = arith.subf %398, %399 : vector<2x128xf32>
    %401 = arith.select %18, %400, %396 : vector<2x128xi1>, vector<2x128xf32>
    %402 = vector.extract_strided_slice %401 {offsets = [0, 0], sizes = [2, 32], strides = [1, 1]} : vector<2x128xf32> to vector<2x32xf32>
    %403 = vector.extract_strided_slice %401 {offsets = [0, 32], sizes = [2, 32], strides = [1, 1]} : vector<2x128xf32> to vector<2x32xf32>
    %404 = vector.extract_strided_slice %401 {offsets = [0, 64], sizes = [2, 32], strides = [1, 1]} : vector<2x128xf32> to vector<2x32xf32>
    %405 = vector.extract_strided_slice %401 {offsets = [0, 96], sizes = [2, 32], strides = [1, 1]} : vector<2x128xf32> to vector<2x32xf32>
    %406 = arith.mulf %403, %347 : vector<2x32xf32>
    %407 = arith.mulf %402, %404 : vector<2x32xf32>
    %408 = arith.addf %406, %407 : vector<2x32xf32>
    %409 = math.tanh %408 : vector<2x32xf32>
    %410 = arith.mulf %405, %409 : vector<2x32xf32>
    %411 = arith.truncf %410 : vector<2x32xf32> to vector<2x32xbf16>
    %412 = arith.index_cast %c6_i32 : i32 to index
    %c0_120 = arith.constant 0 : index
    %c0_121 = arith.constant 0 : index
    %413 = vector.load %arg5[%412, %c0_120, %c0_121] : memref<8x2x64xbf16, #tpu.memory_space<vmem>>, vector<1x2x32xbf16>
    %414 = vector.shape_cast %413 : vector<1x2x32xbf16> to vector<2x32xbf16>
    %415 = vector.shape_cast %411 : vector<2x32xbf16> to vector<1x2x32xbf16>
    tpu.vector_store %arg5[%412, %c0_120, %c0_121], %415 {strides = array<i32>} : memref<8x2x64xbf16, #tpu.memory_space<vmem>>, vector<1x2x32xbf16>,
    %c7_i32_122 = arith.constant 7 : i32
    %416 = arith.subi %c7_i32_122, %c6_i32 : i32
    %417 = arith.index_cast %416 : i32 to index
    %c0_123 = arith.constant 0 : index
    %c128_124 = arith.constant 128 : index
    %418 = vector.load %arg7[%417, %c0_123, %c128_124] : memref<8x2x256xf32, #tpu.memory_space<vmem>>, vector<1x2x128xf32>
    %419 = vector.shape_cast %418 : vector<1x2x128xf32> to vector<2x128xf32>
    %420 = arith.truncf %380 : vector<2x32xf32> to vector<2x32xbf16>
    %cst_125 = arith.constant dense<0.000000e+00> : vector<2x128xf32>
    %421 = tpu.matmul %420, %12, %cst_125 {dimension_numbers = #tpu.dot_dimension_numbers<[1], [0], [0], [1], [0, 0, 1, 1], [], []>} : vector<2x32xbf16>, vector<32x128xbf16>, vector<2x128xf32> -> vector<2x128xf32>
    %422 = arith.addf %419, %421 : vector<2x128xf32>
    %423 = arith.negf %422 : vector<2x128xf32>
    %424 = math.exp %423 : vector<2x128xf32>
    %cst_126 = arith.constant 1.000000e+00 : f32
    %425 = vector.broadcast %cst_126 : f32 to vector<2x128xf32>
    %426 = arith.addf %425, %424 : vector<2x128xf32>
    %427 = arith.divf %425, %426 : vector<2x128xf32>
    %cst_127 = arith.constant 2.000000e+00 : f32
    %428 = vector.broadcast %cst_127 : f32 to vector<2x128xf32>
    %429 = arith.mulf %428, %427 : vector<2x128xf32>
    %cst_128 = arith.constant 1.000000e+00 : f32
    %430 = vector.broadcast %cst_128 : f32 to vector<2x128xf32>
    %431 = arith.subf %429, %430 : vector<2x128xf32>
    %432 = arith.select %18, %431, %427 : vector<2x128xi1>, vector<2x128xf32>
    %433 = vector.extract_strided_slice %432 {offsets = [0, 0], sizes = [2, 32], strides = [1, 1]} : vector<2x128xf32> to vector<2x32xf32>
    %434 = vector.extract_strided_slice %432 {offsets = [0, 32], sizes = [2, 32], strides = [1, 1]} : vector<2x128xf32> to vector<2x32xf32>
    %435 = vector.extract_strided_slice %432 {offsets = [0, 64], sizes = [2, 32], strides = [1, 1]} : vector<2x128xf32> to vector<2x32xf32>
    %436 = vector.extract_strided_slice %432 {offsets = [0, 96], sizes = [2, 32], strides = [1, 1]} : vector<2x128xf32> to vector<2x32xf32>
    %437 = arith.mulf %434, %378 : vector<2x32xf32>
    %438 = arith.mulf %433, %435 : vector<2x32xf32>
    %439 = arith.addf %437, %438 : vector<2x32xf32>
    %440 = math.tanh %439 : vector<2x32xf32>
    %441 = arith.mulf %436, %440 : vector<2x32xf32>
    %442 = arith.truncf %441 : vector<2x32xf32> to vector<2x32xbf16>
    %443 = arith.index_cast %416 : i32 to index
    %c0_129 = arith.constant 0 : index
    %c32_130 = arith.constant 32 : index
    %444 = vector.load %arg5[%443, %c0_129, %c32_130] : memref<8x2x64xbf16, #tpu.memory_space<vmem>>, vector<1x2x32xbf16>
    %445 = vector.shape_cast %444 : vector<1x2x32xbf16> to vector<2x32xbf16>
    %446 = vector.shape_cast %442 : vector<2x32xbf16> to vector<1x2x32xbf16>
    tpu.vector_store %arg5[%443, %c0_129, %c32_130], %446 {strides = array<i32>} : memref<8x2x64xbf16, #tpu.memory_space<vmem>>, vector<1x2x32xbf16>,
    %c7_i32_131 = arith.constant 7 : i32
    %447 = arith.index_cast %c7_i32_131 : i32 to index
    %c0_132 = arith.constant 0 : index
    %c0_133 = arith.constant 0 : index
    %448 = vector.load %arg7[%447, %c0_132, %c0_133] : memref<8x2x256xf32, #tpu.memory_space<vmem>>, vector<1x2x128xf32>
    %449 = vector.shape_cast %448 : vector<1x2x128xf32> to vector<2x128xf32>
    %450 = arith.truncf %410 : vector<2x32xf32> to vector<2x32xbf16>
    %cst_134 = arith.constant dense<0.000000e+00> : vector<2x128xf32>
    %451 = tpu.matmul %450, %10, %cst_134 {dimension_numbers = #tpu.dot_dimension_numbers<[1], [0], [0], [1], [0, 0, 1, 1], [], []>} : vector<2x32xbf16>, vector<32x128xbf16>, vector<2x128xf32> -> vector<2x128xf32>
    %452 = arith.addf %449, %451 : vector<2x128xf32>
    %453 = arith.negf %452 : vector<2x128xf32>
    %454 = math.exp %453 : vector<2x128xf32>
    %cst_135 = arith.constant 1.000000e+00 : f32
    %455 = vector.broadcast %cst_135 : f32 to vector<2x128xf32>
    %456 = arith.addf %455, %454 : vector<2x128xf32>
    %457 = arith.divf %455, %456 : vector<2x128xf32>
    %cst_136 = arith.constant 2.000000e+00 : f32
    %458 = vector.broadcast %cst_136 : f32 to vector<2x128xf32>
    %459 = arith.mulf %458, %457 : vector<2x128xf32>
    %cst_137 = arith.constant 1.000000e+00 : f32
    %460 = vector.broadcast %cst_137 : f32 to vector<2x128xf32>
    %461 = arith.subf %459, %460 : vector<2x128xf32>
    %462 = arith.select %18, %461, %457 : vector<2x128xi1>, vector<2x128xf32>
    %463 = vector.extract_strided_slice %462 {offsets = [0, 0], sizes = [2, 32], strides = [1, 1]} : vector<2x128xf32> to vector<2x32xf32>
    %464 = vector.extract_strided_slice %462 {offsets = [0, 32], sizes = [2, 32], strides = [1, 1]} : vector<2x128xf32> to vector<2x32xf32>
    %465 = vector.extract_strided_slice %462 {offsets = [0, 64], sizes = [2, 32], strides = [1, 1]} : vector<2x128xf32> to vector<2x32xf32>
    %466 = vector.extract_strided_slice %462 {offsets = [0, 96], sizes = [2, 32], strides = [1, 1]} : vector<2x128xf32> to vector<2x32xf32>
    %467 = arith.mulf %464, %408 : vector<2x32xf32>
    %468 = arith.mulf %463, %465 : vector<2x32xf32>
    %469 = arith.addf %467, %468 : vector<2x32xf32>
    %470 = math.tanh %469 : vector<2x32xf32>
    %471 = arith.mulf %466, %470 : vector<2x32xf32>
    %472 = arith.truncf %471 : vector<2x32xf32> to vector<2x32xbf16>
    %473 = arith.index_cast %c7_i32_131 : i32 to index
    %c0_138 = arith.constant 0 : index
    %c0_139 = arith.constant 0 : index
    %474 = vector.load %arg5[%473, %c0_138, %c0_139] : memref<8x2x64xbf16, #tpu.memory_space<vmem>>, vector<1x2x32xbf16>
    %475 = vector.shape_cast %474 : vector<1x2x32xbf16> to vector<2x32xbf16>
    %476 = vector.shape_cast %472 : vector<2x32xbf16> to vector<1x2x32xbf16>
    tpu.vector_store %arg5[%473, %c0_138, %c0_139], %476 {strides = array<i32>} : memref<8x2x64xbf16, #tpu.memory_space<vmem>>, vector<1x2x32xbf16>,
    %c7_i32_140 = arith.constant 7 : i32
    %477 = arith.subi %c7_i32_140, %c7_i32_131 : i32
    %478 = arith.index_cast %477 : i32 to index
    %c0_141 = arith.constant 0 : index
    %c128_142 = arith.constant 128 : index
    %479 = vector.load %arg7[%478, %c0_141, %c128_142] : memref<8x2x256xf32, #tpu.memory_space<vmem>>, vector<1x2x128xf32>
    %480 = vector.shape_cast %479 : vector<1x2x128xf32> to vector<2x128xf32>
    %481 = arith.truncf %441 : vector<2x32xf32> to vector<2x32xbf16>
    %cst_143 = arith.constant dense<0.000000e+00> : vector<2x128xf32>
    %482 = tpu.matmul %481, %12, %cst_143 {dimension_numbers = #tpu.dot_dimension_numbers<[1], [0], [0], [1], [0, 0, 1, 1], [], []>} : vector<2x32xbf16>, vector<32x128xbf16>, vector<2x128xf32> -> vector<2x128xf32>
    %483 = arith.addf %480, %482 : vector<2x128xf32>
    %484 = arith.negf %483 : vector<2x128xf32>
    %485 = math.exp %484 : vector<2x128xf32>
    %cst_144 = arith.constant 1.000000e+00 : f32
    %486 = vector.broadcast %cst_144 : f32 to vector<2x128xf32>
    %487 = arith.addf %486, %485 : vector<2x128xf32>
    %488 = arith.divf %486, %487 : vector<2x128xf32>
    %cst_145 = arith.constant 2.000000e+00 : f32
    %489 = vector.broadcast %cst_145 : f32 to vector<2x128xf32>
    %490 = arith.mulf %489, %488 : vector<2x128xf32>
    %cst_146 = arith.constant 1.000000e+00 : f32
    %491 = vector.broadcast %cst_146 : f32 to vector<2x128xf32>
    %492 = arith.subf %490, %491 : vector<2x128xf32>
    %493 = arith.select %18, %492, %488 : vector<2x128xi1>, vector<2x128xf32>
    %494 = vector.extract_strided_slice %493 {offsets = [0, 0], sizes = [2, 32], strides = [1, 1]} : vector<2x128xf32> to vector<2x32xf32>
    %495 = vector.extract_strided_slice %493 {offsets = [0, 32], sizes = [2, 32], strides = [1, 1]} : vector<2x128xf32> to vector<2x32xf32>
    %496 = vector.extract_strided_slice %493 {offsets = [0, 64], sizes = [2, 32], strides = [1, 1]} : vector<2x128xf32> to vector<2x32xf32>
    %497 = vector.extract_strided_slice %493 {offsets = [0, 96], sizes = [2, 32], strides = [1, 1]} : vector<2x128xf32> to vector<2x32xf32>
    %498 = arith.mulf %495, %439 : vector<2x32xf32>
    %499 = arith.mulf %494, %496 : vector<2x32xf32>
    %500 = arith.addf %498, %499 : vector<2x32xf32>
    %501 = math.tanh %500 : vector<2x32xf32>
    %502 = arith.mulf %497, %501 : vector<2x32xf32>
    %503 = arith.truncf %502 : vector<2x32xf32> to vector<2x32xbf16>
    %504 = arith.index_cast %477 : i32 to index
    %c0_147 = arith.constant 0 : index
    %c32_148 = arith.constant 32 : index
    %505 = vector.load %arg5[%504, %c0_147, %c32_148] : memref<8x2x64xbf16, #tpu.memory_space<vmem>>, vector<1x2x32xbf16>
    %506 = vector.shape_cast %505 : vector<1x2x32xbf16> to vector<2x32xbf16>
    %507 = vector.shape_cast %503 : vector<2x32xbf16> to vector<1x2x32xbf16>
    tpu.vector_store %arg5[%504, %c0_147, %c32_148], %507 {strides = array<i32>} : memref<8x2x64xbf16, #tpu.memory_space<vmem>>, vector<1x2x32xbf16>,
    %c8_i32 = arith.constant 8 : i32
    %c0_149 = arith.constant 0 : index
    %c0_150 = arith.constant 0 : index
    %c0_151 = arith.constant 0 : index
    %508 = vector.load %arg6[%c0_149, %c0_150, %c0_151] : memref<2x2x32xf32, #tpu.memory_space<vmem>>, vector<1x2x32xf32>
    %509 = vector.shape_cast %508 : vector<1x2x32xf32> to vector<2x32xf32>
    %510 = vector.shape_cast %471 : vector<2x32xf32> to vector<1x2x32xf32>
    tpu.vector_store %arg6[%c0_149, %c0_150, %c0_151], %510 {strides = array<i32>} : memref<2x2x32xf32, #tpu.memory_space<vmem>>, vector<1x2x32xf32>,
    %c1_152 = arith.constant 1 : index
    %c0_153 = arith.constant 0 : index
    %c0_154 = arith.constant 0 : index
    %511 = vector.load %arg6[%c1_152, %c0_153, %c0_154] : memref<2x2x32xf32, #tpu.memory_space<vmem>>, vector<1x2x32xf32>
    %512 = vector.shape_cast %511 : vector<1x2x32xf32> to vector<2x32xf32>
    %513 = vector.shape_cast %502 : vector<2x32xf32> to vector<1x2x32xf32>
    tpu.vector_store %arg6[%c1_152, %c0_153, %c0_154], %513 {strides = array<i32>} : memref<2x2x32xf32, #tpu.memory_space<vmem>>, vector<1x2x32xf32>,
    return
  }
  func.func @transform_0(%arg0: i32) -> (i32, i32, i32) {
    %c0_i32 = arith.constant 0 : i32
    %c0_i32_0 = arith.constant 0 : i32
    %c0_i32_1 = arith.constant 0 : i32
    %c0_i32_2 = arith.constant 0 : i32
    return %c0_i32, %c0_i32_0, %c0_i32_1 : i32, i32, i32
  }
  func.func @transform_1(%arg0: i32) -> (i32, i32) {
    %c0_i32 = arith.constant 0 : i32
    %c0_i32_0 = arith.constant 0 : i32
    %c0_i32_1 = arith.constant 0 : i32
    return %c0_i32, %c0_i32_0 : i32, i32
  }
  func.func @transform_2(%arg0: i32) -> (i32, i32, i32) {
    %c0_i32 = arith.constant 0 : i32
    %c0_i32_0 = arith.constant 0 : i32
    %c0_i32_1 = arith.constant 0 : i32
    %c0_i32_2 = arith.constant 0 : i32
    return %c0_i32, %c0_i32_0, %c0_i32_1 : i32, i32, i32
  }
  func.func @transform_3(%arg0: i32) -> (i32, i32) {
    %c0_i32 = arith.constant 0 : i32
    %c0_i32_0 = arith.constant 0 : i32
    %c0_i32_1 = arith.constant 0 : i32
    return %c0_i32, %c0_i32_0 : i32, i32
  }
  func.func @transform_4(%arg0: i32) -> (i32, i32, i32) {
    %c0_i32 = arith.constant 0 : i32
    %c0_i32_0 = arith.constant 0 : i32
    %c0_i32_1 = arith.constant 0 : i32
    %c0_i32_2 = arith.constant 0 : i32
    return %c0_i32, %c0_i32_0, %c0_i32_1 : i32, i32, i32
  }
  func.func @transform_5(%arg0: i32) -> (i32, i32, i32) {
    %c0_i32 = arith.constant 0 : i32
    %c0_i32_0 = arith.constant 0 : i32
    %c0_i32_1 = arith.constant 0 : i32
    %c0_i32_2 = arith.constant 0 : i32
    return %c0_i32, %c0_i32_0, %c0_i32_1 : i32, i32, i32
  }
}

</mosaic_0001>

<bundles_post_ra>
// kernel: rnn_forward.3
= control target key start
LH: loop header
LB: loop body
LE: loop exit
PB: predicated region body
PF: predicated region fallthrough
CT: control target
= control target key end

     0   :  { %11 = vsyncpa [#allocation4], 0  ;;  %s2134_s0 = inlined_call_operand.vmem [shape: bf16[8,2,64], index: 0, kind: input, shape index: {}]   ;;  %s2135_s1 = inlined_call_operand.hbm [shape: bf16[64,256], index: 1, kind: input, shape index: {}]   ;;  %s2136_s2 = inlined_call_operand.vmem [shape: bf16[2,32,128], index: 2, kind: input, shape index: {}]   ;;  %s2137_s3 = inlined_call_operand.vmem [shape: f32[1,256], index: 3, kind: input, shape index: {}]   ;;  %s2138_s4 = inlined_call_operand.hbm [shape: bf16[8,2,64], index: 4, kind: output, shape index: {0}]   ;;  %s2139_s5 = inlined_call_operand.vmem [shape: f32[2,2,32], index: 5, kind: output, shape index: {1}]  }
   0x1   :  { %12 = vsyncpa [#allocation5], 0  ;;  %s19_s20 = sshll.u32 %s2135_s1, 4  ;;  %s1696_s21 = smov [#allocation3]   ;;  %s20_s20 = int_to_ptr.hbm [resolvable:$true] %s19_s20 }
   0x2   :  { %s21_s22 = sshll.u32 %s1696_s21, 4  ;;  %s1697_s23 = smov 128   ;;  %s22_s22 = int_to_ptr.vmem [resolvable:$true] %s21_s22 }
   0x3   :  { %s1698_s24 = smov 8  }
   0x4   :  { %27 = dma.hbm_to_vmem [thread:$0]  %s20_s20, 1024, %s22_s22, [#allocation4], %s1697_s23, %s1697_s23, %s1698_s24  }
   0x5   :  { %1692 = dma.done.wait [#allocation4], 1024  }
   0x6   :  { %1693 = vsyncadd [#allocation4], 4294966272  ;;  %v1452_v0 = vld [vmem:[#allocation3 + $0x30] sm:$0xf]  ;;  %v1534_v1 = vld [vmem:[#allocation3 + $0x34] sm:$0xf0] }
   0x7   :  { %v1533_v2 = vld [vmem:[#allocation3 + $0x34] sm:$0xf]  ;;  %v1453_v3 = vor.u32 %v1534_v1, %v1452_v0  ;;  %v1454_v4 = vld [vmem:[#allocation3 + $0x38] sm:$0xf0]  ;;  %v1444_v5 = vld [vmem:[#allocation3 + $0x20] sm:$0xf] }
   0x8   :  { %v1532_v6 = vld [vmem:[#allocation3 + $0x24] sm:$0xf0]  ;;  %v1457_v7 = vor.u32 %v1533_v2, %v1454_v4  ;;  %v1531_v8 = vld [vmem:[#allocation3 + $0x24] sm:$0xf]  ;;  %v1446_v9 = vld [vmem:[#allocation3 + $0x28] sm:$0xf0] }
   0x9   :  { %v1741_v10 = vld [vmem:[%s2136_s2 + $0x8] sm:$0xff]  ;;  %130 = vmatpush.bf16.msra.mxu0 %v1453_v3  ;;  %v1445_v11 = vor.u32 %v1532_v6, %v1444_v5  ;;  %v1449_v12 = vor.u32 %v1531_v8, %v1446_v9  ;;  %v1436_v13 = vld [vmem:[#allocation3 + $0x10] sm:$0xf]  ;;  %v1530_v14 = vld [vmem:[#allocation3 + $0x14] sm:$0xf0]  ;;  %v1699_v32 = vmov 0  }
   0xa   :  { %144 = vmatpush.bf16.msra.mxu1 %v1457_v7  ;;  %231 = vmatpush.bf16.msra.mxu2 %v1741_v10  ;;  %v1747_v15 = vld [vmem:[%s2136_s2] sm:$0xff]  ;;  %v1529_v16 = vld [vmem:[#allocation3 + $0x14] sm:$0xf]  ;;  %v1428_v18 = vld [vmem:[#allocation3] sm:$0xf]  ;;  %v1437_v21 = vor.u32 %v1530_v14, %v1436_v13  ;;  %vm123_vm0 = vcmask 523264  }
   0xb   :  { %v1438_v17 = vld [vmem:[#allocation3 + $0x18] sm:$0xf0]  ;;  %v37_v19 = vld [vmem:[%s2134_s0] sm:$0x1]  ;;  %v38_v20 = vld [vmem:[%s2134_s0 + $0x1] sm:$0x1] }
   0xc   :  { %v1528_v22 = vld [vmem:[#allocation3 + $0x4] sm:$0xf0]  ;;  %v1527_v23 = vld [vmem:[#allocation3 + $0x4] sm:$0xf]  ;;  %v39_v24 = vld [vmem:[%s2134_s0 + $0x2] sm:$0x1]  ;;  %v1441_v25 = vor.u32 %v1529_v16, %v1438_v17  ;;  %v203_v17 = vlaneseq }
   0xd   :  { %131 = vmatpush.bf16.msra.mxu0 %v1445_v11  ;;  %v1430_v26 = vld [vmem:[#allocation3 + $0x8] sm:$0xf0]  ;;  %v40_v27 = vld [vmem:[%s2134_s0 + $0x3] sm:$0x1]  ;;  %60 = vst [vmem:[#allocation1] ss:$9 sm:$0xff] %v37_v19  ;;  %v1429_v31 = vor.u32 %v1528_v22, %v1428_v18 }
   0xe   :  { %145 = vmatpush.bf16.msra.mxu1 %v1449_v12  ;;  %232 = vmatpush.bf16.msra.mxu2 %v1747_v15  ;;  %v41_v28 = vld [vmem:[%s2134_s0 + $0x4] sm:$0x1]  ;;  %63 = vst [vmem:[#allocation1 + $0x1] ss:$9 sm:$0xff] %v38_v20  ;;  %v1768_v29 = vld [vmem:[%s2136_s2 + $0x18] sm:$0xff]  ;;  %v1433_v34 = vor.u32 %v1527_v23, %v1430_v26  ;;  %v1784_v36 = vld [vmem:[%s2136_s2 + $0x10] sm:$0xff] }
   0xf   :  { %v42_v30 = vld [vmem:[%s2134_s0 + $0x5] sm:$0x1]  ;;  %66 = vst [vmem:[#allocation1 + $0x2] ss:$9 sm:$0xff] %v39_v24  ;;  %v43_v33 = vld [vmem:[%s2134_s0 + $0x6] sm:$0x1]  ;;  %311 = vmatpush.bf16.msra.mxu3 %v1768_v29 }
  0x10   :  { %69 = vst [vmem:[#allocation1 + $0x3] ss:$9 sm:$0xff] %v40_v27  ;;  %v44_v35 = vld [vmem:[%s2134_s0 + $0x7] sm:$0x1]  ;;  %v53_v38 = vld [vmem:[%s2137_s3] sm:$0x3] }
  0x11   :  { %132 = vmatpush.bf16.msra.mxu0 %v1437_v21  ;;  %233 = vmatmul.bf16.vlgmr.msra.gmra.mxu2 %v1699_v32  ;;  %72 = vst [vmem:[#allocation1 + $0x4] ss:$9 sm:$0xff] %v41_v28  ;;  %v55_v40 = vperm.slane %v53_v38, 0  ;;  %v56_v41 = vperm.slane %v53_v38, 1  ;;  %vm160_vm1 = vcmask 1041408   ;;  %vm162_vm2 = vcmask 1043458  }
  0x12   :  { %386 = vmatpush.bf16.msrb.mxu2 %v1741_v10  ;;  %146 = vmatpush.bf16.msra.mxu1 %v1441_v25  ;;  %75 = vst [vmem:[#allocation1 + $0x5] ss:$9 sm:$0xff] %v42_v30  ;;  %vm165_vm3 = vcmask 1045508   ;;  %vm168_vm4 = vcmask 1045504   ;;  %v204_v22 = vand.u32 127, %v203_v17  ;;  %s1700_s3 = smov 64  }
  0x13   :  { %78 = vst [vmem:[#allocation1 + $0x6] ss:$9 sm:$0xff] %v43_v33  ;;  %312 = vmatpush.bf16.msra.mxu3 %v1784_v36  ;;  %s1701_s23 = smov 32   ;;  %s1702_s24 = smov [#allocation6]  }
  0x14   :  { %81 = vst [vmem:[#allocation1 + $0x7] ss:$9 sm:$0xff] %v44_v35  ;;  %vm205_vm8 = vcmp.ge.s32.totalorder %v204_v22, 64  ;;  %vm206_vm9 = vcmp.lt.s32.totalorder %v204_v22, 96  ;;  %s1407_s1 = sshll.u32 %s1702_s24, 4  ;;  %s1409_s27 = sshll.u32 %s2138_s4, 4  ;;  %s1408_s1 = int_to_ptr.vmem [resolvable:$true] %s1407_s1  ;;  %s1410_s27 = int_to_ptr.hbm [resolvable:$true] %s1409_s27 }
  0x15   :  { %133 = vmatpush.bf16.msra.mxu0 %v1429_v31  ;;  %vm1813_vm11 = vmand %vm205_vm8, %vm206_vm9  ;;  %s1703_s30 = smov 16   ;;  %s1704_s6 = smov 1  }
  0x16   :  { %387 = vmatpush.bf16.msrb.mxu2 %v1747_v15  ;;  %147 = vmatpush.bf16.msra.mxu1 %v1433_v34 }
  0x17   :  { %460 = vmatpush.bf16.msrb.mxu3 %v1768_v29 }
  0x18   :  { %313 = vmatmul.bf16.vlgmr.msra.gmra.mxu3 %v1699_v32 }
  0x19   :  { %534 = vmatpush.bf16.msrb.mxu0 %v1741_v10 }
  0x1a   :  { %682 = vmatpush.bf16.msra.mxu2 %v1741_v10  ;;  %608 = vmatpush.bf16.msrb.mxu1 %v1768_v29 }
  0x1b   :  { %461 = vmatpush.bf16.msrb.mxu3 %v1784_v36  ;;  %v82_v37 = vld [vmem:[#allocation1] sm:$0xff] }
  0x1c   :  { %1458 = vmatmul.msk.bf16.vlgmr.msra.gmra.mxu0 %vm123_vm0, %v82_v37  ;;  %1459 = vmatmul.msk.bf16.vlgmr.msra.gmra.mxu1 %vm123_vm0, %v82_v37  ;;  %vm221_vm0 = vcmask 261120  }
  0x1d   :  { %535 = vmatpush.bf16.msrb.mxu0 %v1747_v15 }
  0x1e   :  { %683 = vmatpush.bf16.msra.mxu2 %v1747_v15  ;;  %609 = vmatpush.bf16.msrb.mxu1 %v1784_v36 }
  0x1f   :  { %756 = vmatpush.bf16.msra.mxu3 %v1768_v29 }
  0x21   :  { %829 = vmatpush.bf16.msra.mxu0 %v1741_v10 }
  0x22   :  { %901 = vmatpush.bf16.msra.mxu1 %v1768_v29 }
  0x23   :  { %757 = vmatpush.bf16.msra.mxu3 %v1784_v36 }
  0x25   :  { %830 = vmatpush.bf16.msra.mxu0 %v1747_v15 }
  0x26   :  { %902 = vmatpush.bf16.msra.mxu1 %v1784_v36 }
  0x94   :  { %v234_v39 = vpop.f32.mrf.mxu2 }
  0x99   :  { %v135_v42 = vpop.f32.mrf.mxu0  ;;  %v149_v43 = vpop.f32.mrf.mxu1 }
  0x9a   :  { %v136_v44 = vadd.f32 %v135_v42, %v55_v40  ;;  %v150_v45 = vadd.f32 %v149_v43, %v56_v41 }
  0x9b   :  { %v314_v47 = vpop.f32.mrf.mxu3 }
  0x9c   :  { %v236_v46 = vpop.f32.mrf.mxu2  ;;  %v158_v48 = vrot.slane %v150_v45, 6 }
  0x9e   :  { %v161_v49 = vsel %vm160_vm1, %v136_v44, %v158_v48  ;;  %v163_v50 = vsel %vm162_vm2, %v136_v44, %v158_v48  ;;  %v166_v51 = vsel %vm165_vm3, %v136_v44, %v158_v48  ;;  %v169_v52 = vsel %vm168_vm4, %v158_v48, %v136_v44 }
  0x9f   :  { %v164_v53 = vrot.slane %v163_v50, 2  ;;  %v167_v54 = vrot.slane %v166_v51, 4  ;;  %v170_v55 = vrot.slane %v169_v52, 6  ;;  %186 = vst [vmem:[#allocation2] sm:$0xf] %v161_v49 }
  0xa1   :  { %187 = vst [vmem:[#allocation2 + $0x4] sm:$0xf] %v164_v53  ;;  %v137_v56 = vpop.f32.mrf.mxu0  ;;  %v151_v57 = vpop.f32.mrf.mxu1 }
  0xa2   :  { %188 = vst [vmem:[#allocation2 + $0x8] sm:$0xf] %v167_v54  ;;  %v152_v58 = vadd.f32 %v151_v57, %v56_v41  ;;  %v138_v60 = vadd.f32 %v137_v56, %v55_v40 }
  0xa3   :  { %189 = vst [vmem:[#allocation2 + $0xc] sm:$0xf] %v170_v55  ;;  %v316_v59 = vpop.f32.mrf.mxu3 }
  0xa4   :  { %v159_v61 = vrot.slane %v152_v58, 6 }
  0xa6   :  { %v208_v62 = vld [vmem:[#allocation2] sm:$0x3]  ;;  %v171_v63 = vsel %vm160_vm1, %v138_v60, %v159_v61  ;;  %v172_v0 = vsel %vm162_vm2, %v138_v60, %v159_v61  ;;  %v174_v1 = vsel %vm165_vm3, %v138_v60, %v159_v61  ;;  %v176_v2 = vsel %vm168_vm4, %v159_v61, %v138_v60 }
  0xa7   :  { %v238_v3 = vadd.f32 %v234_v39, %v208_v62  ;;  %v173_v4 = vrot.slane %v172_v0, 2  ;;  %v175_v5 = vrot.slane %v174_v1, 4  ;;  %v177_v6 = vrot.slane %v176_v2, 6  ;;  %190 = vst [vmem:[#allocation2 + $0x10] sm:$0xf] %v171_v63 }
  0xa9   :  { %v1472_v7 = vmul.f32 -1.442695, %v238_v3  ;;  %191 = vst [vmem:[#allocation2 + $0x14] sm:$0xf] %v173_v4 }
  0xaa   :  { %192 = vst [vmem:[#allocation2 + $0x18] sm:$0xf] %v175_v5 }
  0xab   :  { %1548 = vpow2.f32 %v1472_v7  ;;  %193 = vst [vmem:[#allocation2 + $0x1c] sm:$0xf] %v177_v6 }
  0xb1   :  { %v1549_v8 = vpop.eup %1548  ;;  %v446_v17 = vld [vmem:[#allocation2 + $0x1a] sm:$0x3] }
  0xb2   :  { %v242_v9 = vadd.f32 1.0, %v1549_v8  ;;  %v292_v11 = vld [vmem:[#allocation2 + $0x1e] sm:$0x3]  ;;  %v372_v8 = vld [vmem:[#allocation2 + $0x4] sm:$0x3] }
  0xb3   :  { %v318_v12 = vadd.f32 %v314_v47, %v292_v11 }
  0xb4   :  { %1550 = vrcp.f32 %v242_v9  ;;  %v254_v21 = vand.u32 2147483648, %v242_v9  ;;  %v252_v24 = vand.u32 2147483647, %v242_v9  ;;  %vm248_vm6 = vweird.f32 %v242_v9 }
  0xb5   :  { %v1482_v13 = vmul.f32 -1.442695, %v318_v12 }
  0xb6   :  { %v255_v26 = vor.u32 1.1754944e-38, %v254_v21  ;;  %vm253_vm10 = vcmp.eq.f32.partialorder %v252_v24, 8.507059e+37 }
  0xb7   :  { %1552 = vpow2.f32 %v1482_v13 }
  0xba   :  { %v1551_v14 = vpop.eup %1550 }
  0xbb   :  { %v244_v16 = vmul.f32 %v1551_v14, %v242_v9  ;;  %vm249_vm5 = vweird.f32 %v1551_v14 }
  0xbc   :  { %vm250_vm7 = vmor %vm248_vm6, %vm249_vm5 }
  0xbd   :  { %v1553_v18 = vpop.eup %1552  ;;  %v245_v19 = vsub.f32 1.0, %v244_v16 }
  0xbe   :  { %v322_v20 = vadd.f32 1.0, %v1553_v18 }
  0xbf   :  { %v246_v23 = vmul.f32 %v1551_v14, %v245_v19 }
  0xc0   :  { %1554 = vrcp.f32 %v322_v20  ;;  %v334_v38 = vand.u32 2147483648, %v322_v20  ;;  %v332_v40 = vand.u32 2147483647, %v322_v20  ;;  %vm328_vm13 = vweird.f32 %v322_v20 }
  0xc1   :  { %v247_v25 = vadd.f32 %v1551_v14, %v246_v23 }
  0xc2   :  { %v335_v42 = vor.u32 1.1754944e-38, %v334_v38  ;;  %vm333_vm15 = vcmp.eq.f32.partialorder %v332_v40, 8.507059e+37 }
  0xc3   :  { %v251_v27 = vsel %vm250_vm7, %v1551_v14, %v247_v25 }
  0xc4   :  { %v256_v28 = vsel %vm253_vm10, %v255_v26, %v251_v27 }
  0xc5   :  { %v258_v30 = vmul.f32 2.0, %v256_v28 }
  0xc6   :  { %v1555_v31 = vpop.eup %1554 }
  0xc7   :  { %v324_v33 = vmul.f32 %v1555_v31, %v322_v20  ;;  %v1473_v34 = vadd.f32 -1.0, %v258_v30  ;;  %vm329_vm12 = vweird.f32 %v1555_v31 }
  0xc8   :  { %vm330_vm14 = vmor %vm328_vm13, %vm329_vm12 }
  0xc9   :  { %v325_v35 = vsub.f32 1.0, %v324_v33  ;;  %v260_v37 = vsel %vm1813_vm11, %v1473_v34, %v256_v28 }
  0xca   :  { %263 = vrot.lane.b32.xlu0 %v260_v37, %s1700_s3  ;;  %v261_v52 = vmul.f32 0.0, %v260_v37 }
  0xcb   :  { %v326_v39 = vmul.f32 %v1555_v31, %v325_v35 }
  0xcd   :  { %v327_v41 = vadd.f32 %v1555_v31, %v326_v39 }
  0xcf   :  { %v331_v43 = vsel %vm330_vm14, %v1555_v31, %v327_v41 }
  0xd0   :  { %v336_v44 = vsel %vm333_vm15, %v335_v42, %v331_v43 }
  0xd1   :  { %v338_v45 = vmul.f32 2.0, %v336_v44 }
  0xd3   :  { %v1483_v46 = vadd.f32 -1.0, %v338_v45 }
  0xd5   :  { %v340_v47 = vsel %vm1813_vm11, %v1483_v46, %v336_v44 }
  0xd6   :  { %343 = vrot.lane.b32.xlu0 %v340_v47, %s1700_s3  ;;  %v341_v56 = vmul.f32 0.0, %v340_v47 }
 0x13c   :  { %v264_v48 = vpop.permute.xlu0 %263 }
 0x13d   :  { %v266_v49 = vmul.f32 %v264_v48, %v260_v37 }
 0x13f   :  { %268 = vrot.lane.b32.xlu1 %v266_v49, %s1701_s23 }
 0x148   :  { %v344_v50 = vpop.permute.xlu0 %343 }
 0x149   :  { %v346_v51 = vmul.f32 %v344_v50, %v340_v47 }
 0x14b   :  { %348 = vrot.lane.b32.xlu1 %v346_v51, %s1701_s23 }
 0x1b1   :  { %v269_v53 = vpop.permute.xlu1 %268 }
 0x1b2   :  { %v1825_v54 = vadd.f32 %v269_v53, %v261_v52 }
 0x1b4   :  { %1556 = vtanh.f32 %v1825_v54 }
 0x1ba   :  { %v1557_v55 = vpop.eup %1556 }
 0x1bb   :  { %274 = vrot.lane.b32.xlu2 %v1557_v55, %s1700_s3 }
 0x1bd   :  { %v349_v57 = vpop.permute.xlu1 %348 }
 0x1be   :  { %v1829_v58 = vadd.f32 %v349_v57, %v341_v56 }
 0x1c0   :  { %1558 = vtanh.f32 %v1829_v58 }
 0x1c6   :  { %v1559_v59 = vpop.eup %1558 }
 0x1c7   :  { %354 = vrot.lane.b32.xlu2 %v1559_v59, %s1700_s3 }
 0x215   :  { %v275_v60 = vpop.permute.xlu2 %274 }
 0x216   :  { %v277_v61 = vmul.f32 %v275_v60, %v260_v37 }
 0x218   :  { %v1833_v62 = vpack.c.bf16 %v277_v61, %v277_v61 }
 0x21a   :  { %v373_v63 = vunpack.c.l.b16 %v1833_v62 }
 0x21c   :  { %v374_v0 = vpack.c.b16 %v373_v63, %v373_v63 }
 0x21e   :  { %375 = vrot.lane.b32.xlu0 %v374_v0, %s1701_s23 }
 0x221   :  { %v355_v1 = vpop.permute.xlu2 %354 }
 0x222   :  { %v357_v2 = vmul.f32 %v355_v1, %v340_v47 }
 0x224   :  { %v1837_v3 = vpack.c.bf16 %v357_v2, %v357_v2 }
 0x226   :  { %v447_v4 = vunpack.c.l.b16 %v1837_v3 }
 0x228   :  { %v448_v5 = vpack.c.b16 %v447_v4, %v447_v4 }
 0x22a   :  { %449 = vrot.lane.b32.xlu1 %v448_v5, %s1701_s23 }
 0x290   :  { %v376_v6 = vpop.permute.xlu0 %375 }
 0x291   :  { %1484 = vmatmul.msk.bf16.vlgmr.msrb.gmra.mxu2 %vm221_vm0, %v376_v6 }
 0x292   :  { %973 = vmatpush.bf16.msrb.mxu2 %v1741_v10 }
 0x296   :  { %974 = vmatpush.bf16.msrb.mxu2 %v1747_v15 }
 0x29c   :  { %v450_v7 = vpop.permute.xlu1 %449 }
 0x29d   :  { %1487 = vmatmul.msk.bf16.vlgmr.msrb.gmra.mxu3 %vm221_vm0, %v450_v7 }
 0x29e   :  { %1045 = vmatpush.bf16.msrb.mxu3 %v1768_v29 }
 0x2a2   :  { %1046 = vmatpush.bf16.msrb.mxu3 %v1784_v36 }
 0x314   :  { %v389_v9 = vpop.f32.mrf.mxu2 }
 0x315   :  { %v393_v11 = vadd.f32 %v389_v9, %v372_v8 }
 0x317   :  { %v1485_v12 = vmul.f32 -1.442695, %v393_v11 }
 0x319   :  { %1560 = vpow2.f32 %v1485_v12 }
 0x31c   :  { %v391_v13 = vpop.f32.mrf.mxu2 }
 0x31f   :  { %v1561_v14 = vpop.eup %1560 }
 0x320   :  { %v397_v16 = vadd.f32 1.0, %v1561_v14  ;;  %v463_v18 = vpop.f32.mrf.mxu3 }
 0x321   :  { %v467_v19 = vadd.f32 %v463_v18, %v446_v17  ;;  %v520_v17 = vld [vmem:[#allocation2 + $0x8] sm:$0x3] }
 0x322   :  { %1562 = vrcp.f32 %v397_v16  ;;  %v409_v27 = vand.u32 2147483648, %v397_v16  ;;  %v407_v30 = vand.u32 2147483647, %v397_v16  ;;  %vm403_vm2 = vweird.f32 %v397_v16 }
 0x323   :  { %v1488_v20 = vmul.f32 -1.442695, %v467_v19 }
 0x324   :  { %v410_v33 = vor.u32 1.1754944e-38, %v409_v27  ;;  %vm408_vm4 = vcmp.eq.f32.partialorder %v407_v30, 8.507059e+37 }
 0x325   :  { %1564 = vpow2.f32 %v1488_v20 }
 0x328   :  { %v1563_v21 = vpop.eup %1562  ;;  %v465_v22 = vpop.f32.mrf.mxu3 }
 0x329   :  { %v399_v23 = vmul.f32 %v1563_v21, %v397_v16  ;;  %vm404_vm1 = vweird.f32 %v1563_v21 }
 0x32a   :  { %vm405_vm3 = vmor %vm403_vm2, %vm404_vm1 }
 0x32b   :  { %v1565_v24 = vpop.eup %1564  ;;  %v400_v25 = vsub.f32 1.0, %v399_v23 }
 0x32c   :  { %v471_v26 = vadd.f32 1.0, %v1565_v24 }
 0x32d   :  { %v401_v28 = vmul.f32 %v1563_v21, %v400_v25 }
 0x32e   :  { %1566 = vrcp.f32 %v471_v26  ;;  %v483_v43 = vand.u32 2147483648, %v471_v26  ;;  %v481_v45 = vand.u32 2147483647, %v471_v26  ;;  %vm477_vm6 = vweird.f32 %v471_v26 }
 0x32f   :  { %v402_v31 = vadd.f32 %v1563_v21, %v401_v28 }
 0x330   :  { %v484_v47 = vor.u32 1.1754944e-38, %v483_v43  ;;  %vm482_vm8 = vcmp.eq.f32.partialorder %v481_v45, 8.507059e+37 }
 0x331   :  { %v406_v34 = vsel %vm405_vm3, %v1563_v21, %v402_v31 }
 0x332   :  { %v411_v35 = vsel %vm408_vm4, %v410_v33, %v406_v34 }
 0x333   :  { %v413_v37 = vmul.f32 2.0, %v411_v35 }
 0x334   :  { %v1567_v38 = vpop.eup %1566 }
 0x335   :  { %v473_v39 = vmul.f32 %v1567_v38, %v471_v26  ;;  %v1486_v40 = vadd.f32 -1.0, %v413_v37  ;;  %vm478_vm5 = vweird.f32 %v1567_v38 }
 0x336   :  { %vm479_vm7 = vmor %vm477_vm6, %vm478_vm5 }
 0x337   :  { %v474_v41 = vsub.f32 1.0, %v473_v39  ;;  %v415_v42 = vsel %vm1813_vm11, %v1486_v40, %v411_v35  ;;  %v594_v40 = vld [vmem:[#allocation2 + $0x16] sm:$0x3] }
 0x338   :  { %418 = vrot.lane.b32.xlu2 %v415_v42, %s1700_s3  ;;  %v416_v59 = vmul.f32 %v415_v42, %v1825_v54 }
 0x339   :  { %v475_v44 = vmul.f32 %v1567_v38, %v474_v41 }
 0x33b   :  { %v476_v46 = vadd.f32 %v1567_v38, %v475_v44 }
 0x33d   :  { %v480_v48 = vsel %vm479_vm7, %v1567_v38, %v476_v46 }
 0x33e   :  { %v485_v49 = vsel %vm482_vm8, %v484_v47, %v480_v48 }
 0x33f   :  { %v487_v50 = vmul.f32 2.0, %v485_v49 }
 0x341   :  { %v1489_v51 = vadd.f32 -1.0, %v487_v50 }
 0x343   :  { %v489_v52 = vsel %vm1813_vm11, %v1489_v51, %v485_v49 }
 0x344   :  { %492 = vrot.lane.b32.xlu0 %v489_v52, %s1700_s3  ;;  %v490_v0 = vmul.f32 %v489_v52, %v1829_v58 }
 0x392   :  { %v419_v53 = vpop.permute.xlu2 %418 }
 0x393   :  { %v421_v55 = vmul.f32 %v419_v53, %v415_v42 }
 0x395   :  { %423 = vrot.lane.b32.xlu1 %v421_v55, %s1701_s23 }
 0x3b6   :  { %v493_v56 = vpop.permute.xlu0 %492 }
 0x3b7   :  { %v495_v57 = vmul.f32 %v493_v56, %v489_v52 }
 0x3b9   :  { %497 = vrot.lane.b32.xlu2 %v495_v57, %s1701_s23 }
 0x407   :  { %v424_v60 = vpop.permute.xlu1 %423 }
 0x408   :  { %v1856_v61 = vadd.f32 %v424_v60, %v416_v59 }
 0x40a   :  { %1568 = vtanh.f32 %v1856_v61 }
 0x410   :  { %v1569_v63 = vpop.eup %1568 }
 0x411   :  { %429 = vrot.lane.b32.xlu0 %v1569_v63, %s1700_s3 }
 0x413   :  { %v498_v1 = vpop.permute.xlu2 %497 }
 0x414   :  { %v1861_v2 = vadd.f32 %v498_v1, %v490_v0 }
 0x416   :  { %1570 = vtanh.f32 %v1861_v2 }
 0x41c   :  { %v1571_v4 = vpop.eup %1570 }
 0x41d   :  { %503 = vrot.lane.b32.xlu1 %v1571_v4, %s1700_s3 }
 0x483   :  { %v430_v5 = vpop.permute.xlu0 %429 }
 0x484   :  { %v432_v54 = vmul.f32 %v430_v5, %v415_v42 }
 0x486   :  { %v1865_v6 = vpack.c.bf16 %v432_v54, %v432_v54 }
 0x488   :  { %v521_v7 = vunpack.c.l.b16 %v1865_v6 }
 0x48a   :  { %v522_v8 = vpack.c.b16 %v521_v7, %v521_v7 }
 0x48c   :  { %523 = vrot.lane.b32.xlu2 %v522_v8, %s1701_s23 }
 0x48f   :  { %v504_v9 = vpop.permute.xlu1 %503 }
 0x490   :  { %v506_v11 = vmul.f32 %v504_v9, %v489_v52 }
 0x492   :  { %v1869_v58 = vpack.c.bf16 %v506_v11, %v506_v11 }
 0x494   :  { %v595_v12 = vunpack.c.l.b16 %v1869_v58 }
 0x496   :  { %v596_v13 = vpack.c.b16 %v595_v12, %v595_v12 }
 0x498   :  { %597 = vrot.lane.b32.xlu0 %v596_v13, %s1701_s23 }
 0x4e6   :  { %v524_v14 = vpop.permute.xlu2 %523 }
 0x4e7   :  { %1490 = vmatmul.msk.bf16.vlgmr.msrb.gmra.mxu0 %vm221_vm0, %v524_v14 }
 0x4e8   :  { %1117 = vmatpush.bf16.msrb.mxu0 %v1741_v10 }
 0x4ec   :  { %1118 = vmatpush.bf16.msrb.mxu0 %v1747_v15 }
 0x50a   :  { %v598_v16 = vpop.permute.xlu0 %597 }
 0x50b   :  { %1493 = vmatmul.msk.bf16.vlgmr.msrb.gmra.mxu1 %vm221_vm0, %v598_v16 }
 0x50c   :  { %1189 = vmatpush.bf16.msrb.mxu1 %v1768_v29 }
 0x510   :  { %1190 = vmatpush.bf16.msrb.mxu1 %v1784_v36 }
 0x564   :  { %v537_v18 = vpop.f32.mrf.mxu0 }
 0x565   :  { %v541_v19 = vadd.f32 %v537_v18, %v520_v17 }
 0x567   :  { %v1491_v20 = vmul.f32 -1.442695, %v541_v19 }
 0x569   :  { %1572 = vpow2.f32 %v1491_v20 }
 0x56c   :  { %v539_v21 = vpop.f32.mrf.mxu0 }
 0x56f   :  { %v1573_v22 = vpop.eup %1572 }
 0x570   :  { %v545_v23 = vadd.f32 1.0, %v1573_v22 }
 0x572   :  { %1574 = vrcp.f32 %v545_v23  ;;  %v557_v27 = vand.u32 2147483648, %v545_v23  ;;  %v555_v30 = vand.u32 2147483647, %v545_v23  ;;  %vm551_vm10 = vweird.f32 %v545_v23 }
 0x574   :  { %v558_v33 = vor.u32 1.1754944e-38, %v557_v27  ;;  %vm556_vm13 = vcmp.eq.f32.partialorder %v555_v30, 8.507059e+37 }
 0x578   :  { %v1575_v24 = vpop.eup %1574 }
 0x579   :  { %v547_v25 = vmul.f32 %v1575_v24, %v545_v23  ;;  %vm552_vm9 = vweird.f32 %v1575_v24 }
 0x57a   :  { %vm553_vm12 = vmor %vm551_vm10, %vm552_vm9 }
 0x57b   :  { %v548_v26 = vsub.f32 1.0, %v547_v25 }
 0x57d   :  { %v549_v28 = vmul.f32 %v1575_v24, %v548_v26  ;;  %v668_v26 = vld [vmem:[#allocation2 + $0xc] sm:$0x3] }
 0x57f   :  { %v550_v31 = vadd.f32 %v1575_v24, %v549_v28 }
 0x581   :  { %v554_v34 = vsel %vm553_vm12, %v1575_v24, %v550_v31 }
 0x582   :  { %v559_v35 = vsel %vm556_vm13, %v558_v33, %v554_v34 }
 0x583   :  { %v561_v37 = vmul.f32 2.0, %v559_v35 }
 0x585   :  { %v1492_v38 = vadd.f32 -1.0, %v561_v37 }
 0x587   :  { %v563_v39 = vsel %vm1813_vm11, %v1492_v38, %v559_v35  ;;  %v742_v35 = vld [vmem:[#allocation2 + $0x12] sm:$0x3] }
 0x588   :  { %v611_v41 = vpop.f32.mrf.mxu1  ;;  %566 = vrot.lane.b32.xlu1 %v563_v39, %s1700_s3  ;;  %v564_v54 = vmul.f32 %v563_v39, %v1856_v61 }
 0x589   :  { %v615_v42 = vadd.f32 %v611_v41, %v594_v40 }
 0x58b   :  { %v1494_v43 = vmul.f32 -1.442695, %v615_v42 }
 0x58d   :  { %1576 = vpow2.f32 %v1494_v43 }
 0x590   :  { %v613_v44 = vpop.f32.mrf.mxu1 }
 0x593   :  { %v1577_v45 = vpop.eup %1576 }
 0x594   :  { %v619_v46 = vadd.f32 1.0, %v1577_v45 }
 0x596   :  { %1578 = vrcp.f32 %v619_v46  ;;  %v631_v50 = vand.u32 2147483648, %v619_v46  ;;  %v629_v52 = vand.u32 2147483647, %v619_v46  ;;  %vm625_vm15 = vweird.f32 %v619_v46 }
 0x598   :  { %v632_v55 = vor.u32 1.1754944e-38, %v631_v50  ;;  %vm630_vm2 = vcmp.eq.f32.partialorder %v629_v52, 8.507059e+37 }
 0x59c   :  { %v1579_v47 = vpop.eup %1578 }
 0x59d   :  { %v621_v48 = vmul.f32 %v1579_v47, %v619_v46  ;;  %vm626_vm14 = vweird.f32 %v1579_v47 }
 0x59e   :  { %vm627_vm1 = vmor %vm625_vm15, %vm626_vm14 }
 0x59f   :  { %v622_v49 = vsub.f32 1.0, %v621_v48 }
 0x5a1   :  { %v623_v51 = vmul.f32 %v1579_v47, %v622_v49 }
 0x5a3   :  { %v624_v53 = vadd.f32 %v1579_v47, %v623_v51 }
 0x5a5   :  { %v628_v56 = vsel %vm627_vm1, %v1579_v47, %v624_v53 }
 0x5a6   :  { %v633_v57 = vsel %vm630_vm2, %v632_v55, %v628_v56 }
 0x5a7   :  { %v635_v59 = vmul.f32 2.0, %v633_v57 }
 0x5a9   :  { %v1495_v60 = vadd.f32 -1.0, %v635_v59 }
 0x5ab   :  { %v637_v63 = vsel %vm1813_vm11, %v1495_v60, %v633_v57 }
 0x5ac   :  { %640 = vrot.lane.b32.xlu2 %v637_v63, %s1700_s3  ;;  %v638_v11 = vmul.f32 %v637_v63, %v1861_v2 }
 0x5fa   :  { %v567_v0 = vpop.permute.xlu1 %566 }
 0x5fb   :  { %v569_v1 = vmul.f32 %v567_v0, %v563_v39 }
 0x5fd   :  { %571 = vrot.lane.b32.xlu0 %v569_v1, %s1701_s23 }
 0x606   :  { %v641_v4 = vpop.permute.xlu2 %640 }
 0x607   :  { %v643_v5 = vmul.f32 %v641_v4, %v637_v63 }
 0x609   :  { %645 = vrot.lane.b32.xlu1 %v643_v5, %s1701_s23 }
 0x66f   :  { %v572_v7 = vpop.permute.xlu0 %571 }
 0x670   :  { %v1888_v8 = vadd.f32 %v572_v7, %v564_v54 }
 0x672   :  { %1580 = vtanh.f32 %v1888_v8 }
 0x678   :  { %v1581_v9 = vpop.eup %1580 }
 0x679   :  { %577 = vrot.lane.b32.xlu2 %v1581_v9, %s1700_s3 }
 0x67b   :  { %v646_v12 = vpop.permute.xlu1 %645 }
 0x67c   :  { %v1893_v13 = vadd.f32 %v646_v12, %v638_v11 }
 0x67e   :  { %1582 = vtanh.f32 %v1893_v13 }
 0x684   :  { %v1583_v14 = vpop.eup %1582 }
 0x685   :  { %651 = vrot.lane.b32.xlu0 %v1583_v14, %s1700_s3 }
 0x6d3   :  { %v578_v16 = vpop.permute.xlu2 %577 }
 0x6d4   :  { %v580_v61 = vmul.f32 %v578_v16, %v563_v39 }
 0x6d6   :  { %v1897_v17 = vpack.c.bf16 %v580_v61, %v580_v61 }
 0x6d8   :  { %v669_v18 = vunpack.c.l.b16 %v1897_v17 }
 0x6da   :  { %v670_v19 = vpack.c.b16 %v669_v18, %v669_v18 }
 0x6dc   :  { %671 = vrot.lane.b32.xlu1 %v670_v19, %s1701_s23 }
 0x6f7   :  { %v652_v20 = vpop.permute.xlu0 %651 }
 0x6f8   :  { %v654_v21 = vmul.f32 %v652_v20, %v637_v63 }
 0x6fa   :  { %v1901_v2 = vpack.c.bf16 %v654_v21, %v654_v21 }
 0x6fc   :  { %v743_v22 = vunpack.c.l.b16 %v1901_v2 }
 0x6fe   :  { %v744_v23 = vpack.c.b16 %v743_v22, %v743_v22 }
 0x700   :  { %745 = vrot.lane.b32.xlu2 %v744_v23, %s1701_s23 }
 0x74e   :  { %v672_v24 = vpop.permute.xlu1 %671 }
 0x74f   :  { %1496 = vmatmul.msk.bf16.vlgmr.msra.gmra.mxu2 %vm221_vm0, %v672_v24 }
 0x750   :  { %1261 = vmatpush.bf16.msra.mxu2 %v1741_v10 }
 0x754   :  { %1262 = vmatpush.bf16.msra.mxu2 %v1747_v15 }
 0x75a   :  { %v746_v25 = vpop.permute.xlu2 %745 }
 0x75b   :  { %1499 = vmatmul.msk.bf16.vlgmr.msra.gmra.mxu3 %vm221_vm0, %v746_v25 }
 0x75c   :  { %1333 = vmatpush.bf16.msra.mxu3 %v1768_v29 }
 0x760   :  { %1334 = vmatpush.bf16.msra.mxu3 %v1784_v36 }
 0x7d2   :  { %v685_v27 = vpop.f32.mrf.mxu2 }
 0x7d3   :  { %v689_v28 = vadd.f32 %v685_v27, %v668_v26 }
 0x7d5   :  { %v1497_v30 = vmul.f32 -1.442695, %v689_v28 }
 0x7d7   :  { %1584 = vpow2.f32 %v1497_v30 }
 0x7da   :  { %v687_v31 = vpop.f32.mrf.mxu2 }
 0x7dd   :  { %v1585_v33 = vpop.eup %1584 }
 0x7de   :  { %v693_v34 = vadd.f32 1.0, %v1585_v33  ;;  %v759_v37 = vpop.f32.mrf.mxu3 }
 0x7df   :  { %v763_v10 = vadd.f32 %v759_v37, %v742_v35  ;;  %v815_v35 = vld [vmem:[#allocation2 + $0x10] sm:$0x3] }
 0x7e0   :  { %1586 = vrcp.f32 %v693_v34  ;;  %v705_v42 = vand.u32 2147483648, %v693_v34  ;;  %v703_v44 = vand.u32 2147483647, %v693_v34  ;;  %vm699_vm4 = vweird.f32 %v693_v34 }
 0x7e1   :  { %v1500_v15 = vmul.f32 -1.442695, %v763_v10 }
 0x7e2   :  { %v706_v46 = vor.u32 1.1754944e-38, %v705_v42  ;;  %vm704_vm6 = vcmp.eq.f32.partialorder %v703_v44, 8.507059e+37 }
 0x7e3   :  { %1588 = vpow2.f32 %v1500_v15 }
 0x7e6   :  { %v1587_v38 = vpop.eup %1586  ;;  %v761_v39 = vpop.f32.mrf.mxu3 }
 0x7e7   :  { %v695_v40 = vmul.f32 %v1587_v38, %v693_v34  ;;  %vm700_vm3 = vweird.f32 %v1587_v38 }
 0x7e8   :  { %vm701_vm5 = vmor %vm699_vm4, %vm700_vm3 }
 0x7e9   :  { %v1589_v29 = vpop.eup %1588  ;;  %v696_v41 = vsub.f32 1.0, %v695_v40 }
 0x7ea   :  { %v767_v36 = vadd.f32 1.0, %v1589_v29  ;;  %v887_v29 = vld [vmem:[#allocation2 + $0xe] sm:$0x3] }
 0x7eb   :  { %v697_v43 = vmul.f32 %v1587_v38, %v696_v41 }
 0x7ec   :  { %1590 = vrcp.f32 %v767_v36  ;;  %v779_v56 = vand.u32 2147483648, %v767_v36  ;;  %v777_v59 = vand.u32 2147483647, %v767_v36  ;;  %vm773_vm8 = vweird.f32 %v767_v36 }
 0x7ed   :  { %v698_v45 = vadd.f32 %v1587_v38, %v697_v43 }
 0x7ee   :  { %v780_v63 = vor.u32 1.1754944e-38, %v779_v56  ;;  %vm778_vm10 = vcmp.eq.f32.partialorder %v777_v59, 8.507059e+37 }
 0x7ef   :  { %v702_v47 = vsel %vm701_vm5, %v1587_v38, %v698_v45 }
 0x7f0   :  { %v707_v48 = vsel %vm704_vm6, %v706_v46, %v702_v47 }
 0x7f1   :  { %v709_v49 = vmul.f32 2.0, %v707_v48 }
 0x7f2   :  { %v1591_v50 = vpop.eup %1590 }
 0x7f3   :  { %v769_v51 = vmul.f32 %v1591_v50, %v767_v36  ;;  %v1498_v52 = vadd.f32 -1.0, %v709_v49  ;;  %vm774_vm7 = vweird.f32 %v1591_v50 }
 0x7f4   :  { %vm775_vm9 = vmor %vm773_vm8, %vm774_vm7 }
 0x7f5   :  { %v770_v53 = vsub.f32 1.0, %v769_v51  ;;  %v711_v55 = vsel %vm1813_vm11, %v1498_v52, %v707_v48 }
 0x7f6   :  { %714 = vrot.lane.b32.xlu0 %v711_v55, %s1700_s3  ;;  %v712_v14 = vmul.f32 %v711_v55, %v1888_v8 }
 0x7f7   :  { %v771_v57 = vmul.f32 %v1591_v50, %v770_v53 }
 0x7f9   :  { %v772_v60 = vadd.f32 %v1591_v50, %v771_v57 }
 0x7fb   :  { %v776_v0 = vsel %vm775_vm9, %v1591_v50, %v772_v60 }
 0x7fc   :  { %v781_v1 = vsel %vm778_vm10, %v780_v63, %v776_v0 }
 0x7fd   :  { %v783_v4 = vmul.f32 2.0, %v781_v1 }
 0x7ff   :  { %v1501_v5 = vadd.f32 -1.0, %v783_v4 }
 0x801   :  { %v785_v54 = vsel %vm1813_vm11, %v1501_v5, %v781_v1 }
 0x802   :  { %788 = vrot.lane.b32.xlu1 %v785_v54, %s1700_s3  ;;  %v786_v19 = vmul.f32 %v785_v54, %v1893_v13 }
 0x868   :  { %v715_v7 = vpop.permute.xlu0 %714 }
 0x869   :  { %v717_v9 = vmul.f32 %v715_v7, %v711_v55 }
 0x86b   :  { %719 = vrot.lane.b32.xlu2 %v717_v9, %s1701_s23 }
 0x874   :  { %v789_v11 = vpop.permute.xlu1 %788 }
 0x875   :  { %v791_v12 = vmul.f32 %v789_v11, %v785_v54 }
 0x877   :  { %793 = vrot.lane.b32.xlu0 %v791_v12, %s1701_s23 }
 0x8c5   :  { %v720_v16 = vpop.permute.xlu2 %719 }
 0x8c6   :  { %v1920_v61 = vadd.f32 %v720_v16, %v712_v14 }
 0x8c8   :  { %1592 = vtanh.f32 %v1920_v61 }
 0x8ce   :  { %v1593_v18 = vpop.eup %1592 }
 0x8cf   :  { %725 = vrot.lane.b32.xlu1 %v1593_v18, %s1700_s3 }
 0x8e9   :  { %v794_v20 = vpop.permute.xlu0 %793 }
 0x8ea   :  { %v1925_v21 = vadd.f32 %v794_v20, %v786_v19 }
 0x8ec   :  { %1594 = vtanh.f32 %v1925_v21 }
 0x8f2   :  { %v1595_v22 = vpop.eup %1594 }
 0x8f3   :  { %799 = vrot.lane.b32.xlu2 %v1595_v22, %s1700_s3 }
 0x941   :  { %v726_v23 = vpop.permute.xlu1 %725 }
 0x942   :  { %v728_v8 = vmul.f32 %v726_v23, %v711_v55 }
 0x944   :  { %v1929_v24 = vpack.c.bf16 %v728_v8, %v728_v8 }
 0x946   :  { %v816_v25 = vunpack.c.l.b16 %v1929_v24 }
 0x948   :  { %v817_v26 = vpack.c.b16 %v816_v25, %v816_v25 }
 0x94a   :  { %818 = vrot.lane.b32.xlu0 %v817_v26, %s1701_s23 }
 0x94d   :  { %v800_v27 = vpop.permute.xlu2 %799 }
 0x94e   :  { %v802_v28 = vmul.f32 %v800_v27, %v785_v54 }
 0x950   :  { %v1933_v13 = vpack.c.bf16 %v802_v28, %v802_v28 }
 0x952   :  { %v888_v30 = vunpack.c.l.b16 %v1933_v13 }
 0x954   :  { %v889_v31 = vpack.c.b16 %v888_v30, %v888_v30 }
 0x956   :  { %890 = vrot.lane.b32.xlu1 %v889_v31, %s1701_s23 }
 0x9bc   :  { %v819_v33 = vpop.permute.xlu0 %818 }
 0x9bd   :  { %1502 = vmatmul.msk.bf16.vlgmr.msra.gmra.mxu0 %vm221_vm0, %v819_v33 }
 0x9c8   :  { %v891_v34 = vpop.permute.xlu1 %890 }
 0x9c9   :  { %1505 = vmatmul.msk.bf16.vlgmr.msra.gmra.mxu1 %vm221_vm0, %v891_v34 }
 0xa3a   :  { %v832_v37 = vpop.f32.mrf.mxu0 }
 0xa3b   :  { %v836_v10 = vadd.f32 %v832_v37, %v815_v35 }
 0xa3d   :  { %v1503_v15 = vmul.f32 -1.442695, %v836_v10 }
 0xa3f   :  { %1596 = vpow2.f32 %v1503_v15 }
 0xa42   :  { %v834_v38 = vpop.f32.mrf.mxu0 }
 0xa45   :  { %v1597_v39 = vpop.eup %1596 }
 0xa46   :  { %v840_v40 = vadd.f32 1.0, %v1597_v39  ;;  %v904_v41 = vpop.f32.mrf.mxu1 }
 0xa47   :  { %v908_v36 = vadd.f32 %v904_v41, %v887_v29 }
 0xa48   :  { %1598 = vrcp.f32 %v840_v40  ;;  %v852_v49 = vand.u32 2147483648, %v840_v40  ;;  %v850_v51 = vand.u32 2147483647, %v840_v40  ;;  %vm846_vm13 = vweird.f32 %v840_v40 }
 0xa49   :  { %v1506_v42 = vmul.f32 -1.442695, %v908_v36  ;;  %v959_v36 = vld [vmem:[#allocation2 + $0x14] sm:$0x3] }
 0xa4a   :  { %v853_v53 = vor.u32 1.1754944e-38, %v852_v49  ;;  %vm851_vm15 = vcmp.eq.f32.partialorder %v850_v51, 8.507059e+37 }
 0xa4b   :  { %1600 = vpow2.f32 %v1506_v42 }
 0xa4e   :  { %v1599_v43 = vpop.eup %1598  ;;  %v906_v44 = vpop.f32.mrf.mxu1 }
 0xa4f   :  { %v842_v45 = vmul.f32 %v1599_v43, %v840_v40  ;;  %vm847_vm12 = vweird.f32 %v1599_v43 }
 0xa50   :  { %vm848_vm14 = vmor %vm846_vm13, %vm847_vm12 }
 0xa51   :  { %v1601_v46 = vpop.eup %1600  ;;  %v843_v47 = vsub.f32 1.0, %v842_v45 }
 0xa52   :  { %v912_v48 = vadd.f32 1.0, %v1601_v46 }
 0xa53   :  { %v844_v50 = vmul.f32 %v1599_v43, %v843_v47 }
 0xa54   :  { %1602 = vrcp.f32 %v912_v48  ;;  %v924_v4 = vand.u32 2147483648, %v912_v48  ;;  %v922_v54 = vand.u32 2147483647, %v912_v48  ;;  %vm918_vm2 = vweird.f32 %v912_v48 }
 0xa55   :  { %v845_v52 = vadd.f32 %v1599_v43, %v844_v50 }
 0xa56   :  { %v925_v9 = vor.u32 1.1754944e-38, %v924_v4  ;;  %vm923_vm4 = vcmp.eq.f32.partialorder %v922_v54, 8.507059e+37 }
 0xa57   :  { %v849_v55 = vsel %vm848_vm14, %v1599_v43, %v845_v52 }
 0xa58   :  { %v854_v56 = vsel %vm851_vm15, %v853_v53, %v849_v55 }
 0xa59   :  { %v856_v57 = vmul.f32 2.0, %v854_v56 }
 0xa5a   :  { %v1603_v59 = vpop.eup %1602 }
 0xa5b   :  { %v914_v60 = vmul.f32 %v1603_v59, %v912_v48  ;;  %v1504_v63 = vadd.f32 -1.0, %v856_v57  ;;  %vm919_vm1 = vweird.f32 %v1603_v59 }
 0xa5c   :  { %vm920_vm3 = vmor %vm918_vm2, %vm919_vm1 }
 0xa5d   :  { %v915_v0 = vsub.f32 1.0, %v914_v60  ;;  %v858_v1 = vsel %vm1813_vm11, %v1504_v63, %v854_v56 }
 0xa5e   :  { %861 = vrot.lane.b32.xlu2 %v858_v1, %s1700_s3  ;;  %v859_v8 = vmul.f32 %v858_v1, %v1920_v61 }
 0xa5f   :  { %v916_v5 = vmul.f32 %v1603_v59, %v915_v0 }
 0xa61   :  { %v917_v7 = vadd.f32 %v1603_v59, %v916_v5 }
 0xa63   :  { %v921_v11 = vsel %vm920_vm3, %v1603_v59, %v917_v7 }
 0xa64   :  { %v926_v12 = vsel %vm923_vm4, %v925_v9, %v921_v11 }
 0xa65   :  { %v928_v14 = vmul.f32 2.0, %v926_v12 }
 0xa67   :  { %v1507_v16 = vadd.f32 -1.0, %v928_v14 }
 0xa69   :  { %v930_v18 = vsel %vm1813_vm11, %v1507_v16, %v926_v12 }
 0xa6a   :  { %933 = vrot.lane.b32.xlu0 %v930_v18, %s1700_s3  ;;  %v931_v28 = vmul.f32 %v930_v18, %v1925_v21 }
 0xab8   :  { %v862_v19 = vpop.permute.xlu2 %861 }
 0xab9   :  { %v864_v20 = vmul.f32 %v862_v19, %v858_v1 }
 0xabb   :  { %866 = vrot.lane.b32.xlu1 %v864_v20, %s1701_s23 }
 0xadc   :  { %v934_v22 = vpop.permute.xlu0 %933 }
 0xadd   :  { %v936_v23 = vmul.f32 %v934_v22, %v930_v18 }
 0xadf   :  { %938 = vrot.lane.b32.xlu2 %v936_v23, %s1701_s23 }
 0xb2d   :  { %v867_v25 = vpop.permute.xlu1 %866 }
 0xb2e   :  { %v1948_v26 = vadd.f32 %v867_v25, %v859_v8 }
 0xb30   :  { %1604 = vtanh.f32 %v1948_v26 }
 0xb36   :  { %v1605_v27 = vpop.eup %1604 }
 0xb37   :  { %872 = vrot.lane.b32.xlu0 %v1605_v27, %s1700_s3 }
 0xb39   :  { %v939_v30 = vpop.permute.xlu2 %938 }
 0xb3a   :  { %v1953_v31 = vadd.f32 %v939_v30, %v931_v28 }
 0xb3c   :  { %1606 = vtanh.f32 %v1953_v31 }
 0xb42   :  { %v1607_v33 = vpop.eup %1606 }
 0xb43   :  { %944 = vrot.lane.b32.xlu1 %v1607_v33, %s1700_s3 }
 0xba9   :  { %v873_v34 = vpop.permute.xlu0 %872 }
 0xbaa   :  { %v875_v61 = vmul.f32 %v873_v34, %v858_v1  ;;  %v1031_v1 = vld [vmem:[#allocation2 + $0xa] sm:$0x3] }
 0xbac   :  { %v1957_v35 = vpack.c.bf16 %v875_v61, %v875_v61 }
 0xbae   :  { %v960_v37 = vunpack.c.l.b16 %v1957_v35 }
 0xbb0   :  { %v961_v10 = vpack.c.b16 %v960_v37, %v960_v37 }
 0xbb2   :  { %962 = vrot.lane.b32.xlu2 %v961_v10, %s1701_s23 }
 0xbb5   :  { %v945_v15 = vpop.permute.xlu1 %944 }
 0xbb6   :  { %v947_v38 = vmul.f32 %v945_v15, %v930_v18 }
 0xbb8   :  { %v1961_v21 = vpack.c.bf16 %v947_v38, %v947_v38 }
 0xbba   :  { %v1032_v39 = vunpack.c.l.b16 %v1961_v21 }
 0xbbc   :  { %v1033_v40 = vpack.c.b16 %v1032_v39, %v1032_v39 }
 0xbbe   :  { %1034 = vrot.lane.b32.xlu0 %v1033_v40, %s1701_s23 }
 0xc0c   :  { %v963_v29 = vpop.permute.xlu2 %962 }
 0xc0d   :  { %1508 = vmatmul.msk.bf16.vlgmr.msrb.gmra.mxu2 %vm221_vm0, %v963_v29 }
 0xc30   :  { %v1035_v41 = vpop.permute.xlu0 %1034 }
 0xc31   :  { %1511 = vmatmul.msk.bf16.vlgmr.msrb.gmra.mxu3 %vm221_vm0, %v1035_v41 }
 0xc90   :  { %v976_v42 = vpop.f32.mrf.mxu2 }
 0xc91   :  { %v980_v43 = vadd.f32 %v976_v42, %v959_v36 }
 0xc93   :  { %v1509_v44 = vmul.f32 -1.442695, %v980_v43 }
 0xc95   :  { %1608 = vpow2.f32 %v1509_v44 }
 0xc98   :  { %v978_v45 = vpop.f32.mrf.mxu2 }
 0xc9b   :  { %v1609_v46 = vpop.eup %1608 }
 0xc9c   :  { %v984_v47 = vadd.f32 1.0, %v1609_v46 }
 0xc9e   :  { %1610 = vrcp.f32 %v984_v47  ;;  %v996_v51 = vand.u32 2147483648, %v984_v47  ;;  %v994_v53 = vand.u32 2147483647, %v984_v47  ;;  %vm990_vm6 = vweird.f32 %v984_v47 }
 0xca0   :  { %v997_v56 = vor.u32 1.1754944e-38, %v996_v51  ;;  %vm995_vm8 = vcmp.eq.f32.partialorder %v994_v53, 8.507059e+37 }
 0xca4   :  { %v1611_v48 = vpop.eup %1610 }
 0xca5   :  { %v986_v49 = vmul.f32 %v1611_v48, %v984_v47  ;;  %vm991_vm5 = vweird.f32 %v1611_v48 }
 0xca6   :  { %vm992_vm7 = vmor %vm990_vm6, %vm991_vm5 }
 0xca7   :  { %v987_v50 = vsub.f32 1.0, %v986_v49 }
 0xca9   :  { %v988_v52 = vmul.f32 %v1611_v48, %v987_v50 }
 0xcab   :  { %v989_v55 = vadd.f32 %v1611_v48, %v988_v52  ;;  %v1103_v52 = vld [vmem:[#allocation2 + $0x18] sm:$0x3] }
 0xcad   :  { %v993_v57 = vsel %vm992_vm7, %v1611_v48, %v989_v55 }
 0xcae   :  { %v998_v59 = vsel %vm995_vm8, %v997_v56, %v993_v57 }
 0xcaf   :  { %v1000_v60 = vmul.f32 2.0, %v998_v59 }
 0xcb1   :  { %v1510_v63 = vadd.f32 -1.0, %v1000_v60 }
 0xcb3   :  { %v1002_v0 = vsel %vm1813_vm11, %v1510_v63, %v998_v59  ;;  %v1175_v63 = vld [vmem:[#allocation2 + $0x6] sm:$0x3] }
 0xcb4   :  { %v1048_v4 = vpop.f32.mrf.mxu3  ;;  %1005 = vrot.lane.b32.xlu1 %v1002_v0, %s1700_s3  ;;  %v1003_v10 = vmul.f32 %v1002_v0, %v1948_v26 }
 0xcb5   :  { %v1052_v5 = vadd.f32 %v1048_v4, %v1031_v1 }
 0xcb7   :  { %v1512_v54 = vmul.f32 -1.442695, %v1052_v5 }
 0xcb9   :  { %1612 = vpow2.f32 %v1512_v54 }
 0xcbc   :  { %v1050_v7 = vpop.f32.mrf.mxu3 }
 0xcbf   :  { %v1613_v9 = vpop.eup %1612 }
 0xcc0   :  { %v1056_v11 = vadd.f32 1.0, %v1613_v9 }
 0xcc2   :  { %1614 = vrcp.f32 %v1056_v11  ;;  %v1068_v18 = vand.u32 2147483648, %v1056_v11  ;;  %v1066_v20 = vand.u32 2147483647, %v1056_v11  ;;  %vm1062_vm10 = vweird.f32 %v1056_v11 }
 0xcc4   :  { %v1069_v23 = vor.u32 1.1754944e-38, %v1068_v18  ;;  %vm1067_vm13 = vcmp.eq.f32.partialorder %v1066_v20, 8.507059e+37 }
 0xcc8   :  { %v1615_v12 = vpop.eup %1614 }
 0xcc9   :  { %v1058_v14 = vmul.f32 %v1615_v12, %v1056_v11  ;;  %vm1063_vm9 = vweird.f32 %v1615_v12 }
 0xcca   :  { %vm1064_vm12 = vmor %vm1062_vm10, %vm1063_vm9 }
 0xccb   :  { %v1059_v16 = vsub.f32 1.0, %v1058_v14 }
 0xccd   :  { %v1060_v19 = vmul.f32 %v1615_v12, %v1059_v16 }
 0xccf   :  { %v1061_v22 = vadd.f32 %v1615_v12, %v1060_v19 }
 0xcd1   :  { %v1065_v8 = vsel %vm1064_vm12, %v1615_v12, %v1061_v22 }
 0xcd2   :  { %v1070_v25 = vsel %vm1067_vm13, %v1069_v23, %v1065_v8 }
 0xcd3   :  { %v1072_v27 = vmul.f32 2.0, %v1070_v25 }
 0xcd5   :  { %v1513_v28 = vadd.f32 -1.0, %v1072_v27 }
 0xcd7   :  { %v1074_v30 = vsel %vm1813_vm11, %v1513_v28, %v1070_v25 }
 0xcd8   :  { %1077 = vrot.lane.b32.xlu2 %v1074_v30, %s1700_s3  ;;  %v1075_v40 = vmul.f32 %v1074_v30, %v1953_v31 }
 0xd26   :  { %v1006_v33 = vpop.permute.xlu1 %1005 }
 0xd27   :  { %v1008_v34 = vmul.f32 %v1006_v33, %v1002_v0 }
 0xd29   :  { %1010 = vrot.lane.b32.xlu0 %v1008_v34, %s1701_s23 }
 0xd32   :  { %v1078_v61 = vpop.permute.xlu2 %1077 }
 0xd33   :  { %v1080_v37 = vmul.f32 %v1078_v61, %v1074_v30 }
 0xd35   :  { %1082 = vrot.lane.b32.xlu1 %v1080_v37, %s1701_s23 }
 0xd9b   :  { %v1011_v15 = vpop.permute.xlu0 %1010 }
 0xd9c   :  { %v1976_v38 = vadd.f32 %v1011_v15, %v1003_v10 }
 0xd9e   :  { %1616 = vtanh.f32 %v1976_v38 }
 0xda4   :  { %v1617_v39 = vpop.eup %1616 }
 0xda5   :  { %1016 = vrot.lane.b32.xlu2 %v1617_v39, %s1700_s3 }
 0xda7   :  { %v1083_v29 = vpop.permute.xlu1 %1082 }
 0xda8   :  { %v1981_v41 = vadd.f32 %v1083_v29, %v1075_v40 }
 0xdaa   :  { %1618 = vtanh.f32 %v1981_v41 }
 0xdb0   :  { %v1619_v36 = vpop.eup %1618 }
 0xdb1   :  { %1088 = vrot.lane.b32.xlu0 %v1619_v36, %s1700_s3 }
 0xdff   :  { %v1017_v42 = vpop.permute.xlu2 %1016 }
 0xe00   :  { %v1019_v26 = vmul.f32 %v1017_v42, %v1002_v0 }
 0xe02   :  { %v1985_v43 = vpack.c.bf16 %v1019_v26, %v1019_v26 }
 0xe04   :  { %v1104_v44 = vunpack.c.l.b16 %v1985_v43 }
 0xe06   :  { %v1105_v45 = vpack.c.b16 %v1104_v44, %v1104_v44 }
 0xe08   :  { %1106 = vrot.lane.b32.xlu1 %v1105_v45, %s1701_s23 }
 0xe23   :  { %v1089_v46 = vpop.permute.xlu0 %1088 }
 0xe24   :  { %v1091_v47 = vmul.f32 %v1089_v46, %v1074_v30 }
 0xe26   :  { %v1989_v31 = vpack.c.bf16 %v1091_v47, %v1091_v47 }
 0xe28   :  { %v1176_v48 = vunpack.c.l.b16 %v1989_v31 }
 0xe2a   :  { %v1177_v49 = vpack.c.b16 %v1176_v48, %v1176_v48 }
 0xe2c   :  { %1178 = vrot.lane.b32.xlu2 %v1177_v49, %s1701_s23 }
 0xe7a   :  { %v1107_v50 = vpop.permute.xlu1 %1106 }
 0xe7b   :  { %1514 = vmatmul.msk.bf16.vlgmr.msrb.gmra.mxu0 %vm221_vm0, %v1107_v50 }
 0xe86   :  { %v1179_v51 = vpop.permute.xlu2 %1178 }
 0xe87   :  { %1517 = vmatmul.msk.bf16.vlgmr.msrb.gmra.mxu1 %vm221_vm0, %v1179_v51 }
 0xef8   :  { %v1120_v53 = vpop.f32.mrf.mxu0 }
 0xef9   :  { %v1124_v55 = vadd.f32 %v1120_v53, %v1103_v52 }
 0xefb   :  { %v1515_v56 = vmul.f32 -1.442695, %v1124_v55 }
 0xefd   :  { %1620 = vpow2.f32 %v1515_v56 }
 0xf00   :  { %v1122_v57 = vpop.f32.mrf.mxu0 }
 0xf03   :  { %v1621_v59 = vpop.eup %1620 }
 0xf04   :  { %v1128_v60 = vadd.f32 1.0, %v1621_v59  ;;  %v1192_v0 = vpop.f32.mrf.mxu1 }
 0xf05   :  { %v1196_v1 = vadd.f32 %v1192_v0, %v1175_v63 }
 0xf06   :  { %1622 = vrcp.f32 %v1128_v60  ;;  %v1140_v14 = vand.u32 2147483648, %v1128_v60  ;;  %v1138_v18 = vand.u32 2147483647, %v1128_v60  ;;  %vm1134_vm15 = vweird.f32 %v1128_v60 }
 0xf07   :  { %v1518_v4 = vmul.f32 -1.442695, %v1196_v1 }
 0xf08   :  { %v1141_v20 = vor.u32 1.1754944e-38, %v1140_v14  ;;  %vm1139_vm2 = vcmp.eq.f32.partialorder %v1138_v18, 8.507059e+37 }
 0xf09   :  { %1624 = vpow2.f32 %v1518_v4 }
 0xf0c   :  { %v1623_v5 = vpop.eup %1622  ;;  %v1194_v54 = vpop.f32.mrf.mxu1 }
 0xf0d   :  { %v1130_v7 = vmul.f32 %v1623_v5, %v1128_v60  ;;  %vm1135_vm14 = vweird.f32 %v1623_v5 }
 0xf0e   :  { %vm1136_vm1 = vmor %vm1134_vm15, %vm1135_vm14  ;;  %vm281_vm15 = vcmask 1040384  }
 0xf0f   :  { %v1625_v9 = vpop.eup %1624  ;;  %v1131_v11 = vsub.f32 1.0, %v1130_v7  ;;  %v1247_v7 = vld [vmem:[#allocation2 + $0x1c] sm:$0x3] }
 0xf10   :  { %v1200_v12 = vadd.f32 1.0, %v1625_v9 }
 0xf11   :  { %v1132_v16 = vmul.f32 %v1623_v5, %v1131_v11 }
 0xf12   :  { %1626 = vrcp.f32 %v1200_v12  ;;  %v1212_v34 = vand.u32 2147483648, %v1200_v12  ;;  %v1210_v37 = vand.u32 2147483647, %v1200_v12  ;;  %vm1206_vm4 = vweird.f32 %v1200_v12 }
 0xf13   :  { %v1133_v19 = vadd.f32 %v1623_v5, %v1132_v16 }
 0xf14   :  { %v1213_v15 = vor.u32 1.1754944e-38, %v1212_v34  ;;  %vm1211_vm6 = vcmp.eq.f32.partialorder %v1210_v37, 8.507059e+37 }
 0xf15   :  { %v1137_v22 = vsel %vm1136_vm1, %v1623_v5, %v1133_v19  ;;  %v1319_v19 = vld [vmem:[#allocation2 + $0x2] sm:$0x3]  ;;  %vm369_vm1 = vcmask 516352  }
 0xf16   :  { %v1142_v23 = vsel %vm1139_vm2, %v1141_v20, %v1137_v22  ;;  %vm1395_vm2 = vcmask 254976  }
 0xf17   :  { %v1144_v8 = vmul.f32 2.0, %v1142_v23 }
 0xf18   :  { %v1627_v25 = vpop.eup %1626 }
 0xf19   :  { %v1202_v27 = vmul.f32 %v1627_v25, %v1200_v12  ;;  %v1516_v28 = vadd.f32 -1.0, %v1144_v8  ;;  %vm1207_vm3 = vweird.f32 %v1627_v25 }
 0xf1a   :  { %vm1208_vm5 = vmor %vm1206_vm4, %vm1207_vm3 }
 0xf1b   :  { %v1203_v30 = vsub.f32 1.0, %v1202_v27  ;;  %v1146_v33 = vsel %vm1813_vm11, %v1516_v28, %v1142_v23 }
 0xf1c   :  { %1149 = vrot.lane.b32.xlu0 %v1146_v33, %s1700_s3  ;;  %v1147_v47 = vmul.f32 %v1146_v33, %v1976_v38 }
 0xf1d   :  { %v1204_v61 = vmul.f32 %v1627_v25, %v1203_v30 }
 0xf1f   :  { %v1205_v10 = vadd.f32 %v1627_v25, %v1204_v61 }
 0xf21   :  { %v1209_v39 = vsel %vm1208_vm5, %v1627_v25, %v1205_v10 }
 0xf22   :  { %v1214_v40 = vsel %vm1211_vm6, %v1213_v15, %v1209_v39 }
 0xf23   :  { %v1216_v29 = vmul.f32 2.0, %v1214_v40 }
 0xf25   :  { %v1519_v36 = vadd.f32 -1.0, %v1216_v29 }
 0xf27   :  { %v1218_v42 = vsel %vm1813_vm11, %v1519_v36, %v1214_v40 }
 0xf28   :  { %1221 = vrot.lane.b32.xlu1 %v1218_v42, %s1700_s3  ;;  %v1219_v51 = vmul.f32 %v1218_v42, %v1981_v41 }
 0xf8e   :  { %v1150_v26 = vpop.permute.xlu0 %1149 }
 0xf8f   :  { %v1152_v44 = vmul.f32 %v1150_v26, %v1146_v33 }
 0xf91   :  { %1154 = vrot.lane.b32.xlu2 %v1152_v44, %s1701_s23 }
 0xf9a   :  { %v1222_v45 = vpop.permute.xlu1 %1221 }
 0xf9b   :  { %v1224_v46 = vmul.f32 %v1222_v45, %v1218_v42 }
 0xf9d   :  { %1226 = vrot.lane.b32.xlu0 %v1224_v46, %s1701_s23 }
 0xfeb   :  { %v1155_v48 = vpop.permute.xlu2 %1154 }
 0xfec   :  { %v2004_v49 = vadd.f32 %v1155_v48, %v1147_v47 }
 0xfee   :  { %1628 = vtanh.f32 %v2004_v49 }
 0xff4   :  { %v1629_v50 = vpop.eup %1628 }
 0xff5   :  { %1160 = vrot.lane.b32.xlu1 %v1629_v50, %s1700_s3 }
0x100f   :  { %v1227_v52 = vpop.permute.xlu0 %1226 }
0x1010   :  { %v2009_v53 = vadd.f32 %v1227_v52, %v1219_v51 }
0x1012   :  { %1630 = vtanh.f32 %v2009_v53 }
0x1018   :  { %v1631_v55 = vpop.eup %1630 }
0x1019   :  { %1232 = vrot.lane.b32.xlu2 %v1631_v55, %s1700_s3 }
0x1067   :  { %v1161_v56 = vpop.permute.xlu1 %1160 }
0x1068   :  { %v1163_v38 = vmul.f32 %v1161_v56, %v1146_v33 }
0x106a   :  { %v2013_v57 = vpack.c.bf16 %v1163_v38, %v1163_v38 }
0x106c   :  { %v1248_v59 = vunpack.c.l.b16 %v2013_v57 }
0x106e   :  { %v1249_v60 = vpack.c.b16 %v1248_v59, %v1248_v59 }
0x1070   :  { %1250 = vrot.lane.b32.xlu0 %v1249_v60, %s1701_s23 }
0x1073   :  { %v1233_v63 = vpop.permute.xlu2 %1232 }
0x1074   :  { %v1235_v0 = vmul.f32 %v1233_v63, %v1218_v42 }
0x1076   :  { %v2017_v41 = vpack.c.bf16 %v1235_v0, %v1235_v0 }
0x1078   :  { %v1320_v1 = vunpack.c.l.b16 %v2017_v41 }
0x107a   :  { %v1321_v4 = vpack.c.b16 %v1320_v1, %v1320_v1 }
0x107c   :  { %1322 = vrot.lane.b32.xlu1 %v1321_v4, %s1701_s23  ;;  %v280_v4 = vrot.slane %v1833_v62, 3 }
0x107e   :  { %v284_v32 = vsel %vm281_vm15, %v1833_v62, %v280_v4 }
0x10e2   :  { %v1251_v5 = vpop.permute.xlu0 %1250 }
0x10e3   :  { %1520 = vmatmul.msk.bf16.vlgmr.msra.gmra.mxu2 %vm221_vm0, %v1251_v5  ;;  %v509_v5 = vrot.slane %v1869_v58, 3 }
0x10ee   :  { %v1323_v54 = vpop.permute.xlu1 %1322 }
0x10ef   :  { %1523 = vmatmul.msk.bf16.vlgmr.msra.gmra.mxu3 %vm221_vm0, %v1323_v54  ;;  %v512_v54 = vsel %vm281_vm15, %v1869_v58, %v509_v5 }
0x1166   :  { %v1264_v9 = vpop.f32.mrf.mxu2 }
0x1167   :  { %v1268_v11 = vadd.f32 %v1264_v9, %v1247_v7  ;;  %v731_v7 = vrot.slane %v1929_v24, 3 }
0x1169   :  { %v1521_v12 = vmul.f32 -1.442695, %v1268_v11  ;;  %v734_v9 = vsel %vm281_vm15, %v1929_v24, %v731_v7  ;;  %v950_v11 = vrot.slane %v1961_v21, 3 }
0x116b   :  { %1632 = vpow2.f32 %v1521_v12  ;;  %v953_v62 = vsel %vm281_vm15, %v1961_v21, %v950_v11  ;;  %v1166_v12 = vrot.slane %v2013_v57, 3 }
0x116d   :  { %v1169_v58 = vsel %vm281_vm15, %v2013_v57, %v1166_v12 }
0x116e   :  { %v1266_v14 = vpop.f32.mrf.mxu2 }
0x1171   :  { %v1633_v16 = vpop.eup %1632 }
0x1172   :  { %v1272_v18 = vadd.f32 1.0, %v1633_v16  ;;  %v1336_v20 = vpop.f32.mrf.mxu3 }
0x1173   :  { %v1340_v22 = vadd.f32 %v1336_v20, %v1319_v19  ;;  %v360_v20 = vrot.slane %v1837_v3, 3 }
0x1174   :  { %1634 = vrcp.f32 %v1272_v18  ;;  %v1284_v34 = vand.u32 2147483648, %v1272_v18  ;;  %v1282_v37 = vand.u32 2147483647, %v1272_v18  ;;  %vm1278_vm7 = vweird.f32 %v1272_v18 }
0x1175   :  { %v1524_v23 = vmul.f32 -1.442695, %v1340_v22  ;;  %v363_v57 = vsel %vm281_vm15, %v1837_v3, %v360_v20 }
0x1176   :  { %v1285_v15 = vor.u32 1.1754944e-38, %v1284_v34  ;;  %vm1283_vm9 = vcmp.eq.f32.partialorder %v1282_v37, 8.507059e+37  ;;  %v1022_v34 = vrot.slane %v1985_v43, 3 }
0x1177   :  { %1636 = vpow2.f32 %v1524_v23 }
0x1178   :  { %v1025_v37 = vsel %vm281_vm15, %v1985_v43, %v1022_v34 }
0x117a   :  { %v1635_v8 = vpop.eup %1634  ;;  %v1338_v25 = vpop.f32.mrf.mxu3 }
0x117b   :  { %v1274_v27 = vmul.f32 %v1635_v8, %v1272_v18  ;;  %vm1279_vm0 = vweird.f32 %v1635_v8 }
0x117c   :  { %vm1280_vm8 = vmor %vm1278_vm7, %vm1279_vm0 }
0x117d   :  { %v1637_v28 = vpop.eup %1636  ;;  %v1275_v30 = vsub.f32 1.0, %v1274_v27  ;;  %v805_v27 = vrot.slane %v1933_v13, 3 }
0x117e   :  { %v1344_v33 = vadd.f32 1.0, %v1637_v28 }
0x117f   :  { %v1276_v61 = vmul.f32 %v1635_v8, %v1275_v30  ;;  %v657_v30 = vrot.slane %v1901_v2, 3 }
0x1180   :  { %1638 = vrcp.f32 %v1344_v33  ;;  %v1356_v46 = vand.u32 2147483648, %v1344_v33  ;;  %v1354_v48 = vand.u32 2147483647, %v1344_v33  ;;  %vm1350_vm12 = vweird.f32 %v1344_v33 }
0x1181   :  { %v1277_v10 = vadd.f32 %v1635_v8, %v1276_v61  ;;  %v660_v61 = vsel %vm281_vm15, %v1901_v2, %v657_v30  ;;  %v1094_v2 = vrot.slane %v1989_v31, 3 }
0x1182   :  { %v1357_v51 = vor.u32 1.1754944e-38, %v1356_v46  ;;  %vm1355_vm14 = vcmp.eq.f32.partialorder %v1354_v48, 8.507059e+37 }
0x1183   :  { %v1281_v39 = vsel %vm1280_vm8, %v1635_v8, %v1277_v10  ;;  %v583_v8 = vrot.slane %v1897_v17, 3  ;;  %v1238_v10 = vrot.slane %v2017_v41, 3 }
0x1184   :  { %v1286_v40 = vsel %vm1283_vm9, %v1285_v15, %v1281_v39 }
0x1185   :  { %v1288_v29 = vmul.f32 2.0, %v1286_v40  ;;  %v586_v25 = vsel %vm281_vm15, %v1897_v17, %v583_v8  ;;  %v1241_v39 = vsel %vm281_vm15, %v2017_v41, %v1238_v10 }
0x1186   :  { %v1639_v36 = vpop.eup %1638 }
0x1187   :  { %v1346_v42 = vmul.f32 %v1639_v36, %v1344_v33  ;;  %v1522_v26 = vadd.f32 -1.0, %v1288_v29  ;;  %vm1351_vm10 = vweird.f32 %v1639_v36  ;;  %v808_v33 = vsel %vm281_vm15, %v1933_v13, %v805_v27 }
0x1188   :  { %vm1352_vm13 = vmor %vm1350_vm12, %vm1351_vm10 }
0x1189   :  { %v1347_v44 = vsub.f32 1.0, %v1346_v42  ;;  %v2025_v45 = vsel %vm1813_vm11, %v1522_v26, %v1286_v40  ;;  %v1097_v40 = vsel %vm281_vm15, %v1989_v31, %v1094_v2 }
0x118a   :  { %1293 = vrot.lane.b32.xlu2 %v2025_v45, %s1700_s3  ;;  %v1291_v14 = vmul.f32 %v2025_v45, %v2004_v49 }
0x118b   :  { %v1348_v47 = vmul.f32 %v1639_v36, %v1347_v44 }
0x118d   :  { %v1349_v50 = vadd.f32 %v1639_v36, %v1348_v47 }
0x118f   :  { %v1353_v52 = vsel %vm1352_vm13, %v1639_v36, %v1349_v50 }
0x1190   :  { %v1358_v55 = vsel %vm1355_vm14, %v1357_v51, %v1353_v52 }
0x1191   :  { %v1360_v56 = vmul.f32 2.0, %v1358_v55 }
0x1193   :  { %v1525_v38 = vadd.f32 -1.0, %v1360_v56 }
0x1195   :  { %v2031_v59 = vsel %vm1813_vm11, %v1525_v38, %v1358_v55  ;;  %vm289_vm11 = vcmask 253952  }
0x1196   :  { %1365 = vrot.lane.b32.xlu0 %v2031_v59, %s1700_s3  ;;  %v1363_v21 = vmul.f32 %v2031_v59, %v2009_v53  ;;  %v435_v53 = vrot.slane %v1865_v6, 3 }
0x1198   :  { %v438_v28 = vsel %vm281_vm15, %v1865_v6, %v435_v53  ;;  %v878_v6 = vrot.slane %v1957_v35, 3 }
0x119a   :  { %v881_v15 = vsel %vm281_vm15, %v1957_v35, %v878_v6 }
0x11e4   :  { %v1294_v60 = vpop.permute.xlu2 %1293 }
0x11e5   :  { %v1296_v63 = vmul.f32 %v1294_v60, %v2025_v45 }
0x11e7   :  { %1298 = vrot.lane.b32.xlu1 %v1296_v63, %s1701_s23 }
0x1208   :  { %v1366_v0 = vpop.permute.xlu0 %1365 }
0x1209   :  { %v1368_v1 = vmul.f32 %v1366_v0, %v2031_v59 }
0x120b   :  { %1370 = vrot.lane.b32.xlu2 %v1368_v1, %s1701_s23 }
0x1213   :  { %286 = vrot.lane.b32.xlu2 %v284_v32, %s1701_s23 }
0x121b   :  { %514 = vrot.lane.b32.xlu2 %v512_v54, %s1700_s3 }
0x1223   :  { %736 = vrot.lane.b32.xlu2 %v734_v9, %s1701_s23 }
0x122b   :  { %955 = vrot.lane.b32.xlu2 %v953_v62, %s1700_s3 }
0x1233   :  { %1171 = vrot.lane.b32.xlu2 %v1169_v58, %s1701_s23 }
0x1259   :  { %v1299_v24 = vpop.permute.xlu1 %1298 }
0x125a   :  { %v1301_v16 = vadd.f32 %v1299_v24, %v1291_v14 }
0x125c   :  { %1640 = vtanh.f32 %v1301_v16 }
0x1262   :  { %v1641_v18 = vpop.eup %1640 }
0x1263   :  { %1304 = vrot.lane.b32.xlu0 %v1641_v18, %s1700_s3 }
0x1265   :  { %v1371_v19 = vpop.permute.xlu2 %1370 }
0x1266   :  { %v1373_v22 = vadd.f32 %v1371_v19, %v1363_v21 }
0x1268   :  { %1642 = vtanh.f32 %v1373_v22 }
0x126b   :  { %365 = vrot.lane.b32.xlu0 %v363_v57, %s1700_s3 }
0x126d   :  { %v287_v49 = vpop.permute.xlu2 %286 }
0x126e   :  { %v1643_v23 = vpop.eup %1642  ;;  %290 = vst.msk [vmem:[#allocation6] sm:$0x1] %vm289_vm11, %v287_v49 }
0x126f   :  { %1376 = vrot.lane.b32.xlu1 %v1643_v23, %s1700_s3 }
0x1273   :  { %588 = vrot.lane.b32.xlu0 %v586_v25, %s1701_s23 }
0x1275   :  { %v515_v3 = vpop.permute.xlu2 %514 }
0x1276   :  { %518 = vst.msk [vmem:[#allocation6 + $0x6] sm:$0x1] %vm369_vm1, %v515_v3 }
0x1277   :  { %440 = vrot.lane.b32.xlu1 %v438_v28, %s1701_s23 }
0x127b   :  { %810 = vrot.lane.b32.xlu0 %v808_v33, %s1700_s3 }
0x127d   :  { %v737_v17 = vpop.permute.xlu2 %736 }
0x127e   :  { %740 = vst.msk [vmem:[#allocation6 + $0x3] sm:$0x1] %vm289_vm11, %v737_v17 }
0x127f   :  { %662 = vrot.lane.b32.xlu1 %v660_v61, %s1700_s3 }
0x1283   :  { %1027 = vrot.lane.b32.xlu0 %v1025_v37, %s1701_s23 }
0x1285   :  { %v956_v13 = vpop.permute.xlu2 %955 }
0x1286   :  { %958 = vst.msk [vmem:[#allocation6 + $0x3] sm:$0x1] %vm369_vm1, %v956_v13 }
0x1287   :  { %883 = vrot.lane.b32.xlu1 %v881_v15, %s1701_s23 }
0x128b   :  { %1243 = vrot.lane.b32.xlu0 %v1241_v39, %s1700_s3 }
0x128d   :  { %v1172_v43 = vpop.permute.xlu2 %1171 }
0x128e   :  { %1174 = vst.msk [vmem:[#allocation6 + $0x6] sm:$0x1] %vm289_vm11, %v1172_v43 }
0x128f   :  { %1099 = vrot.lane.b32.xlu1 %v1097_v40, %s1700_s3 }
0x12d5   :  { %v1305_v29 = vpop.permute.xlu0 %1304 }
0x12d6   :  { %v1307_v35 = vmul.f32 %v1305_v29, %v2025_v45 }
0x12d8   :  { %v1308_v36 = vpack.c.bf16 %v1307_v35, %v1307_v35  ;;  %1392 = vrot.lane.b32.xlu0 %v1307_v35, %s1701_s23 }
0x12da   :  { %v1310_v42 = vrot.slane %v1308_v36, 3 }
0x12dc   :  { %v1313_v26 = vsel %vm281_vm15, %v1308_v36, %v1310_v42 }
0x12dd   :  { %v366_v41 = vpop.permute.xlu0 %365  ;;  %1315 = vrot.lane.b32.xlu1 %v1313_v26, %s1701_s23 }
0x12de   :  { %370 = vst.msk [vmem:[#allocation6 + $0x7] sm:$0x1] %vm369_vm1, %v366_v41 }
0x12e1   :  { %v1377_v44 = vpop.permute.xlu1 %1376 }
0x12e2   :  { %v1379_v46 = vmul.f32 %v1377_v44, %v2031_v59 }
0x12e4   :  { %v1380_v31 = vpack.c.bf16 %v1379_v46, %v1379_v46 }
0x12e5   :  { %v589_v47 = vpop.permute.xlu0 %588  ;;  %1398 = vrot.lane.b32.xlu1 %v1379_v46, %s1701_s23 }
0x12e6   :  { %v1382_v48 = vrot.slane %v1380_v31, 3  ;;  %592 = vst.msk [vmem:[#allocation6 + $0x2] sm:$0x1] %vm289_vm11, %v589_v47 }
0x12e8   :  { %v1385_v45 = vsel %vm281_vm15, %v1380_v31, %v1382_v48 }
0x12e9   :  { %1387 = vrot.lane.b32.xlu2 %v1385_v45, %s1700_s3  ;;  %v441_v50 = vpop.permute.xlu1 %440 }
0x12ea   :  { %444 = vst.msk [vmem:[#allocation6 + $0x1] sm:$0x1] %vm289_vm11, %v441_v50 }
0x12ed   :  { %v811_v51 = vpop.permute.xlu0 %810 }
0x12ee   :  { %814 = vst.msk [vmem:[#allocation6 + $0x4] sm:$0x1] %vm369_vm1, %v811_v51 }
0x12f1   :  { %v663_v52 = vpop.permute.xlu1 %662 }
0x12f2   :  { %666 = vst.msk [vmem:[#allocation6 + $0x5] sm:$0x1] %vm369_vm1, %v663_v52 }
0x12f5   :  { %v1028_v55 = vpop.permute.xlu0 %1027 }
0x12f6   :  { %1030 = vst.msk [vmem:[#allocation6 + $0x5] sm:$0x1] %vm289_vm11, %v1028_v55 }
0x12f9   :  { %v884_v56 = vpop.permute.xlu1 %883 }
0x12fa   :  { %886 = vst.msk [vmem:[#allocation6 + $0x4] sm:$0x1] %vm289_vm11, %v884_v56 }
0x12fd   :  { %v1244_v38 = vpop.permute.xlu0 %1243 }
0x12fe   :  { %1246 = vst.msk [vmem:[#allocation6 + $0x1] sm:$0x1] %vm369_vm1, %v1244_v38 }
0x1301   :  { %v1100_v59 = vpop.permute.xlu1 %1099 }
0x1302   :  { %1102 = vst.msk [vmem:[#allocation6 + $0x2] sm:$0x1] %vm369_vm1, %v1100_v59 }
0x1343   :  { %v1388_v60 = vpop.permute.xlu2 %1387 }
0x1344   :  { %1390 = vst.msk [vmem:[#allocation6] sm:$0x1] %vm369_vm1, %v1388_v60 }
0x134a   :  { %v1393_v63 = vpop.permute.xlu0 %1392 }
0x134b   :  { %1396 = vst.msk [vmem:[%s2139_s5] sm:$0x3] %vm1395_vm2, %v1393_v63 }
0x134f   :  { %v1316_v0 = vpop.permute.xlu1 %1315 }
0x1350   :  { %1318 = vst.msk [vmem:[#allocation6 + $0x7] sm:$0x1] %vm289_vm11, %v1316_v0 }
0x1351   :  { %1415 = dma.vmem_to_hbm [thread:$0]  %s1408_s1, 128, %s1410_s27, [#allocation5], %s1703_s30, %s1703_s30, %s1704_s6  }
0x1357   :  { %v1399_v1 = vpop.permute.xlu1 %1398 }
0x1358   :  { %1526 = vst.msk [vmem:[%s2139_s5 + $0x2] sm:$0x3] %vm1395_vm2, %v1399_v1 }
0x1359   :  { %1694 = dma.done.wait [#allocation5], 128  }
0x135a   :  { %1695 = vsyncadd [#allocation5], 4294967168 }
0x135b   :  { %1424 = vsyncpa [#allocation4], 1 }
0x135c   :  { %1425 = vsyncpa [#allocation5], 1 }

// kernel: rnn_forward.2
= control target key start
LH: loop header
LB: loop body
LE: loop exit
PB: predicated region body
PF: predicated region fallthrough
CT: control target
= control target key end

     0   :  { %11 = vsyncpa [#allocation4], 0  ;;  %s2155_s0 = inlined_call_operand.vmem [shape: bf16[8,2,16], index: 0, kind: input, shape index: {}]   ;;  %s2156_s1 = inlined_call_operand.hbm [shape: bf16[16,256], index: 1, kind: input, shape index: {}]   ;;  %s2157_s2 = inlined_call_operand.hbm [shape: bf16[2,32,128], index: 2, kind: input, shape index: {}]   ;;  %s2158_s3 = inlined_call_operand.hbm [shape: f32[1,256], index: 3, kind: input, shape index: {}]   ;;  %s2159_s4 = inlined_call_operand.vmem [shape: bf16[8,2,64], index: 4, kind: output, shape index: {0}]   ;;  %s2160_s5 = inlined_call_operand.vmem [shape: f32[2,2,32], index: 5, kind: output, shape index: {1}]  }
   0x1   :  { %12 = vsyncpa [#allocation6], 0  ;;  %s32_s20 = sshll.u32 %s2157_s2, 4  ;;  %s1679_s21 = smov [#allocation5]   ;;  %s33_s20 = int_to_ptr.hbm [resolvable:$true] %s32_s20 }
   0x2   :  { %s34_s22 = sshll.u32 %s1679_s21, 4  ;;  %s19_s25 = sshll.u32 %s2156_s1, 4  ;;  %s35_s22 = int_to_ptr.vmem [resolvable:$true] %s34_s22  ;;  %s20_s25 = int_to_ptr.hbm [resolvable:$true] %s19_s25 }
   0x3   :  { %s1680_s26 = smov 64   ;;  %s1681_s27 = smov 4  }
   0x4   :  { %40 = dma.hbm_to_vmem [thread:$0]  %s33_s20, 512, %s35_s22, [#allocation6], %s1680_s26, %s1680_s26, %s1681_s27  }
   0x5   :  { %s1682_s28 = smov [#allocation3]   ;;  %s1683_s30 = smov 128  }
   0x6   :  { %s21_s29 = sshll.u32 %s1682_s28, 4  ;;  %s1684_s6 = smov 8   ;;  %s22_s29 = int_to_ptr.vmem [resolvable:$true] %s21_s29 }
   0x7   :  { %27 = dma.hbm_to_vmem [thread:$0]  %s20_s25, 256, %s22_s29, [#allocation4], %s1683_s30, %s1683_s30, %s1684_s6  }
   0x8   :  { %s46_s8 = sshll.u32 %s2158_s3, 4  ;;  %s1685_s9 = smov [#allocation7]   ;;  %s47_s8 = int_to_ptr.hbm [resolvable:$true] %s46_s8 }
   0x9   :  { %s48_s10 = sshll.u32 %s1685_s9, 4  ;;  %s49_s10 = int_to_ptr.vmem [resolvable:$true] %s48_s10 }
   0xa   :  { %51 = dma.hbm_to_vmem [thread:$0]  %s47_s8, 32, %s49_s10, [#allocation6]  }
   0xb   :  { %1675 = dma.done.wait [#allocation4], 256  }
   0xc   :  { %1676 = vsyncadd [#allocation4], 4294967040 }
   0xd   :  { %1677 = dma.done.wait [#allocation6], 544  }
   0xe   :  { %1678 = vsyncadd [#allocation6], 4294966752  ;;  %v1729_v0 = vld [vmem:[#allocation5 + $0x8] sm:$0xff]  ;;  %v1407_v1 = vld [vmem:[#allocation3] sm:$0xf]  ;;  %v1686_v18 = vmov 0   ;;  %v195_v61 = vlaneseq }
   0xf   :  { %v1493_v2 = vld [vmem:[#allocation3 + $0x4] sm:$0xf0]  ;;  %v1492_v4 = vld [vmem:[#allocation3 + $0x4] sm:$0xf]  ;;  %v1409_v5 = vld [vmem:[#allocation3 + $0x8] sm:$0xf0]  ;;  %223 = vmatpush.bf16.msra.mxu2 %v1729_v0 }
  0x10   :  { %v1408_v3 = vor.u32 %v1493_v2, %v1407_v1  ;;  %v1412_v6 = vor.u32 %v1492_v4, %v1409_v5  ;;  %v1732_v7 = vld [vmem:[#allocation5] sm:$0xff]  ;;  %v65_v8 = vld [vmem:[%s2155_s0] sm:$0x1]  ;;  %v66_v9 = vld [vmem:[%s2155_s0 + $0x1] sm:$0x1]  ;;  %vm115_vm0 = vcmask 130048  }
  0x11   :  { %v67_v10 = vld [vmem:[%s2155_s0 + $0x2] sm:$0x1]  ;;  %v68_v11 = vld [vmem:[%s2155_s0 + $0x3] sm:$0x1]  ;;  %82 = vst [vmem:[#allocation1] ss:$9 sm:$0xff] %v65_v8 }
  0x12   :  { %125 = vmatpush.bf16.msra.mxu0 %v1408_v3  ;;  %139 = vmatpush.bf16.msra.mxu1 %v1412_v6  ;;  %v69_v12 = vld [vmem:[%s2155_s0 + $0x4] sm:$0x1]  ;;  %85 = vst [vmem:[#allocation1 + $0x1] ss:$9 sm:$0xff] %v66_v9  ;;  %v1750_v13 = vld [vmem:[#allocation5 + $0x18] sm:$0xff]  ;;  %v1760_v16 = vld [vmem:[#allocation5 + $0x10] sm:$0xff] }
  0x13   :  { %224 = vmatpush.bf16.msra.mxu2 %v1732_v7  ;;  %v70_v14 = vld [vmem:[%s2155_s0 + $0x5] sm:$0x1]  ;;  %88 = vst [vmem:[#allocation1 + $0x2] ss:$9 sm:$0xff] %v67_v10  ;;  %v71_v15 = vld [vmem:[%s2155_s0 + $0x6] sm:$0x1]  ;;  %303 = vmatpush.bf16.msra.mxu3 %v1750_v13 }
  0x14   :  { %91 = vst [vmem:[#allocation1 + $0x3] ss:$9 sm:$0xff] %v68_v11  ;;  %v72_v17 = vld [vmem:[%s2155_s0 + $0x7] sm:$0x1]  ;;  %v75_v20 = vld [vmem:[#allocation7] sm:$0x3] }
  0x15   :  { %94 = vst [vmem:[#allocation1 + $0x4] ss:$9 sm:$0xff] %v69_v12  ;;  %v77_v22 = vperm.slane %v75_v20, 0  ;;  %v78_v23 = vperm.slane %v75_v20, 1  ;;  %vm152_vm1 = vcmask 1041408   ;;  %vm154_vm2 = vcmask 1043458  }
  0x16   :  { %378 = vmatpush.bf16.msrb.mxu0 %v1729_v0  ;;  %452 = vmatpush.bf16.msrb.mxu1 %v1750_v13  ;;  %97 = vst [vmem:[#allocation1 + $0x5] ss:$9 sm:$0xff] %v70_v14  ;;  %vm157_vm3 = vcmask 1045508   ;;  %vm160_vm4 = vcmask 1045504   ;;  %v196_v3 = vand.u32 127, %v195_v61  ;;  %s1687_s0 = smov 32  }
  0x17   :  { %526 = vmatpush.bf16.msrb.mxu2 %v1729_v0  ;;  %100 = vst [vmem:[#allocation1 + $0x6] ss:$9 sm:$0xff] %v71_v15  ;;  %304 = vmatpush.bf16.msra.mxu3 %v1760_v16 }
  0x18   :  { %225 = vmatmul.bf16.vlgmr.msra.gmra.mxu2 %v1686_v18  ;;  %103 = vst [vmem:[#allocation1 + $0x7] ss:$9 sm:$0xff] %v72_v17  ;;  %vm197_vm8 = vcmp.ge.s32.totalorder %v196_v3, 64  ;;  %vm198_vm9 = vcmp.lt.s32.totalorder %v196_v3, 96 }
  0x19   :  { %vm1789_vm11 = vmand %vm197_vm8, %vm198_vm9 }
  0x1a   :  { %379 = vmatpush.bf16.msrb.mxu0 %v1732_v7  ;;  %453 = vmatpush.bf16.msrb.mxu1 %v1760_v16 }
  0x1b   :  { %527 = vmatpush.bf16.msrb.mxu2 %v1732_v7  ;;  %600 = vmatpush.bf16.msrb.mxu3 %v1750_v13 }
  0x1c   :  { %305 = vmatmul.bf16.vlgmr.msra.gmra.mxu3 %v1686_v18 }
  0x1f   :  { %821 = vmatpush.bf16.msra.mxu2 %v1729_v0  ;;  %601 = vmatpush.bf16.msrb.mxu3 %v1760_v16  ;;  %v104_v19 = vld [vmem:[#allocation1] sm:$0xff] }
  0x20   :  { %1413 = vmatmul.msk.bf16.vlgmr.msra.gmra.mxu0 %vm115_vm0, %v104_v19  ;;  %1414 = vmatmul.msk.bf16.vlgmr.msra.gmra.mxu1 %vm115_vm0, %v104_v19  ;;  %vm213_vm0 = vcmask 261120  }
  0x21   :  { %674 = vmatpush.bf16.msra.mxu0 %v1729_v0  ;;  %748 = vmatpush.bf16.msra.mxu1 %v1750_v13 }
  0x23   :  { %822 = vmatpush.bf16.msra.mxu2 %v1732_v7  ;;  %893 = vmatpush.bf16.msra.mxu3 %v1750_v13 }
  0x25   :  { %675 = vmatpush.bf16.msra.mxu0 %v1732_v7  ;;  %749 = vmatpush.bf16.msra.mxu1 %v1760_v16 }
  0x27   :  { %894 = vmatpush.bf16.msra.mxu3 %v1760_v16 }
  0x9b   :  { %v226_v21 = vpop.f32.mrf.mxu2 }
  0x9d   :  { %v127_v24 = vpop.f32.mrf.mxu0  ;;  %v141_v25 = vpop.f32.mrf.mxu1 }
  0x9e   :  { %v128_v26 = vadd.f32 %v127_v24, %v77_v22  ;;  %v142_v27 = vadd.f32 %v141_v25, %v78_v23 }
  0x9f   :  { %v306_v28 = vpop.f32.mrf.mxu3 }
  0xa0   :  { %v150_v29 = vrot.slane %v142_v27, 6 }
  0xa2   :  { %v153_v31 = vsel %vm152_vm1, %v128_v26, %v150_v29  ;;  %v155_v32 = vsel %vm154_vm2, %v128_v26, %v150_v29  ;;  %v158_v33 = vsel %vm157_vm3, %v128_v26, %v150_v29  ;;  %v161_v34 = vsel %vm160_vm4, %v150_v29, %v128_v26 }
  0xa3   :  { %v228_v30 = vpop.f32.mrf.mxu2  ;;  %v156_v35 = vrot.slane %v155_v32, 2  ;;  %v159_v36 = vrot.slane %v158_v33, 4  ;;  %v162_v37 = vrot.slane %v161_v34, 6  ;;  %178 = vst [vmem:[#allocation2] sm:$0xf] %v153_v31 }
  0xa5   :  { %179 = vst [vmem:[#allocation2 + $0x4] sm:$0xf] %v156_v35  ;;  %v129_v38 = vpop.f32.mrf.mxu0  ;;  %v143_v39 = vpop.f32.mrf.mxu1 }
  0xa6   :  { %180 = vst [vmem:[#allocation2 + $0x8] sm:$0xf] %v159_v36  ;;  %v144_v40 = vadd.f32 %v143_v39, %v78_v23  ;;  %v130_v42 = vadd.f32 %v129_v38, %v77_v22 }
  0xa7   :  { %v308_v41 = vpop.f32.mrf.mxu3  ;;  %181 = vst [vmem:[#allocation2 + $0xc] sm:$0xf] %v162_v37 }
  0xa8   :  { %v151_v43 = vrot.slane %v144_v40, 6 }
  0xaa   :  { %v200_v44 = vld [vmem:[#allocation2] sm:$0x3]  ;;  %v163_v45 = vsel %vm152_vm1, %v130_v42, %v151_v43  ;;  %v164_v46 = vsel %vm154_vm2, %v130_v42, %v151_v43  ;;  %v166_v47 = vsel %vm157_vm3, %v130_v42, %v151_v43  ;;  %v168_v48 = vsel %vm160_vm4, %v151_v43, %v130_v42 }
  0xab   :  { %v230_v49 = vadd.f32 %v226_v21, %v200_v44  ;;  %v165_v50 = vrot.slane %v164_v46, 2  ;;  %v167_v51 = vrot.slane %v166_v47, 4  ;;  %v169_v52 = vrot.slane %v168_v48, 6  ;;  %182 = vst [vmem:[#allocation2 + $0x10] sm:$0xf] %v163_v45 }
  0xad   :  { %v1423_v53 = vmul.f32 -1.442695, %v230_v49  ;;  %183 = vst [vmem:[#allocation2 + $0x14] sm:$0xf] %v165_v50 }
  0xae   :  { %184 = vst [vmem:[#allocation2 + $0x18] sm:$0xf] %v167_v51 }
  0xaf   :  { %1507 = vpow2.f32 %v1423_v53  ;;  %185 = vst [vmem:[#allocation2 + $0x1c] sm:$0xf] %v169_v52 }
  0xb5   :  { %v1508_v54 = vpop.eup %1507  ;;  %v438_v61 = vld [vmem:[#allocation2 + $0x1a] sm:$0x3] }
  0xb6   :  { %v234_v55 = vadd.f32 1.0, %v1508_v54  ;;  %v284_v56 = vld [vmem:[#allocation2 + $0x1e] sm:$0x3]  ;;  %v364_v54 = vld [vmem:[#allocation2 + $0x4] sm:$0x3] }
  0xb7   :  { %v310_v57 = vadd.f32 %v306_v28, %v284_v56 }
  0xb8   :  { %1509 = vrcp.f32 %v234_v55  ;;  %v246_v2 = vand.u32 2147483648, %v234_v55  ;;  %v244_v5 = vand.u32 2147483647, %v234_v55  ;;  %vm240_vm6 = vweird.f32 %v234_v55 }
  0xb9   :  { %v1433_v58 = vmul.f32 -1.442695, %v310_v57 }
  0xba   :  { %v247_v8 = vor.u32 1.1754944e-38, %v246_v2  ;;  %vm245_vm10 = vcmp.eq.f32.partialorder %v244_v5, 8.507059e+37 }
  0xbb   :  { %1511 = vpow2.f32 %v1433_v58 }
  0xbe   :  { %v1510_v59 = vpop.eup %1509 }
  0xbf   :  { %v236_v60 = vmul.f32 %v1510_v59, %v234_v55  ;;  %vm241_vm5 = vweird.f32 %v1510_v59 }
  0xc0   :  { %vm242_vm7 = vmor %vm240_vm6, %vm241_vm5 }
  0xc1   :  { %v1512_v62 = vpop.eup %1511  ;;  %v237_v63 = vsub.f32 1.0, %v236_v60 }
  0xc2   :  { %v314_v1 = vadd.f32 1.0, %v1512_v62 }
  0xc3   :  { %v238_v4 = vmul.f32 %v1510_v59, %v237_v63 }
  0xc4   :  { %1513 = vrcp.f32 %v314_v1  ;;  %v326_v20 = vand.u32 2147483648, %v314_v1  ;;  %v324_v22 = vand.u32 2147483647, %v314_v1  ;;  %vm320_vm13 = vweird.f32 %v314_v1 }
  0xc5   :  { %v239_v6 = vadd.f32 %v1510_v59, %v238_v4 }
  0xc6   :  { %v327_v24 = vor.u32 1.1754944e-38, %v326_v20  ;;  %vm325_vm15 = vcmp.eq.f32.partialorder %v324_v22, 8.507059e+37 }
  0xc7   :  { %v243_v9 = vsel %vm242_vm7, %v1510_v59, %v239_v6 }
  0xc8   :  { %v248_v10 = vsel %vm245_vm10, %v247_v8, %v243_v9 }
  0xc9   :  { %v250_v11 = vmul.f32 2.0, %v248_v10 }
  0xca   :  { %v1514_v12 = vpop.eup %1513 }
  0xcb   :  { %v316_v15 = vmul.f32 %v1514_v12, %v314_v1  ;;  %v1424_v17 = vadd.f32 -1.0, %v250_v11  ;;  %vm321_vm12 = vweird.f32 %v1514_v12 }
  0xcc   :  { %vm322_vm14 = vmor %vm320_vm13, %vm321_vm12 }
  0xcd   :  { %v317_v18 = vsub.f32 1.0, %v316_v15  ;;  %v252_v19 = vsel %vm1789_vm11, %v1424_v17, %v248_v10 }
  0xce   :  { %255 = vrot.lane.b32.xlu0 %v252_v19, %s1680_s26  ;;  %v253_v34 = vmul.f32 0.0, %v252_v19 }
  0xcf   :  { %v318_v21 = vmul.f32 %v1514_v12, %v317_v18 }
  0xd1   :  { %v319_v23 = vadd.f32 %v1514_v12, %v318_v21 }
  0xd3   :  { %v323_v25 = vsel %vm322_vm14, %v1514_v12, %v319_v23 }
  0xd4   :  { %v328_v26 = vsel %vm325_vm15, %v327_v24, %v323_v25 }
  0xd5   :  { %v330_v27 = vmul.f32 2.0, %v328_v26 }
  0xd7   :  { %v1434_v28 = vadd.f32 -1.0, %v330_v27 }
  0xd9   :  { %v332_v29 = vsel %vm1789_vm11, %v1434_v28, %v328_v26 }
  0xda   :  { %335 = vrot.lane.b32.xlu0 %v332_v29, %s1680_s26  ;;  %v333_v38 = vmul.f32 0.0, %v332_v29 }
 0x140   :  { %v256_v30 = vpop.permute.xlu0 %255 }
 0x141   :  { %v258_v31 = vmul.f32 %v256_v30, %v252_v19 }
 0x143   :  { %260 = vrot.lane.b32.xlu1 %v258_v31, %s1687_s0 }
 0x14c   :  { %v336_v32 = vpop.permute.xlu0 %335 }
 0x14d   :  { %v338_v33 = vmul.f32 %v336_v32, %v332_v29 }
 0x14f   :  { %340 = vrot.lane.b32.xlu1 %v338_v33, %s1687_s0 }
 0x1b5   :  { %v261_v35 = vpop.permute.xlu1 %260 }
 0x1b6   :  { %v1801_v36 = vadd.f32 %v261_v35, %v253_v34 }
 0x1b8   :  { %1515 = vtanh.f32 %v1801_v36 }
 0x1be   :  { %v1516_v37 = vpop.eup %1515 }
 0x1bf   :  { %266 = vrot.lane.b32.xlu2 %v1516_v37, %s1680_s26 }
 0x1c1   :  { %v341_v39 = vpop.permute.xlu1 %340 }
 0x1c2   :  { %v1805_v40 = vadd.f32 %v341_v39, %v333_v38 }
 0x1c4   :  { %1517 = vtanh.f32 %v1805_v40 }
 0x1ca   :  { %v1518_v41 = vpop.eup %1517 }
 0x1cb   :  { %346 = vrot.lane.b32.xlu2 %v1518_v41, %s1680_s26 }
 0x219   :  { %v267_v42 = vpop.permute.xlu2 %266 }
 0x21a   :  { %v269_v43 = vmul.f32 %v267_v42, %v252_v19 }
 0x21c   :  { %v1809_v44 = vpack.c.bf16 %v269_v43, %v269_v43 }
 0x21e   :  { %v365_v45 = vunpack.c.l.b16 %v1809_v44 }
 0x220   :  { %v366_v46 = vpack.c.b16 %v365_v45, %v365_v45 }
 0x222   :  { %367 = vrot.lane.b32.xlu0 %v366_v46, %s1687_s0 }
 0x225   :  { %v347_v47 = vpop.permute.xlu2 %346 }
 0x226   :  { %v349_v48 = vmul.f32 %v347_v47, %v332_v29 }
 0x228   :  { %v1813_v49 = vpack.c.bf16 %v349_v48, %v349_v48 }
 0x22a   :  { %v439_v50 = vunpack.c.l.b16 %v1813_v49 }
 0x22c   :  { %v440_v51 = vpack.c.b16 %v439_v50, %v439_v50 }
 0x22e   :  { %441 = vrot.lane.b32.xlu1 %v440_v51, %s1687_s0 }
 0x294   :  { %v368_v52 = vpop.permute.xlu0 %367 }
 0x295   :  { %1436 = vmatmul.msk.bf16.vlgmr.msrb.gmra.mxu0 %vm213_vm0, %v368_v52 }
 0x296   :  { %965 = vmatpush.bf16.msrb.mxu0 %v1729_v0 }
 0x29a   :  { %966 = vmatpush.bf16.msrb.mxu0 %v1732_v7 }
 0x2a0   :  { %v442_v53 = vpop.permute.xlu1 %441 }
 0x2a1   :  { %1440 = vmatmul.msk.bf16.vlgmr.msrb.gmra.mxu1 %vm213_vm0, %v442_v53 }
 0x2a2   :  { %1037 = vmatpush.bf16.msrb.mxu1 %v1750_v13 }
 0x2a6   :  { %1038 = vmatpush.bf16.msrb.mxu1 %v1760_v16 }
 0x312   :  { %v381_v55 = vpop.f32.mrf.mxu0 }
 0x313   :  { %v385_v56 = vadd.f32 %v381_v55, %v364_v54 }
 0x315   :  { %v1437_v57 = vmul.f32 -1.442695, %v385_v56 }
 0x317   :  { %1519 = vpow2.f32 %v1437_v57 }
 0x31a   :  { %v383_v58 = vpop.f32.mrf.mxu0 }
 0x31d   :  { %v1520_v59 = vpop.eup %1519 }
 0x31e   :  { %v389_v60 = vadd.f32 1.0, %v1520_v59  ;;  %v455_v62 = vpop.f32.mrf.mxu1 }
 0x31f   :  { %v459_v63 = vadd.f32 %v455_v62, %v438_v61  ;;  %v512_v61 = vld [vmem:[#allocation2 + $0x8] sm:$0x3] }
 0x320   :  { %1521 = vrcp.f32 %v389_v60  ;;  %v401_v9 = vand.u32 2147483648, %v389_v60  ;;  %v399_v11 = vand.u32 2147483647, %v389_v60  ;;  %vm395_vm2 = vweird.f32 %v389_v60 }
 0x321   :  { %v1441_v1 = vmul.f32 -1.442695, %v459_v63 }
 0x322   :  { %v402_v15 = vor.u32 1.1754944e-38, %v401_v9  ;;  %vm400_vm4 = vcmp.eq.f32.partialorder %v399_v11, 8.507059e+37 }
 0x323   :  { %1523 = vpow2.f32 %v1441_v1 }
 0x326   :  { %v1522_v2 = vpop.eup %1521  ;;  %v457_v3 = vpop.f32.mrf.mxu1 }
 0x327   :  { %v391_v4 = vmul.f32 %v1522_v2, %v389_v60  ;;  %vm396_vm1 = vweird.f32 %v1522_v2 }
 0x328   :  { %vm397_vm3 = vmor %vm395_vm2, %vm396_vm1 }
 0x329   :  { %v1524_v5 = vpop.eup %1523  ;;  %v392_v6 = vsub.f32 1.0, %v391_v4 }
 0x32a   :  { %v463_v8 = vadd.f32 1.0, %v1524_v5 }
 0x32b   :  { %v393_v10 = vmul.f32 %v1522_v2, %v392_v6 }
 0x32c   :  { %1525 = vrcp.f32 %v463_v8  ;;  %v475_v25 = vand.u32 2147483648, %v463_v8  ;;  %v473_v27 = vand.u32 2147483647, %v463_v8  ;;  %vm469_vm6 = vweird.f32 %v463_v8 }
 0x32d   :  { %v394_v12 = vadd.f32 %v1522_v2, %v393_v10 }
 0x32e   :  { %v476_v29 = vor.u32 1.1754944e-38, %v475_v25  ;;  %vm474_vm8 = vcmp.eq.f32.partialorder %v473_v27, 8.507059e+37 }
 0x32f   :  { %v398_v17 = vsel %vm397_vm3, %v1522_v2, %v394_v12 }
 0x330   :  { %v403_v18 = vsel %vm400_vm4, %v402_v15, %v398_v17 }
 0x331   :  { %v405_v19 = vmul.f32 2.0, %v403_v18 }
 0x332   :  { %v1526_v20 = vpop.eup %1525 }
 0x333   :  { %v465_v21 = vmul.f32 %v1526_v20, %v463_v8  ;;  %v1438_v22 = vadd.f32 -1.0, %v405_v19  ;;  %vm470_vm5 = vweird.f32 %v1526_v20 }
 0x334   :  { %vm471_vm7 = vmor %vm469_vm6, %vm470_vm5 }
 0x335   :  { %v466_v23 = vsub.f32 1.0, %v465_v21  ;;  %v407_v24 = vsel %vm1789_vm11, %v1438_v22, %v403_v18  ;;  %v586_v22 = vld [vmem:[#allocation2 + $0x16] sm:$0x3] }
 0x336   :  { %410 = vrot.lane.b32.xlu2 %v407_v24, %s1680_s26  ;;  %v408_v41 = vmul.f32 %v407_v24, %v1801_v36 }
 0x337   :  { %v467_v26 = vmul.f32 %v1526_v20, %v466_v23 }
 0x339   :  { %v468_v28 = vadd.f32 %v1526_v20, %v467_v26 }
 0x33b   :  { %v472_v30 = vsel %vm471_vm7, %v1526_v20, %v468_v28 }
 0x33c   :  { %v477_v31 = vsel %vm474_vm8, %v476_v29, %v472_v30 }
 0x33d   :  { %v479_v32 = vmul.f32 2.0, %v477_v31 }
 0x33f   :  { %v1442_v33 = vadd.f32 -1.0, %v479_v32 }
 0x341   :  { %v481_v34 = vsel %vm1789_vm11, %v1442_v33, %v477_v31 }
 0x342   :  { %484 = vrot.lane.b32.xlu0 %v481_v34, %s1680_s26  ;;  %v482_v46 = vmul.f32 %v481_v34, %v1805_v40 }
 0x390   :  { %v411_v35 = vpop.permute.xlu2 %410 }
 0x391   :  { %v413_v37 = vmul.f32 %v411_v35, %v407_v24 }
 0x393   :  { %415 = vrot.lane.b32.xlu1 %v413_v37, %s1687_s0 }
 0x3b4   :  { %v485_v38 = vpop.permute.xlu0 %484 }
 0x3b5   :  { %v487_v39 = vmul.f32 %v485_v38, %v481_v34 }
 0x3b7   :  { %489 = vrot.lane.b32.xlu2 %v487_v39, %s1687_s0 }
 0x405   :  { %v416_v42 = vpop.permute.xlu1 %415 }
 0x406   :  { %v1832_v43 = vadd.f32 %v416_v42, %v408_v41 }
 0x408   :  { %1527 = vtanh.f32 %v1832_v43 }
 0x40e   :  { %v1528_v45 = vpop.eup %1527 }
 0x40f   :  { %421 = vrot.lane.b32.xlu0 %v1528_v45, %s1680_s26 }
 0x411   :  { %v490_v47 = vpop.permute.xlu2 %489 }
 0x412   :  { %v1837_v48 = vadd.f32 %v490_v47, %v482_v46 }
 0x414   :  { %1529 = vtanh.f32 %v1837_v48 }
 0x41a   :  { %v1530_v50 = vpop.eup %1529 }
 0x41b   :  { %495 = vrot.lane.b32.xlu1 %v1530_v50, %s1680_s26 }
 0x481   :  { %v422_v51 = vpop.permute.xlu0 %421 }
 0x482   :  { %v424_v36 = vmul.f32 %v422_v51, %v407_v24 }
 0x484   :  { %v1841_v52 = vpack.c.bf16 %v424_v36, %v424_v36 }
 0x486   :  { %v513_v53 = vunpack.c.l.b16 %v1841_v52 }
 0x488   :  { %v514_v54 = vpack.c.b16 %v513_v53, %v513_v53 }
 0x48a   :  { %515 = vrot.lane.b32.xlu2 %v514_v54, %s1687_s0 }
 0x48d   :  { %v496_v55 = vpop.permute.xlu1 %495 }
 0x48e   :  { %v498_v56 = vmul.f32 %v496_v55, %v481_v34 }
 0x490   :  { %v1845_v40 = vpack.c.bf16 %v498_v56, %v498_v56 }
 0x492   :  { %v587_v57 = vunpack.c.l.b16 %v1845_v40 }
 0x494   :  { %v588_v58 = vpack.c.b16 %v587_v57, %v587_v57 }
 0x496   :  { %589 = vrot.lane.b32.xlu0 %v588_v58, %s1687_s0 }
 0x4e4   :  { %v516_v59 = vpop.permute.xlu2 %515 }
 0x4e5   :  { %1444 = vmatmul.msk.bf16.vlgmr.msrb.gmra.mxu2 %vm213_vm0, %v516_v59 }
 0x4e6   :  { %1109 = vmatpush.bf16.msrb.mxu2 %v1729_v0 }
 0x4ea   :  { %1110 = vmatpush.bf16.msrb.mxu2 %v1732_v7 }
 0x508   :  { %v590_v60 = vpop.permute.xlu0 %589 }
 0x509   :  { %1448 = vmatmul.msk.bf16.vlgmr.msrb.gmra.mxu3 %vm213_vm0, %v590_v60 }
 0x50a   :  { %1181 = vmatpush.bf16.msrb.mxu3 %v1750_v13 }
 0x50e   :  { %1182 = vmatpush.bf16.msrb.mxu3 %v1760_v16 }
 0x568   :  { %v529_v62 = vpop.f32.mrf.mxu2 }
 0x569   :  { %v533_v63 = vadd.f32 %v529_v62, %v512_v61 }
 0x56b   :  { %v1445_v1 = vmul.f32 -1.442695, %v533_v63 }
 0x56d   :  { %1531 = vpow2.f32 %v1445_v1 }
 0x570   :  { %v531_v2 = vpop.f32.mrf.mxu2 }
 0x573   :  { %v1532_v3 = vpop.eup %1531 }
 0x574   :  { %v537_v4 = vadd.f32 1.0, %v1532_v3 }
 0x576   :  { %1533 = vrcp.f32 %v537_v4  ;;  %v549_v9 = vand.u32 2147483648, %v537_v4  ;;  %v547_v11 = vand.u32 2147483647, %v537_v4  ;;  %vm543_vm10 = vweird.f32 %v537_v4 }
 0x578   :  { %v550_v15 = vor.u32 1.1754944e-38, %v549_v9  ;;  %vm548_vm13 = vcmp.eq.f32.partialorder %v547_v11, 8.507059e+37 }
 0x57c   :  { %v1534_v5 = vpop.eup %1533 }
 0x57d   :  { %v539_v6 = vmul.f32 %v1534_v5, %v537_v4  ;;  %vm544_vm9 = vweird.f32 %v1534_v5 }
 0x57e   :  { %vm545_vm12 = vmor %vm543_vm10, %vm544_vm9 }
 0x57f   :  { %v540_v8 = vsub.f32 1.0, %v539_v6 }
 0x581   :  { %v541_v10 = vmul.f32 %v1534_v5, %v540_v8  ;;  %v660_v8 = vld [vmem:[#allocation2 + $0xc] sm:$0x3] }
 0x583   :  { %v542_v12 = vadd.f32 %v1534_v5, %v541_v10 }
 0x585   :  { %v546_v17 = vsel %vm545_vm12, %v1534_v5, %v542_v12 }
 0x586   :  { %v551_v18 = vsel %vm548_vm13, %v550_v15, %v546_v17 }
 0x587   :  { %v553_v19 = vmul.f32 2.0, %v551_v18 }
 0x589   :  { %v1446_v20 = vadd.f32 -1.0, %v553_v19 }
 0x58b   :  { %v555_v21 = vsel %vm1789_vm11, %v1446_v20, %v551_v18  ;;  %v734_v18 = vld [vmem:[#allocation2 + $0x12] sm:$0x3] }
 0x58c   :  { %v603_v23 = vpop.f32.mrf.mxu3  ;;  %558 = vrot.lane.b32.xlu1 %v555_v21, %s1680_s26  ;;  %v556_v36 = vmul.f32 %v555_v21, %v1832_v43 }
 0x58d   :  { %v607_v24 = vadd.f32 %v603_v23, %v586_v22 }
 0x58f   :  { %v1449_v25 = vmul.f32 -1.442695, %v607_v24 }
 0x591   :  { %1535 = vpow2.f32 %v1449_v25 }
 0x594   :  { %v605_v26 = vpop.f32.mrf.mxu3 }
 0x597   :  { %v1536_v27 = vpop.eup %1535 }
 0x598   :  { %v611_v28 = vadd.f32 1.0, %v1536_v27 }
 0x59a   :  { %1537 = vrcp.f32 %v611_v28  ;;  %v623_v32 = vand.u32 2147483648, %v611_v28  ;;  %v621_v34 = vand.u32 2147483647, %v611_v28  ;;  %vm617_vm15 = vweird.f32 %v611_v28 }
 0x59c   :  { %v624_v37 = vor.u32 1.1754944e-38, %v623_v32  ;;  %vm622_vm2 = vcmp.eq.f32.partialorder %v621_v34, 8.507059e+37 }
 0x5a0   :  { %v1538_v29 = vpop.eup %1537 }
 0x5a1   :  { %v613_v30 = vmul.f32 %v1538_v29, %v611_v28  ;;  %vm618_vm14 = vweird.f32 %v1538_v29 }
 0x5a2   :  { %vm619_vm1 = vmor %vm617_vm15, %vm618_vm14 }
 0x5a3   :  { %v614_v31 = vsub.f32 1.0, %v613_v30 }
 0x5a5   :  { %v615_v33 = vmul.f32 %v1538_v29, %v614_v31 }
 0x5a7   :  { %v616_v35 = vadd.f32 %v1538_v29, %v615_v33 }
 0x5a9   :  { %v620_v38 = vsel %vm619_vm1, %v1538_v29, %v616_v35 }
 0x5aa   :  { %v625_v39 = vsel %vm622_vm2, %v624_v37, %v620_v38 }
 0x5ab   :  { %v627_v41 = vmul.f32 2.0, %v625_v39 }
 0x5ad   :  { %v1450_v42 = vadd.f32 -1.0, %v627_v41 }
 0x5af   :  { %v629_v45 = vsel %vm1789_vm11, %v1450_v42, %v625_v39 }
 0x5b0   :  { %632 = vrot.lane.b32.xlu2 %v629_v45, %s1680_s26  ;;  %v630_v56 = vmul.f32 %v629_v45, %v1837_v48 }
 0x5fe   :  { %v559_v46 = vpop.permute.xlu1 %558 }
 0x5ff   :  { %v561_v47 = vmul.f32 %v559_v46, %v555_v21 }
 0x601   :  { %563 = vrot.lane.b32.xlu0 %v561_v47, %s1687_s0 }
 0x60a   :  { %v633_v50 = vpop.permute.xlu2 %632 }
 0x60b   :  { %v635_v51 = vmul.f32 %v633_v50, %v629_v45 }
 0x60d   :  { %637 = vrot.lane.b32.xlu1 %v635_v51, %s1687_s0 }
 0x673   :  { %v564_v53 = vpop.permute.xlu0 %563 }
 0x674   :  { %v1864_v54 = vadd.f32 %v564_v53, %v556_v36 }
 0x676   :  { %1539 = vtanh.f32 %v1864_v54 }
 0x67c   :  { %v1540_v55 = vpop.eup %1539 }
 0x67d   :  { %569 = vrot.lane.b32.xlu2 %v1540_v55, %s1680_s26 }
 0x67f   :  { %v638_v57 = vpop.permute.xlu1 %637 }
 0x680   :  { %v1869_v58 = vadd.f32 %v638_v57, %v630_v56 }
 0x682   :  { %1541 = vtanh.f32 %v1869_v58 }
 0x688   :  { %v1542_v59 = vpop.eup %1541 }
 0x689   :  { %643 = vrot.lane.b32.xlu0 %v1542_v59, %s1680_s26 }
 0x6d7   :  { %v570_v60 = vpop.permute.xlu2 %569 }
 0x6d8   :  { %v572_v43 = vmul.f32 %v570_v60, %v555_v21 }
 0x6da   :  { %v1873_v61 = vpack.c.bf16 %v572_v43, %v572_v43 }
 0x6dc   :  { %v661_v62 = vunpack.c.l.b16 %v1873_v61 }
 0x6de   :  { %v662_v63 = vpack.c.b16 %v661_v62, %v661_v62 }
 0x6e0   :  { %663 = vrot.lane.b32.xlu1 %v662_v63, %s1687_s0 }
 0x6fb   :  { %v644_v1 = vpop.permute.xlu0 %643 }
 0x6fc   :  { %v646_v2 = vmul.f32 %v644_v1, %v629_v45 }
 0x6fe   :  { %v1877_v48 = vpack.c.bf16 %v646_v2, %v646_v2 }
 0x700   :  { %v735_v3 = vunpack.c.l.b16 %v1877_v48 }
 0x702   :  { %v736_v4 = vpack.c.b16 %v735_v3, %v735_v3 }
 0x704   :  { %737 = vrot.lane.b32.xlu2 %v736_v4, %s1687_s0 }
 0x752   :  { %v664_v5 = vpop.permute.xlu1 %663 }
 0x753   :  { %1452 = vmatmul.msk.bf16.vlgmr.msra.gmra.mxu0 %vm213_vm0, %v664_v5 }
 0x754   :  { %1253 = vmatpush.bf16.msra.mxu0 %v1729_v0 }
 0x758   :  { %1254 = vmatpush.bf16.msra.mxu0 %v1732_v7 }
 0x75e   :  { %v738_v6 = vpop.permute.xlu2 %737 }
 0x75f   :  { %1456 = vmatmul.msk.bf16.vlgmr.msra.gmra.mxu1 %vm213_vm0, %v738_v6 }
 0x760   :  { %1325 = vmatpush.bf16.msra.mxu1 %v1750_v13 }
 0x764   :  { %1326 = vmatpush.bf16.msra.mxu1 %v1760_v16 }
 0x7d0   :  { %v677_v9 = vpop.f32.mrf.mxu0 }
 0x7d1   :  { %v681_v10 = vadd.f32 %v677_v9, %v660_v8 }
 0x7d3   :  { %v1453_v11 = vmul.f32 -1.442695, %v681_v10 }
 0x7d5   :  { %1543 = vpow2.f32 %v1453_v11 }
 0x7d8   :  { %v679_v12 = vpop.f32.mrf.mxu0 }
 0x7db   :  { %v1544_v15 = vpop.eup %1543 }
 0x7dc   :  { %v685_v17 = vadd.f32 1.0, %v1544_v15  ;;  %v751_v19 = vpop.f32.mrf.mxu1 }
 0x7dd   :  { %v755_v0 = vadd.f32 %v751_v19, %v734_v18  ;;  %v807_v18 = vld [vmem:[#allocation2 + $0x10] sm:$0x3] }
 0x7de   :  { %1545 = vrcp.f32 %v685_v17  ;;  %v697_v24 = vand.u32 2147483648, %v685_v17  ;;  %v695_v26 = vand.u32 2147483647, %v685_v17  ;;  %vm691_vm4 = vweird.f32 %v685_v17 }
 0x7df   :  { %v1457_v7 = vmul.f32 -1.442695, %v755_v0 }
 0x7e0   :  { %v698_v28 = vor.u32 1.1754944e-38, %v697_v24  ;;  %vm696_vm6 = vcmp.eq.f32.partialorder %v695_v26, 8.507059e+37 }
 0x7e1   :  { %1547 = vpow2.f32 %v1457_v7 }
 0x7e4   :  { %v1546_v20 = vpop.eup %1545  ;;  %v753_v21 = vpop.f32.mrf.mxu1 }
 0x7e5   :  { %v687_v22 = vmul.f32 %v1546_v20, %v685_v17  ;;  %vm692_vm3 = vweird.f32 %v1546_v20 }
 0x7e6   :  { %vm693_vm5 = vmor %vm691_vm4, %vm692_vm3 }
 0x7e7   :  { %v1548_v13 = vpop.eup %1547  ;;  %v688_v23 = vsub.f32 1.0, %v687_v22 }
 0x7e8   :  { %v759_v16 = vadd.f32 1.0, %v1548_v13  ;;  %v879_v13 = vld [vmem:[#allocation2 + $0xe] sm:$0x3] }
 0x7e9   :  { %v689_v25 = vmul.f32 %v1546_v20, %v688_v23 }
 0x7ea   :  { %1549 = vrcp.f32 %v759_v16  ;;  %v771_v38 = vand.u32 2147483648, %v759_v16  ;;  %v769_v41 = vand.u32 2147483647, %v759_v16  ;;  %vm765_vm8 = vweird.f32 %v759_v16 }
 0x7eb   :  { %v690_v27 = vadd.f32 %v1546_v20, %v689_v25 }
 0x7ec   :  { %v772_v45 = vor.u32 1.1754944e-38, %v771_v38  ;;  %vm770_vm10 = vcmp.eq.f32.partialorder %v769_v41, 8.507059e+37 }
 0x7ed   :  { %v694_v29 = vsel %vm693_vm5, %v1546_v20, %v690_v27 }
 0x7ee   :  { %v699_v30 = vsel %vm696_vm6, %v698_v28, %v694_v29 }
 0x7ef   :  { %v701_v31 = vmul.f32 2.0, %v699_v30 }
 0x7f0   :  { %v1550_v32 = vpop.eup %1549 }
 0x7f1   :  { %v761_v33 = vmul.f32 %v1550_v32, %v759_v16  ;;  %v1454_v34 = vadd.f32 -1.0, %v701_v31  ;;  %vm766_vm7 = vweird.f32 %v1550_v32 }
 0x7f2   :  { %vm767_vm9 = vmor %vm765_vm8, %vm766_vm7 }
 0x7f3   :  { %v762_v35 = vsub.f32 1.0, %v761_v33  ;;  %v703_v37 = vsel %vm1789_vm11, %v1454_v34, %v699_v30 }
 0x7f4   :  { %706 = vrot.lane.b32.xlu0 %v703_v37, %s1680_s26  ;;  %v704_v59 = vmul.f32 %v703_v37, %v1864_v54 }
 0x7f5   :  { %v763_v39 = vmul.f32 %v1550_v32, %v762_v35 }
 0x7f7   :  { %v764_v42 = vadd.f32 %v1550_v32, %v763_v39 }
 0x7f9   :  { %v768_v46 = vsel %vm767_vm9, %v1550_v32, %v764_v42 }
 0x7fa   :  { %v773_v47 = vsel %vm770_vm10, %v772_v45, %v768_v46 }
 0x7fb   :  { %v775_v50 = vmul.f32 2.0, %v773_v47 }
 0x7fd   :  { %v1458_v51 = vadd.f32 -1.0, %v775_v50 }
 0x7ff   :  { %v777_v36 = vsel %vm1789_vm11, %v1458_v51, %v773_v47 }
 0x800   :  { %780 = vrot.lane.b32.xlu1 %v777_v36, %s1680_s26  ;;  %v778_v63 = vmul.f32 %v777_v36, %v1869_v58 }
 0x866   :  { %v707_v53 = vpop.permute.xlu0 %706 }
 0x867   :  { %v709_v55 = vmul.f32 %v707_v53, %v703_v37 }
 0x869   :  { %711 = vrot.lane.b32.xlu2 %v709_v55, %s1687_s0 }
 0x872   :  { %v781_v56 = vpop.permute.xlu1 %780 }
 0x873   :  { %v783_v57 = vmul.f32 %v781_v56, %v777_v36 }
 0x875   :  { %785 = vrot.lane.b32.xlu0 %v783_v57, %s1687_s0 }
 0x8c3   :  { %v712_v60 = vpop.permute.xlu2 %711 }
 0x8c4   :  { %v1896_v43 = vadd.f32 %v712_v60, %v704_v59 }
 0x8c6   :  { %1551 = vtanh.f32 %v1896_v43 }
 0x8cc   :  { %v1552_v62 = vpop.eup %1551 }
 0x8cd   :  { %717 = vrot.lane.b32.xlu1 %v1552_v62, %s1680_s26 }
 0x8e7   :  { %v786_v1 = vpop.permute.xlu0 %785 }
 0x8e8   :  { %v1901_v2 = vadd.f32 %v786_v1, %v778_v63 }
 0x8ea   :  { %1553 = vtanh.f32 %v1901_v2 }
 0x8f0   :  { %v1554_v3 = vpop.eup %1553 }
 0x8f1   :  { %791 = vrot.lane.b32.xlu2 %v1554_v3, %s1680_s26 }
 0x93f   :  { %v718_v4 = vpop.permute.xlu1 %717 }
 0x940   :  { %v720_v54 = vmul.f32 %v718_v4, %v703_v37 }
 0x942   :  { %v1905_v5 = vpack.c.bf16 %v720_v54, %v720_v54 }
 0x944   :  { %v808_v6 = vunpack.c.l.b16 %v1905_v5 }
 0x946   :  { %v809_v8 = vpack.c.b16 %v808_v6, %v808_v6 }
 0x948   :  { %810 = vrot.lane.b32.xlu0 %v809_v8, %s1687_s0 }
 0x94b   :  { %v792_v9 = vpop.permute.xlu2 %791 }
 0x94c   :  { %v794_v10 = vmul.f32 %v792_v9, %v777_v36 }
 0x94e   :  { %v1909_v58 = vpack.c.bf16 %v794_v10, %v794_v10 }
 0x950   :  { %v880_v11 = vunpack.c.l.b16 %v1909_v58 }
 0x952   :  { %v881_v12 = vpack.c.b16 %v880_v11, %v880_v11 }
 0x954   :  { %882 = vrot.lane.b32.xlu1 %v881_v12, %s1687_s0 }
 0x9ba   :  { %v811_v15 = vpop.permute.xlu0 %810 }
 0x9bb   :  { %1460 = vmatmul.msk.bf16.vlgmr.msra.gmra.mxu2 %vm213_vm0, %v811_v15 }
 0x9c6   :  { %v883_v17 = vpop.permute.xlu1 %882 }
 0x9c7   :  { %1464 = vmatmul.msk.bf16.vlgmr.msra.gmra.mxu3 %vm213_vm0, %v883_v17 }
 0xa3e   :  { %v824_v19 = vpop.f32.mrf.mxu2 }
 0xa3f   :  { %v828_v0 = vadd.f32 %v824_v19, %v807_v18 }
 0xa41   :  { %v1461_v7 = vmul.f32 -1.442695, %v828_v0 }
 0xa43   :  { %1555 = vpow2.f32 %v1461_v7 }
 0xa46   :  { %v826_v20 = vpop.f32.mrf.mxu2 }
 0xa49   :  { %v1556_v21 = vpop.eup %1555 }
 0xa4a   :  { %v832_v22 = vadd.f32 1.0, %v1556_v21  ;;  %v896_v23 = vpop.f32.mrf.mxu3 }
 0xa4b   :  { %v900_v16 = vadd.f32 %v896_v23, %v879_v13 }
 0xa4c   :  { %1557 = vrcp.f32 %v832_v22  ;;  %v844_v31 = vand.u32 2147483648, %v832_v22  ;;  %v842_v33 = vand.u32 2147483647, %v832_v22  ;;  %vm838_vm13 = vweird.f32 %v832_v22 }
 0xa4d   :  { %v1465_v24 = vmul.f32 -1.442695, %v900_v16  ;;  %v951_v16 = vld [vmem:[#allocation2 + $0x14] sm:$0x3] }
 0xa4e   :  { %v845_v35 = vor.u32 1.1754944e-38, %v844_v31  ;;  %vm843_vm15 = vcmp.eq.f32.partialorder %v842_v33, 8.507059e+37 }
 0xa4f   :  { %1559 = vpow2.f32 %v1465_v24 }
 0xa52   :  { %v1558_v25 = vpop.eup %1557  ;;  %v898_v26 = vpop.f32.mrf.mxu3 }
 0xa53   :  { %v834_v27 = vmul.f32 %v1558_v25, %v832_v22  ;;  %vm839_vm12 = vweird.f32 %v1558_v25 }
 0xa54   :  { %vm840_vm14 = vmor %vm838_vm13, %vm839_vm12 }
 0xa55   :  { %v1560_v28 = vpop.eup %1559  ;;  %v835_v29 = vsub.f32 1.0, %v834_v27 }
 0xa56   :  { %v904_v30 = vadd.f32 1.0, %v1560_v28 }
 0xa57   :  { %v836_v32 = vmul.f32 %v1558_v25, %v835_v29 }
 0xa58   :  { %1561 = vrcp.f32 %v904_v30  ;;  %v916_v50 = vand.u32 2147483648, %v904_v30  ;;  %v914_v36 = vand.u32 2147483647, %v904_v30  ;;  %vm910_vm2 = vweird.f32 %v904_v30 }
 0xa59   :  { %v837_v34 = vadd.f32 %v1558_v25, %v836_v32 }
 0xa5a   :  { %v917_v55 = vor.u32 1.1754944e-38, %v916_v50  ;;  %vm915_vm4 = vcmp.eq.f32.partialorder %v914_v36, 8.507059e+37 }
 0xa5b   :  { %v841_v37 = vsel %vm840_vm14, %v1558_v25, %v837_v34 }
 0xa5c   :  { %v846_v38 = vsel %vm843_vm15, %v845_v35, %v841_v37 }
 0xa5d   :  { %v848_v39 = vmul.f32 2.0, %v846_v38 }
 0xa5e   :  { %v1562_v41 = vpop.eup %1561 }
 0xa5f   :  { %v906_v42 = vmul.f32 %v1562_v41, %v904_v30  ;;  %v1462_v45 = vadd.f32 -1.0, %v848_v39  ;;  %vm911_vm1 = vweird.f32 %v1562_v41 }
 0xa60   :  { %vm912_vm3 = vmor %vm910_vm2, %vm911_vm1 }
 0xa61   :  { %v907_v46 = vsub.f32 1.0, %v906_v42  ;;  %v850_v47 = vsel %vm1789_vm11, %v1462_v45, %v846_v38 }
 0xa62   :  { %853 = vrot.lane.b32.xlu2 %v850_v47, %s1680_s26  ;;  %v851_v54 = vmul.f32 %v850_v47, %v1896_v43 }
 0xa63   :  { %v908_v51 = vmul.f32 %v1562_v41, %v907_v46 }
 0xa65   :  { %v909_v53 = vadd.f32 %v1562_v41, %v908_v51 }
 0xa67   :  { %v913_v56 = vsel %vm912_vm3, %v1562_v41, %v909_v53 }
 0xa68   :  { %v918_v57 = vsel %vm915_vm4, %v917_v55, %v913_v56 }
 0xa69   :  { %v920_v59 = vmul.f32 2.0, %v918_v57 }
 0xa6b   :  { %v1466_v60 = vadd.f32 -1.0, %v920_v59 }
 0xa6d   :  { %v922_v62 = vsel %vm1789_vm11, %v1466_v60, %v918_v57 }
 0xa6e   :  { %925 = vrot.lane.b32.xlu0 %v922_v62, %s1680_s26  ;;  %v923_v10 = vmul.f32 %v922_v62, %v1901_v2 }
 0xabc   :  { %v854_v63 = vpop.permute.xlu2 %853 }
 0xabd   :  { %v856_v1 = vmul.f32 %v854_v63, %v850_v47 }
 0xabf   :  { %858 = vrot.lane.b32.xlu1 %v856_v1, %s1687_s0 }
 0xae0   :  { %v926_v3 = vpop.permute.xlu0 %925 }
 0xae1   :  { %v928_v4 = vmul.f32 %v926_v3, %v922_v62 }
 0xae3   :  { %930 = vrot.lane.b32.xlu2 %v928_v4, %s1687_s0 }
 0xb31   :  { %v859_v6 = vpop.permute.xlu1 %858 }
 0xb32   :  { %v1924_v8 = vadd.f32 %v859_v6, %v851_v54 }
 0xb34   :  { %1563 = vtanh.f32 %v1924_v8 }
 0xb3a   :  { %v1564_v9 = vpop.eup %1563 }
 0xb3b   :  { %864 = vrot.lane.b32.xlu0 %v1564_v9, %s1680_s26 }
 0xb3d   :  { %v931_v11 = vpop.permute.xlu2 %930 }
 0xb3e   :  { %v1929_v12 = vadd.f32 %v931_v11, %v923_v10 }
 0xb40   :  { %1565 = vtanh.f32 %v1929_v12 }
 0xb46   :  { %v1566_v15 = vpop.eup %1565 }
 0xb47   :  { %936 = vrot.lane.b32.xlu1 %v1566_v15, %s1680_s26 }
 0xbad   :  { %v865_v17 = vpop.permute.xlu0 %864 }
 0xbae   :  { %v867_v43 = vmul.f32 %v865_v17, %v850_v47  ;;  %v1023_v47 = vld [vmem:[#allocation2 + $0xa] sm:$0x3] }
 0xbb0   :  { %v1933_v18 = vpack.c.bf16 %v867_v43, %v867_v43 }
 0xbb2   :  { %v952_v19 = vunpack.c.l.b16 %v1933_v18 }
 0xbb4   :  { %v953_v0 = vpack.c.b16 %v952_v19, %v952_v19 }
 0xbb6   :  { %954 = vrot.lane.b32.xlu2 %v953_v0, %s1687_s0 }
 0xbb9   :  { %v937_v7 = vpop.permute.xlu1 %936 }
 0xbba   :  { %v939_v20 = vmul.f32 %v937_v7, %v922_v62 }
 0xbbc   :  { %v1937_v2 = vpack.c.bf16 %v939_v20, %v939_v20 }
 0xbbe   :  { %v1024_v21 = vunpack.c.l.b16 %v1937_v2 }
 0xbc0   :  { %v1025_v22 = vpack.c.b16 %v1024_v21, %v1024_v21 }
 0xbc2   :  { %1026 = vrot.lane.b32.xlu0 %v1025_v22, %s1687_s0 }
 0xc10   :  { %v955_v13 = vpop.permute.xlu2 %954 }
 0xc11   :  { %1468 = vmatmul.msk.bf16.vlgmr.msrb.gmra.mxu0 %vm213_vm0, %v955_v13 }
 0xc34   :  { %v1027_v23 = vpop.permute.xlu0 %1026 }
 0xc35   :  { %1472 = vmatmul.msk.bf16.vlgmr.msrb.gmra.mxu1 %vm213_vm0, %v1027_v23 }
 0xc8e   :  { %v968_v24 = vpop.f32.mrf.mxu0 }
 0xc8f   :  { %v972_v25 = vadd.f32 %v968_v24, %v951_v16 }
 0xc91   :  { %v1469_v26 = vmul.f32 -1.442695, %v972_v25 }
 0xc93   :  { %1567 = vpow2.f32 %v1469_v26 }
 0xc96   :  { %v970_v27 = vpop.f32.mrf.mxu0 }
 0xc99   :  { %v1568_v28 = vpop.eup %1567 }
 0xc9a   :  { %v976_v29 = vadd.f32 1.0, %v1568_v28 }
 0xc9c   :  { %1569 = vrcp.f32 %v976_v29  ;;  %v988_v33 = vand.u32 2147483648, %v976_v29  ;;  %v986_v35 = vand.u32 2147483647, %v976_v29  ;;  %vm982_vm6 = vweird.f32 %v976_v29 }
 0xc9e   :  { %v989_v38 = vor.u32 1.1754944e-38, %v988_v33  ;;  %vm987_vm8 = vcmp.eq.f32.partialorder %v986_v35, 8.507059e+37 }
 0xca2   :  { %v1570_v30 = vpop.eup %1569 }
 0xca3   :  { %v978_v31 = vmul.f32 %v1570_v30, %v976_v29  ;;  %vm983_vm5 = vweird.f32 %v1570_v30 }
 0xca4   :  { %vm984_vm7 = vmor %vm982_vm6, %vm983_vm5 }
 0xca5   :  { %v979_v32 = vsub.f32 1.0, %v978_v31 }
 0xca7   :  { %v980_v34 = vmul.f32 %v1570_v30, %v979_v32 }
 0xca9   :  { %v981_v37 = vadd.f32 %v1570_v30, %v980_v34  ;;  %v1095_v34 = vld [vmem:[#allocation2 + $0x18] sm:$0x3] }
 0xcab   :  { %v985_v39 = vsel %vm984_vm7, %v1570_v30, %v981_v37 }
 0xcac   :  { %v990_v41 = vsel %vm987_vm8, %v989_v38, %v985_v39 }
 0xcad   :  { %v992_v42 = vmul.f32 2.0, %v990_v41 }
 0xcaf   :  { %v1470_v45 = vadd.f32 -1.0, %v992_v42 }
 0xcb1   :  { %v994_v46 = vsel %vm1789_vm11, %v1470_v45, %v990_v41  ;;  %v1167_v45 = vld [vmem:[#allocation2 + $0x6] sm:$0x3] }
 0xcb2   :  { %v1040_v50 = vpop.f32.mrf.mxu1  ;;  %997 = vrot.lane.b32.xlu1 %v994_v46, %s1680_s26  ;;  %v995_v0 = vmul.f32 %v994_v46, %v1924_v8 }
 0xcb3   :  { %v1044_v51 = vadd.f32 %v1040_v50, %v1023_v47 }
 0xcb5   :  { %v1473_v36 = vmul.f32 -1.442695, %v1044_v51 }
 0xcb7   :  { %1571 = vpow2.f32 %v1473_v36 }
 0xcba   :  { %v1042_v53 = vpop.f32.mrf.mxu1 }
 0xcbd   :  { %v1572_v55 = vpop.eup %1571 }
 0xcbe   :  { %v1048_v56 = vadd.f32 1.0, %v1572_v55 }
 0xcc0   :  { %1573 = vrcp.f32 %v1048_v56  ;;  %v1060_v62 = vand.u32 2147483648, %v1048_v56  ;;  %v1058_v1 = vand.u32 2147483647, %v1048_v56  ;;  %vm1054_vm10 = vweird.f32 %v1048_v56 }
 0xcc2   :  { %v1061_v4 = vor.u32 1.1754944e-38, %v1060_v62  ;;  %vm1059_vm13 = vcmp.eq.f32.partialorder %v1058_v1, 8.507059e+37 }
 0xcc6   :  { %v1574_v57 = vpop.eup %1573 }
 0xcc7   :  { %v1050_v59 = vmul.f32 %v1574_v57, %v1048_v56  ;;  %vm1055_vm9 = vweird.f32 %v1574_v57 }
 0xcc8   :  { %vm1056_vm12 = vmor %vm1054_vm10, %vm1055_vm9 }
 0xcc9   :  { %v1051_v60 = vsub.f32 1.0, %v1050_v59 }
 0xccb   :  { %v1052_v63 = vmul.f32 %v1574_v57, %v1051_v60 }
 0xccd   :  { %v1053_v3 = vadd.f32 %v1574_v57, %v1052_v63 }
 0xccf   :  { %v1057_v54 = vsel %vm1056_vm12, %v1574_v57, %v1053_v3 }
 0xcd0   :  { %v1062_v6 = vsel %vm1059_vm13, %v1061_v4, %v1057_v54 }
 0xcd1   :  { %v1064_v9 = vmul.f32 2.0, %v1062_v6 }
 0xcd3   :  { %v1474_v10 = vadd.f32 -1.0, %v1064_v9 }
 0xcd5   :  { %v1066_v11 = vsel %vm1789_vm11, %v1474_v10, %v1062_v6 }
 0xcd6   :  { %1069 = vrot.lane.b32.xlu2 %v1066_v11, %s1680_s26  ;;  %v1067_v22 = vmul.f32 %v1066_v11, %v1929_v12 }
 0xd24   :  { %v998_v15 = vpop.permute.xlu1 %997 }
 0xd25   :  { %v1000_v17 = vmul.f32 %v998_v15, %v994_v46 }
 0xd27   :  { %1002 = vrot.lane.b32.xlu0 %v1000_v17, %s1687_s0 }
 0xd30   :  { %v1070_v43 = vpop.permute.xlu2 %1069 }
 0xd31   :  { %v1072_v19 = vmul.f32 %v1070_v43, %v1066_v11 }
 0xd33   :  { %1074 = vrot.lane.b32.xlu1 %v1072_v19, %s1687_s0 }
 0xd99   :  { %v1003_v7 = vpop.permute.xlu0 %1002 }
 0xd9a   :  { %v1952_v20 = vadd.f32 %v1003_v7, %v995_v0 }
 0xd9c   :  { %1575 = vtanh.f32 %v1952_v20 }
 0xda2   :  { %v1576_v21 = vpop.eup %1575 }
 0xda3   :  { %1008 = vrot.lane.b32.xlu2 %v1576_v21, %s1680_s26 }
 0xda5   :  { %v1075_v13 = vpop.permute.xlu1 %1074 }
 0xda6   :  { %v1957_v23 = vadd.f32 %v1075_v13, %v1067_v22 }
 0xda8   :  { %1577 = vtanh.f32 %v1957_v23 }
 0xdae   :  { %v1578_v16 = vpop.eup %1577 }
 0xdaf   :  { %1080 = vrot.lane.b32.xlu0 %v1578_v16, %s1680_s26 }
 0xdfd   :  { %v1009_v24 = vpop.permute.xlu2 %1008 }
 0xdfe   :  { %v1011_v8 = vmul.f32 %v1009_v24, %v994_v46 }
 0xe00   :  { %v1961_v25 = vpack.c.bf16 %v1011_v8, %v1011_v8 }
 0xe02   :  { %v1096_v26 = vunpack.c.l.b16 %v1961_v25 }
 0xe04   :  { %v1097_v27 = vpack.c.b16 %v1096_v26, %v1096_v26 }
 0xe06   :  { %1098 = vrot.lane.b32.xlu1 %v1097_v27, %s1687_s0 }
 0xe21   :  { %v1081_v28 = vpop.permute.xlu0 %1080 }
 0xe22   :  { %v1083_v29 = vmul.f32 %v1081_v28, %v1066_v11 }
 0xe24   :  { %v1965_v12 = vpack.c.bf16 %v1083_v29, %v1083_v29 }
 0xe26   :  { %v1168_v30 = vunpack.c.l.b16 %v1965_v12 }
 0xe28   :  { %v1169_v31 = vpack.c.b16 %v1168_v30, %v1168_v30 }
 0xe2a   :  { %1170 = vrot.lane.b32.xlu2 %v1169_v31, %s1687_s0 }
 0xe78   :  { %v1099_v32 = vpop.permute.xlu1 %1098 }
 0xe79   :  { %1476 = vmatmul.msk.bf16.vlgmr.msrb.gmra.mxu2 %vm213_vm0, %v1099_v32 }
 0xe84   :  { %v1171_v33 = vpop.permute.xlu2 %1170 }
 0xe85   :  { %1480 = vmatmul.msk.bf16.vlgmr.msrb.gmra.mxu3 %vm213_vm0, %v1171_v33 }
 0xefc   :  { %v1112_v35 = vpop.f32.mrf.mxu2 }
 0xefd   :  { %v1116_v37 = vadd.f32 %v1112_v35, %v1095_v34 }
 0xeff   :  { %v1477_v38 = vmul.f32 -1.442695, %v1116_v37 }
 0xf01   :  { %1579 = vpow2.f32 %v1477_v38 }
 0xf04   :  { %v1114_v39 = vpop.f32.mrf.mxu2 }
 0xf07   :  { %v1580_v41 = vpop.eup %1579 }
 0xf08   :  { %v1120_v42 = vadd.f32 1.0, %v1580_v41  ;;  %v1184_v46 = vpop.f32.mrf.mxu3 }
 0xf09   :  { %v1188_v47 = vadd.f32 %v1184_v46, %v1167_v45 }
 0xf0a   :  { %1581 = vrcp.f32 %v1120_v42  ;;  %v1132_v59 = vand.u32 2147483648, %v1120_v42  ;;  %v1130_v62 = vand.u32 2147483647, %v1120_v42  ;;  %vm1126_vm15 = vweird.f32 %v1120_v42 }
 0xf0b   :  { %v1481_v50 = vmul.f32 -1.442695, %v1188_v47 }
 0xf0c   :  { %v1133_v1 = vor.u32 1.1754944e-38, %v1132_v59  ;;  %vm1131_vm2 = vcmp.eq.f32.partialorder %v1130_v62, 8.507059e+37 }
 0xf0d   :  { %1583 = vpow2.f32 %v1481_v50 }
 0xf10   :  { %v1582_v51 = vpop.eup %1581  ;;  %v1186_v36 = vpop.f32.mrf.mxu3 }
 0xf11   :  { %v1122_v53 = vmul.f32 %v1582_v51, %v1120_v42  ;;  %vm1127_vm14 = vweird.f32 %v1582_v51 }
 0xf12   :  { %vm1128_vm1 = vmor %vm1126_vm15, %vm1127_vm14  ;;  %vm273_vm15 = vcmask 1040384  }
 0xf13   :  { %v1584_v55 = vpop.eup %1583  ;;  %v1123_v56 = vsub.f32 1.0, %v1122_v53  ;;  %v1239_v53 = vld [vmem:[#allocation2 + $0x1c] sm:$0x3] }
 0xf14   :  { %v1192_v57 = vadd.f32 1.0, %v1584_v55 }
 0xf15   :  { %v1124_v60 = vmul.f32 %v1582_v51, %v1123_v56 }
 0xf16   :  { %1585 = vrcp.f32 %v1192_v57  ;;  %v1204_v17 = vand.u32 2147483648, %v1192_v57  ;;  %v1202_v19 = vand.u32 2147483647, %v1192_v57  ;;  %vm1198_vm4 = vweird.f32 %v1192_v57 }
 0xf17   :  { %v1125_v63 = vadd.f32 %v1582_v51, %v1124_v60 }
 0xf18   :  { %v1205_v7 = vor.u32 1.1754944e-38, %v1204_v17  ;;  %vm1203_vm6 = vcmp.eq.f32.partialorder %v1202_v19, 8.507059e+37 }
 0xf19   :  { %v1129_v3 = vsel %vm1128_vm1, %v1582_v51, %v1125_v63  ;;  %v1311_v63 = vld [vmem:[#allocation2 + $0x2] sm:$0x3]  ;;  %vm361_vm1 = vcmask 516352  }
 0xf1a   :  { %v1134_v4 = vsel %vm1131_vm2, %v1133_v1, %v1129_v3  ;;  %vm1387_vm2 = vcmask 254976  }
 0xf1b   :  { %v1136_v54 = vmul.f32 2.0, %v1134_v4 }
 0xf1c   :  { %v1586_v6 = vpop.eup %1585 }
 0xf1d   :  { %v1194_v9 = vmul.f32 %v1586_v6, %v1192_v57  ;;  %v1478_v10 = vadd.f32 -1.0, %v1136_v54  ;;  %vm1199_vm3 = vweird.f32 %v1586_v6 }
 0xf1e   :  { %vm1200_vm5 = vmor %vm1198_vm4, %vm1199_vm3 }
 0xf1f   :  { %v1195_v11 = vsub.f32 1.0, %v1194_v9  ;;  %v1138_v15 = vsel %vm1789_vm11, %v1478_v10, %v1134_v4 }
 0xf20   :  { %1141 = vrot.lane.b32.xlu0 %v1138_v15, %s1680_s26  ;;  %v1139_v29 = vmul.f32 %v1138_v15, %v1952_v20 }
 0xf21   :  { %v1196_v43 = vmul.f32 %v1586_v6, %v1195_v11 }
 0xf23   :  { %v1197_v0 = vadd.f32 %v1586_v6, %v1196_v43 }
 0xf25   :  { %v1201_v21 = vsel %vm1200_vm5, %v1586_v6, %v1197_v0 }
 0xf26   :  { %v1206_v22 = vsel %vm1203_vm6, %v1205_v7, %v1201_v21 }
 0xf27   :  { %v1208_v13 = vmul.f32 2.0, %v1206_v22 }
 0xf29   :  { %v1482_v16 = vadd.f32 -1.0, %v1208_v13 }
 0xf2b   :  { %v1210_v24 = vsel %vm1789_vm11, %v1482_v16, %v1206_v22 }
 0xf2c   :  { %1213 = vrot.lane.b32.xlu1 %v1210_v24, %s1680_s26  ;;  %v1211_v33 = vmul.f32 %v1210_v24, %v1957_v23 }
 0xf92   :  { %v1142_v8 = vpop.permute.xlu0 %1141 }
 0xf93   :  { %v1144_v26 = vmul.f32 %v1142_v8, %v1138_v15 }
 0xf95   :  { %1146 = vrot.lane.b32.xlu2 %v1144_v26, %s1687_s0 }
 0xf9e   :  { %v1214_v27 = vpop.permute.xlu1 %1213 }
 0xf9f   :  { %v1216_v28 = vmul.f32 %v1214_v27, %v1210_v24 }
 0xfa1   :  { %1218 = vrot.lane.b32.xlu0 %v1216_v28, %s1687_s0 }
 0xfef   :  { %v1147_v30 = vpop.permute.xlu2 %1146 }
 0xff0   :  { %v1980_v31 = vadd.f32 %v1147_v30, %v1139_v29 }
 0xff2   :  { %1587 = vtanh.f32 %v1980_v31 }
 0xff8   :  { %v1588_v32 = vpop.eup %1587 }
 0xff9   :  { %1152 = vrot.lane.b32.xlu1 %v1588_v32, %s1680_s26 }
0x1013   :  { %v1219_v34 = vpop.permute.xlu0 %1218 }
0x1014   :  { %v1985_v35 = vadd.f32 %v1219_v34, %v1211_v33 }
0x1016   :  { %1589 = vtanh.f32 %v1985_v35 }
0x101c   :  { %v1590_v37 = vpop.eup %1589 }
0x101d   :  { %1224 = vrot.lane.b32.xlu2 %v1590_v37, %s1680_s26 }
0x106b   :  { %v1153_v38 = vpop.permute.xlu1 %1152 }
0x106c   :  { %v1155_v20 = vmul.f32 %v1153_v38, %v1138_v15 }
0x106e   :  { %v1989_v39 = vpack.c.bf16 %v1155_v20, %v1155_v20 }
0x1070   :  { %v1240_v41 = vunpack.c.l.b16 %v1989_v39 }
0x1072   :  { %v1241_v42 = vpack.c.b16 %v1240_v41, %v1240_v41 }
0x1074   :  { %1242 = vrot.lane.b32.xlu0 %v1241_v42, %s1687_s0 }
0x1077   :  { %v1225_v45 = vpop.permute.xlu2 %1224 }
0x1078   :  { %v1227_v46 = vmul.f32 %v1225_v45, %v1210_v24 }
0x107a   :  { %v1993_v23 = vpack.c.bf16 %v1227_v46, %v1227_v46 }
0x107c   :  { %v1312_v47 = vunpack.c.l.b16 %v1993_v23 }
0x107e   :  { %v1313_v50 = vpack.c.b16 %v1312_v47, %v1312_v47 }
0x1080   :  { %1314 = vrot.lane.b32.xlu1 %v1313_v50, %s1687_s0  ;;  %v272_v50 = vrot.slane %v1809_v44, 3 }
0x1082   :  { %v276_v14 = vsel %vm273_vm15, %v1809_v44, %v272_v50 }
0x10e6   :  { %v1243_v51 = vpop.permute.xlu0 %1242 }
0x10e7   :  { %1484 = vmatmul.msk.bf16.vlgmr.msra.gmra.mxu0 %vm213_vm0, %v1243_v51  ;;  %v501_v51 = vrot.slane %v1845_v40, 3 }
0x10f2   :  { %v1315_v36 = vpop.permute.xlu1 %1314 }
0x10f3   :  { %1488 = vmatmul.msk.bf16.vlgmr.msra.gmra.mxu1 %vm213_vm0, %v1315_v36  ;;  %v504_v36 = vsel %vm273_vm15, %v1845_v40, %v501_v51 }
0x1164   :  { %v1256_v55 = vpop.f32.mrf.mxu0 }
0x1165   :  { %v1260_v56 = vadd.f32 %v1256_v55, %v1239_v53  ;;  %v723_v53 = vrot.slane %v1905_v5, 3 }
0x1167   :  { %v1485_v57 = vmul.f32 -1.442695, %v1260_v56  ;;  %v726_v55 = vsel %vm273_vm15, %v1905_v5, %v723_v53  ;;  %v942_v56 = vrot.slane %v1937_v2, 3 }
0x1169   :  { %1591 = vpow2.f32 %v1485_v57  ;;  %v945_v44 = vsel %vm273_vm15, %v1937_v2, %v942_v56  ;;  %v1158_v57 = vrot.slane %v1989_v39, 3 }
0x116b   :  { %v1161_v40 = vsel %vm273_vm15, %v1989_v39, %v1158_v57 }
0x116c   :  { %v1258_v59 = vpop.f32.mrf.mxu0 }
0x116f   :  { %v1592_v60 = vpop.eup %1591 }
0x1170   :  { %v1264_v62 = vadd.f32 1.0, %v1592_v60  ;;  %v1328_v1 = vpop.f32.mrf.mxu1 }
0x1171   :  { %v1332_v3 = vadd.f32 %v1328_v1, %v1311_v63 }
0x1172   :  { %1593 = vrcp.f32 %v1264_v62  ;;  %v1276_v17 = vand.u32 2147483648, %v1264_v62  ;;  %v1274_v19 = vand.u32 2147483647, %v1264_v62  ;;  %vm1270_vm7 = vweird.f32 %v1264_v62 }
0x1173   :  { %v1489_v4 = vmul.f32 -1.442695, %v1332_v3  ;;  %v352_v3 = vrot.slane %v1813_v49, 3 }
0x1174   :  { %v1277_v7 = vor.u32 1.1754944e-38, %v1276_v17  ;;  %vm1275_vm9 = vcmp.eq.f32.partialorder %v1274_v19, 8.507059e+37  ;;  %v1014_v17 = vrot.slane %v1961_v25, 3 }
0x1175   :  { %1595 = vpow2.f32 %v1489_v4  ;;  %v355_v39 = vsel %vm273_vm15, %v1813_v49, %v352_v3 }
0x1178   :  { %v1594_v54 = vpop.eup %1593  ;;  %v1330_v6 = vpop.f32.mrf.mxu1 }
0x1179   :  { %v1266_v9 = vmul.f32 %v1594_v54, %v1264_v62  ;;  %vm1271_vm0 = vweird.f32 %v1594_v54 }
0x117a   :  { %vm1272_vm8 = vmor %vm1270_vm7, %vm1271_vm0 }
0x117b   :  { %v1596_v10 = vpop.eup %1595  ;;  %v1267_v11 = vsub.f32 1.0, %v1266_v9 }
0x117c   :  { %v1336_v15 = vadd.f32 1.0, %v1596_v10  ;;  %v797_v10 = vrot.slane %v1909_v58, 3 }
0x117d   :  { %v1268_v43 = vmul.f32 %v1594_v54, %v1267_v11 }
0x117e   :  { %1597 = vrcp.f32 %v1336_v15  ;;  %v1348_v28 = vand.u32 2147483648, %v1336_v15  ;;  %v1346_v30 = vand.u32 2147483647, %v1336_v15  ;;  %vm1342_vm12 = vweird.f32 %v1336_v15 }
0x117f   :  { %v1269_v0 = vadd.f32 %v1594_v54, %v1268_v43  ;;  %v800_v11 = vsel %vm273_vm15, %v1909_v58, %v797_v10  ;;  %v870_v43 = vrot.slane %v1933_v18, 3  ;;  %v1017_v58 = vsel %vm273_vm15, %v1961_v25, %v1014_v17 }
0x1180   :  { %v1349_v33 = vor.u32 1.1754944e-38, %v1348_v28  ;;  %vm1347_vm14 = vcmp.eq.f32.partialorder %v1346_v30, 8.507059e+37  ;;  %v1086_v25 = vrot.slane %v1965_v12, 3 }
0x1181   :  { %v1273_v21 = vsel %vm1272_vm8, %v1594_v54, %v1269_v0  ;;  %v575_v54 = vrot.slane %v1873_v61, 3  ;;  %v873_v0 = vsel %vm273_vm15, %v1933_v18, %v870_v43 }
0x1182   :  { %v1278_v22 = vsel %vm1275_vm9, %v1277_v7, %v1273_v21  ;;  %v1089_v18 = vsel %vm273_vm15, %v1965_v12, %v1086_v25 }
0x1183   :  { %v1280_v13 = vmul.f32 2.0, %v1278_v22  ;;  %v578_v6 = vsel %vm273_vm15, %v1873_v61, %v575_v54  ;;  %v649_v61 = vrot.slane %v1877_v48, 3 }
0x1184   :  { %v1598_v16 = vpop.eup %1597 }
0x1185   :  { %v1338_v24 = vmul.f32 %v1598_v16, %v1336_v15  ;;  %v1486_v8 = vadd.f32 -1.0, %v1280_v13  ;;  %vm1343_vm10 = vweird.f32 %v1598_v16 }
0x1186   :  { %vm1344_vm13 = vmor %vm1342_vm12, %vm1343_vm10 }
0x1187   :  { %v1339_v26 = vsub.f32 1.0, %v1338_v24  ;;  %v2001_v27 = vsel %vm1789_vm11, %v1486_v8, %v1278_v22 }
0x1188   :  { %1285 = vrot.lane.b32.xlu2 %v2001_v27, %s1680_s26  ;;  %v1283_v59 = vmul.f32 %v2001_v27, %v1980_v31 }
0x1189   :  { %v1340_v29 = vmul.f32 %v1598_v16, %v1339_v26 }
0x118b   :  { %v1341_v32 = vadd.f32 %v1598_v16, %v1340_v29 }
0x118d   :  { %v1345_v34 = vsel %vm1344_vm13, %v1598_v16, %v1341_v32 }
0x118e   :  { %v1350_v37 = vsel %vm1347_vm14, %v1349_v33, %v1345_v34 }
0x118f   :  { %v1352_v38 = vmul.f32 2.0, %v1350_v37 }
0x1191   :  { %v1490_v20 = vadd.f32 -1.0, %v1352_v38 }
0x1193   :  { %v2007_v41 = vsel %vm1789_vm11, %v1490_v20, %v1350_v37  ;;  %vm281_vm11 = vcmask 253952  }
0x1194   :  { %1357 = vrot.lane.b32.xlu0 %v2007_v41, %s1680_s26  ;;  %v1355_v2 = vmul.f32 %v2007_v41, %v1985_v35  ;;  %v427_v35 = vrot.slane %v1841_v52, 3 }
0x1196   :  { %v430_v9 = vsel %vm273_vm15, %v1841_v52, %v427_v35  ;;  %v652_v52 = vsel %vm273_vm15, %v1877_v48, %v649_v61  ;;  %v1230_v48 = vrot.slane %v1993_v23, 3 }
0x1198   :  { %v1233_v7 = vsel %vm273_vm15, %v1993_v23, %v1230_v48 }
0x11e2   :  { %v1286_v42 = vpop.permute.xlu2 %1285 }
0x11e3   :  { %v1288_v45 = vmul.f32 %v1286_v42, %v2001_v27 }
0x11e5   :  { %1290 = vrot.lane.b32.xlu1 %v1288_v45, %s1687_s0 }
0x1206   :  { %v1358_v46 = vpop.permute.xlu0 %1357 }
0x1207   :  { %v1360_v47 = vmul.f32 %v1358_v46, %v2007_v41 }
0x1209   :  { %1362 = vrot.lane.b32.xlu2 %v1360_v47, %s1687_s0 }
0x1211   :  { %278 = vrot.lane.b32.xlu2 %v276_v14, %s1687_s0 }
0x1219   :  { %506 = vrot.lane.b32.xlu2 %v504_v36, %s1680_s26 }
0x1221   :  { %728 = vrot.lane.b32.xlu2 %v726_v55, %s1687_s0 }
0x1229   :  { %947 = vrot.lane.b32.xlu2 %v945_v44, %s1680_s26 }
0x1231   :  { %1163 = vrot.lane.b32.xlu2 %v1161_v40, %s1687_s0 }
0x1257   :  { %v1291_v5 = vpop.permute.xlu1 %1290 }
0x1258   :  { %v1293_v60 = vadd.f32 %v1291_v5, %v1283_v59 }
0x125a   :  { %1599 = vtanh.f32 %v1293_v60 }
0x1260   :  { %v1600_v62 = vpop.eup %1599 }
0x1261   :  { %1296 = vrot.lane.b32.xlu0 %v1600_v62, %s1680_s26 }
0x1263   :  { %v1363_v63 = vpop.permute.xlu2 %1362 }
0x1264   :  { %v1365_v1 = vadd.f32 %v1363_v63, %v1355_v2 }
0x1266   :  { %1601 = vtanh.f32 %v1365_v1 }
0x1269   :  { %357 = vrot.lane.b32.xlu0 %v355_v39, %s1680_s26 }
0x126b   :  { %v279_v31 = vpop.permute.xlu2 %278 }
0x126c   :  { %v1602_v4 = vpop.eup %1601  ;;  %282 = vst.msk [vmem:[%s2159_s4] sm:$0x1] %vm281_vm11, %v279_v31 }
0x126d   :  { %1368 = vrot.lane.b32.xlu1 %v1602_v4, %s1680_s26 }
0x1271   :  { %580 = vrot.lane.b32.xlu0 %v578_v6, %s1687_s0 }
0x1273   :  { %v507_v49 = vpop.permute.xlu2 %506 }
0x1274   :  { %1443 = vst.msk [vmem:[%s2159_s4 + $0x6] sm:$0x1] %vm361_vm1, %v507_v49 }
0x1275   :  { %432 = vrot.lane.b32.xlu1 %v430_v9, %s1687_s0 }
0x1279   :  { %802 = vrot.lane.b32.xlu0 %v800_v11, %s1680_s26 }
0x127b   :  { %v729_v15 = vpop.permute.xlu2 %728 }
0x127c   :  { %1455 = vst.msk [vmem:[%s2159_s4 + $0x3] sm:$0x1] %vm281_vm11, %v729_v15 }
0x127d   :  { %654 = vrot.lane.b32.xlu1 %v652_v52, %s1680_s26 }
0x1281   :  { %1019 = vrot.lane.b32.xlu0 %v1017_v58, %s1687_s0 }
0x1283   :  { %v948_v19 = vpop.permute.xlu2 %947 }
0x1284   :  { %1467 = vst.msk [vmem:[%s2159_s4 + $0x3] sm:$0x1] %vm361_vm1, %v948_v19 }
0x1285   :  { %875 = vrot.lane.b32.xlu1 %v873_v0, %s1687_s0 }
0x1289   :  { %1235 = vrot.lane.b32.xlu0 %v1233_v7, %s1680_s26 }
0x128b   :  { %v1164_v21 = vpop.permute.xlu2 %1163 }
0x128c   :  { %1479 = vst.msk [vmem:[%s2159_s4 + $0x6] sm:$0x1] %vm281_vm11, %v1164_v21 }
0x128d   :  { %1091 = vrot.lane.b32.xlu1 %v1089_v18, %s1680_s26 }
0x12d3   :  { %v1297_v22 = vpop.permute.xlu0 %1296 }
0x12d4   :  { %v1299_v13 = vmul.f32 %v1297_v22, %v2001_v27 }
0x12d6   :  { %v1300_v16 = vpack.c.bf16 %v1299_v13, %v1299_v13  ;;  %1384 = vrot.lane.b32.xlu0 %v1299_v13, %s1687_s0 }
0x12d8   :  { %v1302_v23 = vrot.slane %v1300_v16, 3 }
0x12da   :  { %v1305_v24 = vsel %vm273_vm15, %v1300_v16, %v1302_v23 }
0x12db   :  { %v358_v8 = vpop.permute.xlu0 %357  ;;  %1307 = vrot.lane.b32.xlu1 %v1305_v24, %s1687_s0 }
0x12dc   :  { %1435 = vst.msk [vmem:[%s2159_s4 + $0x7] sm:$0x1] %vm361_vm1, %v358_v8 }
0x12df   :  { %v1369_v12 = vpop.permute.xlu1 %1368 }
0x12e0   :  { %v1371_v26 = vmul.f32 %v1369_v12, %v2007_v41 }
0x12e2   :  { %v1372_v28 = vpack.c.bf16 %v1371_v26, %v1371_v26 }
0x12e3   :  { %v581_v29 = vpop.permute.xlu0 %580  ;;  %1390 = vrot.lane.b32.xlu1 %v1371_v26, %s1687_s0 }
0x12e4   :  { %v1374_v27 = vrot.slane %v1372_v28, 3  ;;  %1447 = vst.msk [vmem:[%s2159_s4 + $0x2] sm:$0x1] %vm281_vm11, %v581_v29 }
0x12e6   :  { %v1377_v30 = vsel %vm273_vm15, %v1372_v28, %v1374_v27 }
0x12e7   :  { %1379 = vrot.lane.b32.xlu2 %v1377_v30, %s1680_s26  ;;  %v433_v32 = vpop.permute.xlu1 %432 }
0x12e8   :  { %1439 = vst.msk [vmem:[%s2159_s4 + $0x1] sm:$0x1] %vm281_vm11, %v433_v32 }
0x12eb   :  { %v803_v33 = vpop.permute.xlu0 %802 }
0x12ec   :  { %1459 = vst.msk [vmem:[%s2159_s4 + $0x4] sm:$0x1] %vm361_vm1, %v803_v33 }
0x12ef   :  { %v655_v34 = vpop.permute.xlu1 %654 }
0x12f0   :  { %1451 = vst.msk [vmem:[%s2159_s4 + $0x5] sm:$0x1] %vm361_vm1, %v655_v34 }
0x12f3   :  { %v1020_v37 = vpop.permute.xlu0 %1019 }
0x12f4   :  { %1471 = vst.msk [vmem:[%s2159_s4 + $0x5] sm:$0x1] %vm281_vm11, %v1020_v37 }
0x12f7   :  { %v876_v38 = vpop.permute.xlu1 %875 }
0x12f8   :  { %1463 = vst.msk [vmem:[%s2159_s4 + $0x4] sm:$0x1] %vm281_vm11, %v876_v38 }
0x12fb   :  { %v1236_v20 = vpop.permute.xlu0 %1235 }
0x12fc   :  { %1483 = vst.msk [vmem:[%s2159_s4 + $0x1] sm:$0x1] %vm361_vm1, %v1236_v20 }
0x12ff   :  { %v1092_v41 = vpop.permute.xlu1 %1091 }
0x1300   :  { %1475 = vst.msk [vmem:[%s2159_s4 + $0x2] sm:$0x1] %vm361_vm1, %v1092_v41 }
0x1341   :  { %v1380_v42 = vpop.permute.xlu2 %1379 }
0x1342   :  { %1382 = vst.msk [vmem:[%s2159_s4] sm:$0x1] %vm361_vm1, %v1380_v42 }
0x1348   :  { %v1385_v45 = vpop.permute.xlu0 %1384 }
0x1349   :  { %1388 = vst.msk [vmem:[%s2160_s5] sm:$0x3] %vm1387_vm2, %v1385_v45 }
0x134d   :  { %v1308_v46 = vpop.permute.xlu1 %1307 }
0x134e   :  { %1487 = vst.msk [vmem:[%s2159_s4 + $0x7] sm:$0x1] %vm281_vm11, %v1308_v46 }
0x1355   :  { %v1391_v47 = vpop.permute.xlu1 %1390 }
0x1356   :  { %1491 = vst.msk [vmem:[%s2160_s5 + $0x2] sm:$0x3] %vm1387_vm2, %v1391_v47 }
0x1357   :  { %1403 = vsyncpa [#allocation4], 1 }
0x1358   :  { %1404 = vsyncpa [#allocation6], 1 }

</bundles_post_ra>
